<compile_context>
chip_gen: v7x
topology: tpu7x:2x2x1
jax: 0.10.0
libtpu: 0.0.40
codegen_flags: <defaults>
</compile_context>

<pallas_src>
import functools

import jax
import jax.numpy as jnp
from jax import lax
from jax.experimental import pallas as pl
from jax.experimental.pallas import tpu as pltpu


def _round_up(v, m):
    return (v + m - 1) // m * m


# ---------------------------------------------------------------------------
# Pallas kernel 1: tiled matmul + per-output-channel affine (1x1 convs, cls).
#   O = (X @ W) * scale + bias    with bf16 operands, f32 accumulation.
# ---------------------------------------------------------------------------
def _matmul_affine_kernel(x_ref, w_ref, s_ref, b_ref, o_ref, acc_ref):
    @pl.when(pl.program_id(2) == 0)
    def _():
        acc_ref[...] = jnp.zeros_like(acc_ref)

    acc_ref[...] += jnp.dot(x_ref[...], w_ref[...],
                            preferred_element_type=jnp.float32)

    @pl.when(pl.program_id(2) == pl.num_programs(2) - 1)
    def _():
        o_ref[...] = acc_ref[...] * s_ref[...] + b_ref[...]


def matmul_affine(x2d, w, scale, bias, *, tm=256, tn=256, tk=256):
    M, K = x2d.shape
    N = w.shape[1]
    tm = min(tm, _round_up(M, 128))
    tn = min(tn, _round_up(N, 128))
    tk = min(tk, _round_up(K, 128))
    Mp, Kp, Np = _round_up(M, tm), _round_up(K, tk), _round_up(N, tn)

    xb = jnp.pad(x2d, ((0, Mp - M), (0, Kp - K))).astype(jnp.bfloat16)
    wb = jnp.pad(w, ((0, Kp - K), (0, Np - N))).astype(jnp.bfloat16)
    sb = jnp.pad(scale.reshape(1, N), ((0, 0), (0, Np - N))).astype(jnp.float32)
    bb = jnp.pad(bias.reshape(1, N), ((0, 0), (0, Np - N))).astype(jnp.float32)

    cost = pl.CostEstimate(flops=2 * Mp * Np * Kp, transcendentals=0,
                           bytes_accessed=xb.size * 2 + wb.size * 2 + Mp * Np * 4)

    out = pl.pallas_call(
        _matmul_affine_kernel,
        out_shape=jax.ShapeDtypeStruct((Mp, Np), jnp.float32),
        grid=(Mp // tm, Np // tn, Kp // tk),
        in_specs=[
            pl.BlockSpec((tm, tk), lambda i, j, k: (i, k)),
            pl.BlockSpec((tk, tn), lambda i, j, k: (k, j)),
            pl.BlockSpec((1, tn), lambda i, j, k: (0, j)),
            pl.BlockSpec((1, tn), lambda i, j, k: (0, j)),
        ],
        out_specs=pl.BlockSpec((tm, tn), lambda i, j, k: (i, j)),
        scratch_shapes=[pltpu.VMEM((tm, tn), jnp.float32)],
        compiler_params=pltpu.CompilerParams(
            dimension_semantics=("parallel", "parallel", "arbitrary")),
        cost_estimate=cost,
    )(xb, wb, sb, bb)
    return out[:M, :N]


# ---------------------------------------------------------------------------
# Pallas kernel 2: 3x3 / pad=1 / stride=1 conv + fused BN affine, per batch.
# No im2col HBM buffer: nine shifted-window bf16 matmuls accumulated in a
# f32 VMEM scratch, affine epilogue, flat (H*W, N) output (reshaped in glue).
# ---------------------------------------------------------------------------
def _conv3x3_kernel(xp_ref, w_ref, s_ref, b_ref, o_ref, acc_ref):
    H = xp_ref.shape[1] - 2
    W = xp_ref.shape[2] - 2
    C = xp_ref.shape[3]
    acc_ref[...] = jnp.zeros_like(acc_ref)
    for t in range(9):                      # static unroll over the 9 taps
        dh, dw = t // 3, t % 3
        win = xp_ref[0, dh:dh + H, dw:dw + W, :]          # (H, W, C) bf16
        acc_ref[...] += jnp.dot(win.reshape(H * W, C), w_ref[t],
                                preferred_element_type=jnp.float32)
    o_ref[0] = acc_ref[...] * s_ref[...] + b_ref[...]


def conv3x3_bn(x, w, scale, bias):
    # x: (B, H, W, C) f32; w: (9, C, N); scale/bias: (N,)
    B, H, W, C = x.shape
    N = w.shape[-1]
    xp = jnp.pad(x, ((0, 0), (1, 1), (1, 1), (0, 0))).astype(jnp.bfloat16)
    out = pl.pallas_call(
        _conv3x3_kernel,
        out_shape=jax.ShapeDtypeStruct((B, H * W, N), jnp.float32),
        grid=(B,),
        in_specs=[
            pl.BlockSpec((1, H + 2, W + 2, C), lambda b: (b, 0, 0, 0)),
            pl.BlockSpec((9, C, N), lambda b: (0, 0, 0)),
            pl.BlockSpec((1, N), lambda b: (0, 0)),
            pl.BlockSpec((1, N), lambda b: (0, 0)),
        ],
        out_specs=pl.BlockSpec((1, H * W, N), lambda b: (b, 0, 0)),
        scratch_shapes=[pltpu.VMEM((H * W, N), jnp.float32)],
        compiler_params=pltpu.CompilerParams(dimension_semantics=("parallel",)),
    )(xp, w.astype(jnp.bfloat16),
      scale.reshape(1, N).astype(jnp.float32),
      bias.reshape(1, N).astype(jnp.float32))
    # TODO(synk): at production H/W this per-batch block should be row-tiled
    # (manual DMA of overlapping row windows) to fit v7x's 64 MiB VMEM.
    return out.reshape(B, H, W, N)


# ---------------------------------------------------------------------------
# Pallas kernel 3: criss-cross attention for one batch element (MXU einsums).
#   e_h[h,w,g] = sum_c q[h,w,c] k[g,w,c]   (-inf on g==h, the INF() term)
#   e_w[h,w,g] = sum_c q[h,w,c] k[h,g,c]
#   att = joint softmax over the concatenated (H+W) logits
#   out[h,w,:] = gamma * (sum_g att_h v[g,w,:] + sum_g att_w v[h,g,:]) + x[h,w,:]
# ---------------------------------------------------------------------------
def _cca_kernel(q_ref, k_ref, v_ref, x_ref, o_ref, *, gamma):
    q = q_ref[0]      # (H, W, Cqp) bf16
    k = k_ref[0]      # (H, W, Cqp) bf16
    v = v_ref[0]      # (H, W, C)   bf16
    xb = x_ref[0]     # (H, W, C)   f32
    H, W, _ = q.shape

    # column attention (same w, varying h'): (H, W, H) — MXU, f32 accumulate
    e_h = jnp.einsum('hwc,gwc->hwg', q, k, preferred_element_type=jnp.float32)
    row = lax.broadcasted_iota(jnp.int32, (H, W, H), 0)
    col = lax.broadcasted_iota(jnp.int32, (H, W, H), 2)
    e_h = jnp.where(row == col, -1e30, e_h)     # INF(): exclude self along H
    # row attention (same h, varying w'): (H, W, W)
    e_w = jnp.einsum('hwc,hgc->hwg', q, k, preferred_element_type=jnp.float32)

    # joint softmax over the concatenated (H + W) logits, without concatenation
    m = jnp.maximum(jnp.max(e_h, axis=-1, keepdims=True),
                    jnp.max(e_w, axis=-1, keepdims=True))
    p_h = jnp.exp(e_h - m)
    p_w = jnp.exp(e_w - m)
    inv = pl.reciprocal(jnp.sum(p_h, axis=-1, keepdims=True)
                        + jnp.sum(p_w, axis=-1, keepdims=True), approx=True)
    att_h = (p_h * inv).astype(v.dtype)
    att_w = (p_w * inv).astype(v.dtype)

    out_h = jnp.einsum('hwg,gwc->hwc', att_h, v, preferred_element_type=jnp.float32)
    out_w = jnp.einsum('hwg,hgc->hwc', att_w, v, preferred_element_type=jnp.float32)
    o_ref[0] = gamma * (out_h + out_w) + xb


def criss_cross_attention(feat, wq, bq, wk, bk, wv, bv, gamma):
    # feat: (B, H, W, C) NHWC f32
    B, H, W, C = feat.shape
    Cq = wq.shape[1]
    Cqp = _round_up(max(Cq, 1), 128)   # lane-dense q/k; zero pad cols are inert

    wq_p = jnp.pad(wq, ((0, 0), (0, Cqp - Cq)))
    wk_p = jnp.pad(wk, ((0, 0), (0, Cqp - Cq)))
    bq_p = jnp.pad(bq, (0, Cqp - Cq))
    bk_p = jnp.pad(bk, (0, Cqp - Cq))

    # fused q/k/v 1x1 conv: one pass over the activation
    w_qkv = jnp.concatenate([wq_p, wk_p, wv], axis=1)      # (C, 2*Cqp + C)
    b_qkv = jnp.concatenate([bq_p, bk_p, bv])
    flat = feat.reshape(B * H * W, C)
    qkv = matmul_affine(flat, w_qkv,
                        jnp.ones((2 * Cqp + C,), jnp.float32), b_qkv)
    q = qkv[:, :Cqp].reshape(B, H, W, Cqp).astype(jnp.bfloat16)
    k = qkv[:, Cqp:2 * Cqp].reshape(B, H, W, Cqp).astype(jnp.bfloat16)
    v = qkv[:, 2 * Cqp:].reshape(B, H, W, C).astype(jnp.bfloat16)

    kernel = functools.partial(_cca_kernel, gamma=float(gamma))
    return pl.pallas_call(
        kernel,
        out_shape=jax.ShapeDtypeStruct((B, H, W, C), jnp.float32),
        grid=(B,),
        in_specs=[
            pl.BlockSpec((1, H, W, Cqp), lambda b: (b, 0, 0, 0)),
            pl.BlockSpec((1, H, W, Cqp), lambda b: (b, 0, 0, 0)),
            pl.BlockSpec((1, H, W, C), lambda b: (b, 0, 0, 0)),
            pl.BlockSpec((1, H, W, C), lambda b: (b, 0, 0, 0)),
        ],
        out_specs=pl.BlockSpec((1, H, W, C), lambda b: (b, 0, 0, 0)),
        compiler_params=pltpu.CompilerParams(dimension_semantics=("parallel",)),
    )(q, k, v, feat)


# ---------------------------------------------------------------------------
# Parameters (deterministic, synthetic — no checkpoint loading).
# ---------------------------------------------------------------------------
def init_params(key, in_channels, out_channels, num_classes):
    inter = in_channels // 4
    cq = max(1, inter // 8)
    ks = jax.random.split(key, 8)

    def w(k, shape, s=0.05):
        return s * jax.random.normal(k, shape, jnp.float32)

    eps = 1e-5
    bn_scale = lambda n: jnp.full((n,), 1.0 / jnp.sqrt(1.0 + eps), jnp.float32)  # gamma=1, var=1
    bn_bias = lambda n: jnp.zeros((n,), jnp.float32)                              # beta=0, mean=0

    params = dict(
        conva_w=w(ks[0], (9, in_channels, inter)),
        conva_s=bn_scale(inter), conva_b=bn_bias(inter),
        wq=w(ks[1], (inter, cq)), bq=jnp.zeros((cq,), jnp.float32),
        wk=w(ks[2], (inter, cq)), bk=jnp.zeros((cq,), jnp.float32),
        wv=w(ks[3], (inter, inter)), bv=jnp.zeros((inter,), jnp.float32),
        gamma=0.5,  # PyTorch inits this nn.Parameter to 0; nonzero so the attention path is exercised
        convb_w=w(ks[4], (9, inter, inter)),
        convb_s=bn_scale(inter), convb_b=bn_bias(inter),
        bott_w=w(ks[5], (9, in_channels + inter, out_channels)),
        bott_s=bn_scale(out_channels), bott_b=bn_bias(out_channels),
        cls_w=w(ks[6], (out_channels, num_classes)),
        cls_b=w(ks[7], (num_classes,), 0.01),
    )
    return params, inter, cq


# ---------------------------------------------------------------------------
# RCCAModule.forward
# ---------------------------------------------------------------------------
def rcca_forward(x_nchw, params, recurrence=1):
    x = jnp.transpose(x_nchw, (0, 2, 3, 1))  # NCHW -> NHWC, f32
    B, H, W, _ = x.shape
    num_classes = params["cls_w"].shape[1]

    # conva: Conv3x3 (no bias) + BN
    out = conv3x3_bn(x, params["conva_w"], params["conva_s"], params["conva_b"])
    # recurrent criss-cross attention
    for _ in range(recurrence):
        out = criss_cross_attention(out, params["wq"], params["bq"],
                                    params["wk"], params["bk"],
                                    params["wv"], params["bv"], params["gamma"])
    # convb: Conv3x3 (no bias) + BN
    out = conv3x3_bn(out, params["convb_w"], params["convb_s"], params["convb_b"])
    # bottleneck: Conv3x3 on cat([x, out]) + BN + Dropout + Conv1x1(+bias)
    cat = jnp.concatenate([x, out], axis=-1)
    out = conv3x3_bn(cat, params["bott_w"], params["bott_s"], params["bott_b"])
    # TODO(synk): Dropout2d(0.1) is stochastic in train mode; identity here (eval semantics).
    out = matmul_affine(out.reshape(B * H * W, -1), params["cls_w"],
                        jnp.ones((num_classes,), jnp.float32), params["cls_b"])
    out = out.reshape(B, H, W, num_classes)
    return jnp.transpose(out, (0, 3, 1, 2))  # NHWC -> NCHW


if __name__ == "__main__":
    key = jax.random.PRNGKey(0)
    B, in_channels, H, W = 2, 64, 16, 16
    # out_channels=512 matches the hard-coded Conv2d(512, num_classes) in the module
    out_channels, num_classes = 512, 5

    kx, kp = jax.random.split(key)
    x = jax.random.normal(kx, (B, in_channels, H, W), jnp.float32)  # NCHW like PyTorch
    params, inter, cq = init_params(kp, in_channels, out_channels, num_classes)

    y = rcca_forward(x, params, recurrence=1)
    y = jax.block_until_ready(y)
    assert y.shape == (B, num_classes, H, W)
    assert bool(jnp.all(jnp.isfinite(y)))
    print("KERNEL_OK")
</pallas_src>

<mosaic_0001>
module attributes {stable_mosaic.version = 11 : i64} {
  func.func @_conv3x3_kernel(%arg0: i32, %arg1: memref<1x18x18x64xbf16, #tpu.memory_space<vmem>>, %arg2: memref<9x64x16xbf16, #tpu.memory_space<vmem>>, %arg3: memref<1x16xf32, #tpu.memory_space<vmem>>, %arg4: memref<1x16xf32, #tpu.memory_space<vmem>>, %arg5: memref<1x256x16xf32, #tpu.memory_space<vmem>>, %arg6: memref<256x16xf32, #tpu.memory_space<vmem>>) attributes {dimension_semantics = [#tpu.dimension_semantics<parallel>], iteration_bounds = array<i64: 2>, scalar_prefetch = 0 : i64, scratch_operands = 1 : i64, tpu.core_type = #tpu.core_type<tc>, window_params = [{transform_indices = @transform_0, window_bounds = array<i64: 1, 18, 18, 64>}, {pipeline_mode = #tpu.pipeline_mode<synchronous>, transform_indices = @transform_1, window_bounds = array<i64: 9, 64, 16>}, {pipeline_mode = #tpu.pipeline_mode<synchronous>, transform_indices = @transform_2, window_bounds = array<i64: 1, 16>}, {pipeline_mode = #tpu.pipeline_mode<synchronous>, transform_indices = @transform_3, window_bounds = array<i64: 1, 16>}, {transform_indices = @transform_4, window_bounds = array<i64: 1, 256, 16>}]} {
    %cst = arith.constant 0.000000e+00 : f32
    %0 = vector.broadcast %cst : f32 to vector<256x16xf32>
    %c0 = arith.constant 0 : index
    %c0_0 = arith.constant 0 : index
    %1 = vector.load %arg6[%c0, %c0_0] : memref<256x16xf32, #tpu.memory_space<vmem>>, vector<256x16xf32>
    tpu.vector_store %arg6[%c0, %c0_0], %0 {strides = array<i32>} : memref<256x16xf32, #tpu.memory_space<vmem>>, vector<256x16xf32>,
    %c0_1 = arith.constant 0 : index
    %c0_2 = arith.constant 0 : index
    %c0_3 = arith.constant 0 : index
    %c0_4 = arith.constant 0 : index
    %2 = vector.load %arg1[%c0_1, %c0_2, %c0_3, %c0_4] : memref<1x18x18x64xbf16, #tpu.memory_space<vmem>>, vector<1x16x16x64xbf16>
    %3 = vector.shape_cast %2 : vector<1x16x16x64xbf16> to vector<16x16x64xbf16>
    %c0_5 = arith.constant 0 : index
    %c0_6 = arith.constant 0 : index
    %4 = vector.load %arg6[%c0_5, %c0_6] : memref<256x16xf32, #tpu.memory_space<vmem>>, vector<256x16xf32>
    %5 = vector.shape_cast %3 : vector<16x16x64xbf16> to vector<256x64xbf16>
    %c0_7 = arith.constant 0 : index
    %c0_8 = arith.constant 0 : index
    %c0_9 = arith.constant 0 : index
    %6 = vector.load %arg2[%c0_7, %c0_8, %c0_9] : memref<9x64x16xbf16, #tpu.memory_space<vmem>>, vector<1x64x16xbf16>
    %7 = vector.shape_cast %6 : vector<1x64x16xbf16> to vector<64x16xbf16>
    %cst_10 = arith.constant dense<0.000000e+00> : vector<256x16xf32>
    %8 = tpu.matmul %5, %7, %cst_10 {dimension_numbers = #tpu.dot_dimension_numbers<[1], [0], [0], [1], [0, 0, 1, 1], [], []>} : vector<256x64xbf16>, vector<64x16xbf16>, vector<256x16xf32> -> vector<256x16xf32>
    %9 = arith.addf %4, %8 : vector<256x16xf32>
    %c0_11 = arith.constant 0 : index
    %c0_12 = arith.constant 0 : index
    %10 = vector.load %arg6[%c0_11, %c0_12] : memref<256x16xf32, #tpu.memory_space<vmem>>, vector<256x16xf32>
    tpu.vector_store %arg6[%c0_11, %c0_12], %9 {strides = array<i32>} : memref<256x16xf32, #tpu.memory_space<vmem>>, vector<256x16xf32>,
    %c0_13 = arith.constant 0 : index
    %c0_14 = arith.constant 0 : index
    %c1 = arith.constant 1 : index
    %c0_15 = arith.constant 0 : index
    %11 = vector.load %arg1[%c0_13, %c0_14, %c1, %c0_15] : memref<1x18x18x64xbf16, #tpu.memory_space<vmem>>, vector<1x16x16x64xbf16>
    %12 = vector.shape_cast %11 : vector<1x16x16x64xbf16> to vector<16x16x64xbf16>
    %c0_16 = arith.constant 0 : index
    %c0_17 = arith.constant 0 : index
    %13 = vector.load %arg6[%c0_16, %c0_17] : memref<256x16xf32, #tpu.memory_space<vmem>>, vector<256x16xf32>
    %14 = vector.shape_cast %12 : vector<16x16x64xbf16> to vector<256x64xbf16>
    %c1_18 = arith.constant 1 : index
    %c0_19 = arith.constant 0 : index
    %c0_20 = arith.constant 0 : index
    %15 = vector.load %arg2[%c1_18, %c0_19, %c0_20] : memref<9x64x16xbf16, #tpu.memory_space<vmem>>, vector<1x64x16xbf16>
    %16 = vector.shape_cast %15 : vector<1x64x16xbf16> to vector<64x16xbf16>
    %cst_21 = arith.constant dense<0.000000e+00> : vector<256x16xf32>
    %17 = tpu.matmul %14, %16, %cst_21 {dimension_numbers = #tpu.dot_dimension_numbers<[1], [0], [0], [1], [0, 0, 1, 1], [], []>} : vector<256x64xbf16>, vector<64x16xbf16>, vector<256x16xf32> -> vector<256x16xf32>
    %18 = arith.addf %13, %17 : vector<256x16xf32>
    %c0_22 = arith.constant 0 : index
    %c0_23 = arith.constant 0 : index
    %19 = vector.load %arg6[%c0_22, %c0_23] : memref<256x16xf32, #tpu.memory_space<vmem>>, vector<256x16xf32>
    tpu.vector_store %arg6[%c0_22, %c0_23], %18 {strides = array<i32>} : memref<256x16xf32, #tpu.memory_space<vmem>>, vector<256x16xf32>,
    %c0_24 = arith.constant 0 : index
    %c0_25 = arith.constant 0 : index
    %c2 = arith.constant 2 : index
    %c0_26 = arith.constant 0 : index
    %20 = vector.load %arg1[%c0_24, %c0_25, %c2, %c0_26] : memref<1x18x18x64xbf16, #tpu.memory_space<vmem>>, vector<1x16x16x64xbf16>
    %21 = vector.shape_cast %20 : vector<1x16x16x64xbf16> to vector<16x16x64xbf16>
    %c0_27 = arith.constant 0 : index
    %c0_28 = arith.constant 0 : index
    %22 = vector.load %arg6[%c0_27, %c0_28] : memref<256x16xf32, #tpu.memory_space<vmem>>, vector<256x16xf32>
    %23 = vector.shape_cast %21 : vector<16x16x64xbf16> to vector<256x64xbf16>
    %c2_29 = arith.constant 2 : index
    %c0_30 = arith.constant 0 : index
    %c0_31 = arith.constant 0 : index
    %24 = vector.load %arg2[%c2_29, %c0_30, %c0_31] : memref<9x64x16xbf16, #tpu.memory_space<vmem>>, vector<1x64x16xbf16>
    %25 = vector.shape_cast %24 : vector<1x64x16xbf16> to vector<64x16xbf16>
    %cst_32 = arith.constant dense<0.000000e+00> : vector<256x16xf32>
    %26 = tpu.matmul %23, %25, %cst_32 {dimension_numbers = #tpu.dot_dimension_numbers<[1], [0], [0], [1], [0, 0, 1, 1], [], []>} : vector<256x64xbf16>, vector<64x16xbf16>, vector<256x16xf32> -> vector<256x16xf32>
    %27 = arith.addf %22, %26 : vector<256x16xf32>
    %c0_33 = arith.constant 0 : index
    %c0_34 = arith.constant 0 : index
    %28 = vector.load %arg6[%c0_33, %c0_34] : memref<256x16xf32, #tpu.memory_space<vmem>>, vector<256x16xf32>
    tpu.vector_store %arg6[%c0_33, %c0_34], %27 {strides = array<i32>} : memref<256x16xf32, #tpu.memory_space<vmem>>, vector<256x16xf32>,
    %c0_35 = arith.constant 0 : index
    %c1_36 = arith.constant 1 : index
    %c0_37 = arith.constant 0 : index
    %c0_38 = arith.constant 0 : index
    %29 = vector.load %arg1[%c0_35, %c1_36, %c0_37, %c0_38] : memref<1x18x18x64xbf16, #tpu.memory_space<vmem>>, vector<1x16x16x64xbf16>
    %30 = vector.shape_cast %29 : vector<1x16x16x64xbf16> to vector<16x16x64xbf16>
    %c0_39 = arith.constant 0 : index
    %c0_40 = arith.constant 0 : index
    %31 = vector.load %arg6[%c0_39, %c0_40] : memref<256x16xf32, #tpu.memory_space<vmem>>, vector<256x16xf32>
    %32 = vector.shape_cast %30 : vector<16x16x64xbf16> to vector<256x64xbf16>
    %c3 = arith.constant 3 : index
    %c0_41 = arith.constant 0 : index
    %c0_42 = arith.constant 0 : index
    %33 = vector.load %arg2[%c3, %c0_41, %c0_42] : memref<9x64x16xbf16, #tpu.memory_space<vmem>>, vector<1x64x16xbf16>
    %34 = vector.shape_cast %33 : vector<1x64x16xbf16> to vector<64x16xbf16>
    %cst_43 = arith.constant dense<0.000000e+00> : vector<256x16xf32>
    %35 = tpu.matmul %32, %34, %cst_43 {dimension_numbers = #tpu.dot_dimension_numbers<[1], [0], [0], [1], [0, 0, 1, 1], [], []>} : vector<256x64xbf16>, vector<64x16xbf16>, vector<256x16xf32> -> vector<256x16xf32>
    %36 = arith.addf %31, %35 : vector<256x16xf32>
    %c0_44 = arith.constant 0 : index
    %c0_45 = arith.constant 0 : index
    %37 = vector.load %arg6[%c0_44, %c0_45] : memref<256x16xf32, #tpu.memory_space<vmem>>, vector<256x16xf32>
    tpu.vector_store %arg6[%c0_44, %c0_45], %36 {strides = array<i32>} : memref<256x16xf32, #tpu.memory_space<vmem>>, vector<256x16xf32>,
    %c0_46 = arith.constant 0 : index
    %c1_47 = arith.constant 1 : index
    %c1_48 = arith.constant 1 : index
    %c0_49 = arith.constant 0 : index
    %38 = vector.load %arg1[%c0_46, %c1_47, %c1_48, %c0_49] : memref<1x18x18x64xbf16, #tpu.memory_space<vmem>>, vector<1x16x16x64xbf16>
    %39 = vector.shape_cast %38 : vector<1x16x16x64xbf16> to vector<16x16x64xbf16>
    %c0_50 = arith.constant 0 : index
    %c0_51 = arith.constant 0 : index
    %40 = vector.load %arg6[%c0_50, %c0_51] : memref<256x16xf32, #tpu.memory_space<vmem>>, vector<256x16xf32>
    %41 = vector.shape_cast %39 : vector<16x16x64xbf16> to vector<256x64xbf16>
    %c4 = arith.constant 4 : index
    %c0_52 = arith.constant 0 : index
    %c0_53 = arith.constant 0 : index
    %42 = vector.load %arg2[%c4, %c0_52, %c0_53] : memref<9x64x16xbf16, #tpu.memory_space<vmem>>, vector<1x64x16xbf16>
    %43 = vector.shape_cast %42 : vector<1x64x16xbf16> to vector<64x16xbf16>
    %cst_54 = arith.constant dense<0.000000e+00> : vector<256x16xf32>
    %44 = tpu.matmul %41, %43, %cst_54 {dimension_numbers = #tpu.dot_dimension_numbers<[1], [0], [0], [1], [0, 0, 1, 1], [], []>} : vector<256x64xbf16>, vector<64x16xbf16>, vector<256x16xf32> -> vector<256x16xf32>
    %45 = arith.addf %40, %44 : vector<256x16xf32>
    %c0_55 = arith.constant 0 : index
    %c0_56 = arith.constant 0 : index
    %46 = vector.load %arg6[%c0_55, %c0_56] : memref<256x16xf32, #tpu.memory_space<vmem>>, vector<256x16xf32>
    tpu.vector_store %arg6[%c0_55, %c0_56], %45 {strides = array<i32>} : memref<256x16xf32, #tpu.memory_space<vmem>>, vector<256x16xf32>,
    %c0_57 = arith.constant 0 : index
    %c1_58 = arith.constant 1 : index
    %c2_59 = arith.constant 2 : index
    %c0_60 = arith.constant 0 : index
    %47 = vector.load %arg1[%c0_57, %c1_58, %c2_59, %c0_60] : memref<1x18x18x64xbf16, #tpu.memory_space<vmem>>, vector<1x16x16x64xbf16>
    %48 = vector.shape_cast %47 : vector<1x16x16x64xbf16> to vector<16x16x64xbf16>
    %c0_61 = arith.constant 0 : index
    %c0_62 = arith.constant 0 : index
    %49 = vector.load %arg6[%c0_61, %c0_62] : memref<256x16xf32, #tpu.memory_space<vmem>>, vector<256x16xf32>
    %50 = vector.shape_cast %48 : vector<16x16x64xbf16> to vector<256x64xbf16>
    %c5 = arith.constant 5 : index
    %c0_63 = arith.constant 0 : index
    %c0_64 = arith.constant 0 : index
    %51 = vector.load %arg2[%c5, %c0_63, %c0_64] : memref<9x64x16xbf16, #tpu.memory_space<vmem>>, vector<1x64x16xbf16>
    %52 = vector.shape_cast %51 : vector<1x64x16xbf16> to vector<64x16xbf16>
    %cst_65 = arith.constant dense<0.000000e+00> : vector<256x16xf32>
    %53 = tpu.matmul %50, %52, %cst_65 {dimension_numbers = #tpu.dot_dimension_numbers<[1], [0], [0], [1], [0, 0, 1, 1], [], []>} : vector<256x64xbf16>, vector<64x16xbf16>, vector<256x16xf32> -> vector<256x16xf32>
    %54 = arith.addf %49, %53 : vector<256x16xf32>
    %c0_66 = arith.constant 0 : index
    %c0_67 = arith.constant 0 : index
    %55 = vector.load %arg6[%c0_66, %c0_67] : memref<256x16xf32, #tpu.memory_space<vmem>>, vector<256x16xf32>
    tpu.vector_store %arg6[%c0_66, %c0_67], %54 {strides = array<i32>} : memref<256x16xf32, #tpu.memory_space<vmem>>, vector<256x16xf32>,
    %c0_68 = arith.constant 0 : index
    %c2_69 = arith.constant 2 : index
    %c0_70 = arith.constant 0 : index
    %c0_71 = arith.constant 0 : index
    %56 = vector.load %arg1[%c0_68, %c2_69, %c0_70, %c0_71] : memref<1x18x18x64xbf16, #tpu.memory_space<vmem>>, vector<1x16x16x64xbf16>
    %57 = vector.shape_cast %56 : vector<1x16x16x64xbf16> to vector<16x16x64xbf16>
    %c0_72 = arith.constant 0 : index
    %c0_73 = arith.constant 0 : index
    %58 = vector.load %arg6[%c0_72, %c0_73] : memref<256x16xf32, #tpu.memory_space<vmem>>, vector<256x16xf32>
    %59 = vector.shape_cast %57 : vector<16x16x64xbf16> to vector<256x64xbf16>
    %c6 = arith.constant 6 : index
    %c0_74 = arith.constant 0 : index
    %c0_75 = arith.constant 0 : index
    %60 = vector.load %arg2[%c6, %c0_74, %c0_75] : memref<9x64x16xbf16, #tpu.memory_space<vmem>>, vector<1x64x16xbf16>
    %61 = vector.shape_cast %60 : vector<1x64x16xbf16> to vector<64x16xbf16>
    %cst_76 = arith.constant dense<0.000000e+00> : vector<256x16xf32>
    %62 = tpu.matmul %59, %61, %cst_76 {dimension_numbers = #tpu.dot_dimension_numbers<[1], [0], [0], [1], [0, 0, 1, 1], [], []>} : vector<256x64xbf16>, vector<64x16xbf16>, vector<256x16xf32> -> vector<256x16xf32>
    %63 = arith.addf %58, %62 : vector<256x16xf32>
    %c0_77 = arith.constant 0 : index
    %c0_78 = arith.constant 0 : index
    %64 = vector.load %arg6[%c0_77, %c0_78] : memref<256x16xf32, #tpu.memory_space<vmem>>, vector<256x16xf32>
    tpu.vector_store %arg6[%c0_77, %c0_78], %63 {strides = array<i32>} : memref<256x16xf32, #tpu.memory_space<vmem>>, vector<256x16xf32>,
    %c0_79 = arith.constant 0 : index
    %c2_80 = arith.constant 2 : index
    %c1_81 = arith.constant 1 : index
    %c0_82 = arith.constant 0 : index
    %65 = vector.load %arg1[%c0_79, %c2_80, %c1_81, %c0_82] : memref<1x18x18x64xbf16, #tpu.memory_space<vmem>>, vector<1x16x16x64xbf16>
    %66 = vector.shape_cast %65 : vector<1x16x16x64xbf16> to vector<16x16x64xbf16>
    %c0_83 = arith.constant 0 : index
    %c0_84 = arith.constant 0 : index
    %67 = vector.load %arg6[%c0_83, %c0_84] : memref<256x16xf32, #tpu.memory_space<vmem>>, vector<256x16xf32>
    %68 = vector.shape_cast %66 : vector<16x16x64xbf16> to vector<256x64xbf16>
    %c7 = arith.constant 7 : index
    %c0_85 = arith.constant 0 : index
    %c0_86 = arith.constant 0 : index
    %69 = vector.load %arg2[%c7, %c0_85, %c0_86] : memref<9x64x16xbf16, #tpu.memory_space<vmem>>, vector<1x64x16xbf16>
    %70 = vector.shape_cast %69 : vector<1x64x16xbf16> to vector<64x16xbf16>
    %cst_87 = arith.constant dense<0.000000e+00> : vector<256x16xf32>
    %71 = tpu.matmul %68, %70, %cst_87 {dimension_numbers = #tpu.dot_dimension_numbers<[1], [0], [0], [1], [0, 0, 1, 1], [], []>} : vector<256x64xbf16>, vector<64x16xbf16>, vector<256x16xf32> -> vector<256x16xf32>
    %72 = arith.addf %67, %71 : vector<256x16xf32>
    %c0_88 = arith.constant 0 : index
    %c0_89 = arith.constant 0 : index
    %73 = vector.load %arg6[%c0_88, %c0_89] : memref<256x16xf32, #tpu.memory_space<vmem>>, vector<256x16xf32>
    tpu.vector_store %arg6[%c0_88, %c0_89], %72 {strides = array<i32>} : memref<256x16xf32, #tpu.memory_space<vmem>>, vector<256x16xf32>,
    %c0_90 = arith.constant 0 : index
    %c2_91 = arith.constant 2 : index
    %c2_92 = arith.constant 2 : index
    %c0_93 = arith.constant 0 : index
    %74 = vector.load %arg1[%c0_90, %c2_91, %c2_92, %c0_93] : memref<1x18x18x64xbf16, #tpu.memory_space<vmem>>, vector<1x16x16x64xbf16>
    %75 = vector.shape_cast %74 : vector<1x16x16x64xbf16> to vector<16x16x64xbf16>
    %c0_94 = arith.constant 0 : index
    %c0_95 = arith.constant 0 : index
    %76 = vector.load %arg6[%c0_94, %c0_95] : memref<256x16xf32, #tpu.memory_space<vmem>>, vector<256x16xf32>
    %77 = vector.shape_cast %75 : vector<16x16x64xbf16> to vector<256x64xbf16>
    %c8 = arith.constant 8 : index
    %c0_96 = arith.constant 0 : index
    %c0_97 = arith.constant 0 : index
    %78 = vector.load %arg2[%c8, %c0_96, %c0_97] : memref<9x64x16xbf16, #tpu.memory_space<vmem>>, vector<1x64x16xbf16>
    %79 = vector.shape_cast %78 : vector<1x64x16xbf16> to vector<64x16xbf16>
    %cst_98 = arith.constant dense<0.000000e+00> : vector<256x16xf32>
    %80 = tpu.matmul %77, %79, %cst_98 {dimension_numbers = #tpu.dot_dimension_numbers<[1], [0], [0], [1], [0, 0, 1, 1], [], []>} : vector<256x64xbf16>, vector<64x16xbf16>, vector<256x16xf32> -> vector<256x16xf32>
    %81 = arith.addf %76, %80 : vector<256x16xf32>
    %c0_99 = arith.constant 0 : index
    %c0_100 = arith.constant 0 : index
    %82 = vector.load %arg6[%c0_99, %c0_100] : memref<256x16xf32, #tpu.memory_space<vmem>>, vector<256x16xf32>
    tpu.vector_store %arg6[%c0_99, %c0_100], %81 {strides = array<i32>} : memref<256x16xf32, #tpu.memory_space<vmem>>, vector<256x16xf32>,
    %c0_101 = arith.constant 0 : index
    %c0_102 = arith.constant 0 : index
    %83 = vector.load %arg6[%c0_101, %c0_102] : memref<256x16xf32, #tpu.memory_space<vmem>>, vector<256x16xf32>
    %c0_103 = arith.constant 0 : index
    %c0_104 = arith.constant 0 : index
    %84 = vector.load %arg3[%c0_103, %c0_104] : memref<1x16xf32, #tpu.memory_space<vmem>>, vector<1x16xf32>
    %85 = vector.broadcast %84 : vector<1x16xf32> to vector<256x16xf32>
    %86 = arith.mulf %83, %85 : vector<256x16xf32>
    %c0_105 = arith.constant 0 : index
    %c0_106 = arith.constant 0 : index
    %87 = vector.load %arg4[%c0_105, %c0_106] : memref<1x16xf32, #tpu.memory_space<vmem>>, vector<1x16xf32>
    %88 = vector.broadcast %87 : vector<1x16xf32> to vector<256x16xf32>
    %89 = arith.addf %86, %88 : vector<256x16xf32>
    %c0_107 = arith.constant 0 : index
    %c0_108 = arith.constant 0 : index
    %c0_109 = arith.constant 0 : index
    %90 = vector.load %arg5[%c0_107, %c0_108, %c0_109] : memref<1x256x16xf32, #tpu.memory_space<vmem>>, vector<1x256x16xf32>
    %91 = vector.shape_cast %90 : vector<1x256x16xf32> to vector<256x16xf32>
    %92 = vector.shape_cast %89 : vector<256x16xf32> to vector<1x256x16xf32>
    tpu.vector_store %arg5[%c0_107, %c0_108, %c0_109], %92 {strides = array<i32>} : memref<1x256x16xf32, #tpu.memory_space<vmem>>, vector<1x256x16xf32>,
    return
  }
  func.func @transform_0(%arg0: i32) -> (i32, i32, i32, i32) {
    %c0_i32 = arith.constant 0 : i32
    %c0_i32_0 = arith.constant 0 : i32
    %c0_i32_1 = arith.constant 0 : i32
    %c0_i32_2 = arith.constant 0 : i32
    return %arg0, %c0_i32, %c0_i32_0, %c0_i32_1 : i32, i32, i32, i32
  }
  func.func @transform_1(%arg0: i32) -> (i32, i32, i32) {
    %c0_i32 = arith.constant 0 : i32
    %c0_i32_0 = arith.constant 0 : i32
    %c0_i32_1 = arith.constant 0 : i32
    %c0_i32_2 = arith.constant 0 : i32
    return %c0_i32, %c0_i32_0, %c0_i32_1 : i32, i32, i32
  }
  func.func @transform_2(%arg0: i32) -> (i32, i32) {
    %c0_i32 = arith.constant 0 : i32
    %c0_i32_0 = arith.constant 0 : i32
    %c0_i32_1 = arith.constant 0 : i32
    return %c0_i32, %c0_i32_0 : i32, i32
  }
  func.func @transform_3(%arg0: i32) -> (i32, i32) {
    %c0_i32 = arith.constant 0 : i32
    %c0_i32_0 = arith.constant 0 : i32
    %c0_i32_1 = arith.constant 0 : i32
    return %c0_i32, %c0_i32_0 : i32, i32
  }
  func.func @transform_4(%arg0: i32) -> (i32, i32, i32) {
    %c0_i32 = arith.constant 0 : i32
    %c0_i32_0 = arith.constant 0 : i32
    %c0_i32_1 = arith.constant 0 : i32
    return %arg0, %c0_i32, %c0_i32_0 : i32, i32, i32
  }
}

</mosaic_0001>

<bundles_post_ra>
// kernel: tpu_custom_call.1
= control target key start
LH: loop header
LB: loop body
LE: loop exit
PB: predicated region body
PF: predicated region fallthrough
CT: control target
= control target key end

     0   :  { %s7404_s15 = smov 0   ;;  %s9207_s0 = inlined_call_operand.vmem [shape: bf16[2,18,18,64], index: 0, kind: input, shape index: {}]   ;;  %s9208_s1 = inlined_call_operand.vmem [shape: bf16[9,64,16], index: 1, kind: input, shape index: {}]   ;;  %s9209_s2 = inlined_call_operand.vmem [shape: f32[1,16], index: 2, kind: input, shape index: {}]   ;;  %s9210_s3 = inlined_call_operand.vmem [shape: f32[1,16], index: 3, kind: input, shape index: {}]   ;;  %s9211_s4 = inlined_call_operand.vmem [shape: f32[2,256,16], index: 4, kind: output, shape index: {}]  }
   0x1 LB: > { %s6023_s16 = sadd.s32 4294967295, %s7376_s15   ;;  %p6027_p0 = scmp.ge.s32.totalorder %s7376_s15, 1  ;;  %s7376_s15 = sphi %s7404_s15, %s14_s15  }
   0x2   : > { %p162_p1 = scmp.lt.s32.totalorder %s7376_s15, 3 }
   0x4   : > { %p163_p2 = pnand %p6027_p0, %p162_p1 }
   0x5   : > { %v7286_v0 = vld [vmem:[%s9208_s1] sm:$0xff] (!%p163_p2)   ;;  %p188_p3 = scmp.lt.s32.totalorder (!%p163_p2), %s6023_s16, 1  ;;  %v7287_v1 = vld [vmem:[%s9208_s1 + $0x8] sm:$0xff] (!%p163_p2)   ;;  %v7288_v2 = vld [vmem:[%s9208_s1 + $0x10] sm:$0xff] (!%p163_p2)   ;;  %vm408_vm0 = vcmask (!%p163_p2), 523264   ;;  %vm1631_vm3 = vcmask (!%p163_p2), 1042432  }
   0x6   : > { %166 = sbr.rel (%p163_p2) target bundleno = 592 (0x250), region = 36  ;;  %7268 = vmatprep.subr.bf16.mxu1 (!%p163_p2), %v7286_v0  ;;  %6908 = vmatprep.subr.bf16.mxu0 (!%p163_p2), %v7286_v0  ;;  %v7289_v4 = vld [vmem:[%s9208_s1 + $0x18] sm:$0xff] (!%p163_p2)   ;;  %v7292_v6 = vld [vmem:[%s9208_s1 + $0x20] sm:$0xff] (!%p163_p2)   ;;  %v7297_v11 = vld [vmem:[%s9208_s1 + $0x28] sm:$0xff] (!%p163_p2)   ;;  %vm762_vm1 = vsmask.f32 (!%p163_p2), 3328 }
   0x7   : > { %7272 = vmatpush3.bf16.msra.mxu1 (!%p163_p2), %v7286_v0  ;;  %6909 = vmatpush3.bf16.msra.mxu0 (!%p163_p2), %v7286_v0  ;;  %v7298_v7 = vld [vmem:[%s9208_s1 + $0x40] sm:$0xff] (!%p163_p2)   ;;  %v7304_v13 = vld [vmem:[%s9208_s1 + $0x48] sm:$0xff] (!%p163_p2)   ;;  %v7303_v15 = vld [vmem:[%s9208_s1 + $0x30] sm:$0xff] (!%p163_p2)   ;;  %vm763_vm2 = vsmask.f32 (!%p163_p2), 7440  ;;  %vm1632_vm4 = vcmask (!%p163_p2), 1046532  }
   0x8   : > { %7269 = vmatprep.subr.bf16.mxu1 (!%p163_p2), %v7287_v1  ;;  %6910 = vmatprep.subr.bf16.mxu0 (!%p163_p2), %v7287_v1  ;;  %v7309_v19 = vld [vmem:[%s9208_s1 + $0x38] sm:$0xff] (!%p163_p2)   ;;  %v7310_v20 = vld [vmem:[%s9208_s1 + $0x50] sm:$0xff] (!%p163_p2)   ;;  %v7486_v46 = vld [vmem:[%s9208_s1 + $0x60] sm:$0xff] (!%p163_p2)   ;;  %vm199_vm7 = vcmask (!%p163_p2), 130048  }
   0x9   : > { %vm7490_vm5 = vmor (!%p163_p2), %vm762_vm1, %vm763_vm2  ;;  %v7314_v57 = vld [vmem:[%s9208_s1 + $0x58] sm:$0xff] (!%p163_p2)   ;;  %v7503_v58 = vld [vmem:[%s9208_s1 + $0x80] sm:$0xff] (!%p163_p2)  }
   0xa   : > { %vm7526_vm6 = vmor (!%p163_p2), %vm1631_vm3, %vm1632_vm4 }
   0xb   : > { %7273 = vmatpush3.bf16.msra.mxu1 (!%p163_p2), %v7287_v1  ;;  %6911 = vmatpush3.bf16.msra.mxu0 (!%p163_p2), %v7287_v1 }
   0xc   : > { %7270 = vmatprep.subr.bf16.mxu1 (!%p163_p2), %v7288_v2  ;;  %6912 = vmatprep.subr.bf16.mxu0 (!%p163_p2), %v7288_v2 }
   0xd   : > { %s9217_s16 = smov (!%p188_p3, %s6023_s16), 1 }
   0xe   : > { %s7276_s23 = smul.u32 216, %s9217_s16  ;;  %s6727_s24 = sshll.u32 %s9217_s16, 8 }
   0xf   : > { %7274 = vmatpush3.bf16.msra.mxu1 %v7288_v2  ;;  %6913 = vmatpush3.bf16.msra.mxu0 %v7288_v2  ;;  %s9027_s29 = scalar_lea.vmem %s9211_s4, %s6727_s24 }
  0x10   : > { %s7427_s26 = scalar_lea.vmem %s9207_s0, %s7276_s23  ;;  %7271 = vmatprep.subr.bf16.mxu1 %v7289_v4  ;;  %6914 = vmatprep.subr.bf16.mxu0 %v7289_v4 }
  0x11   : > { %v7290_v3 = vld [vmem:[%s7427_s26 + $0x60] sm:$0xff]   ;;  %v7291_v8 = vld [vmem:[%s7427_s26 + $0x6c] sm:$0xff]   ;;  %v7294_v10 = vld [vmem:[%s7427_s26 + $0x78] sm:$0xff]  }
  0x12   : > { %6932 = vmatprep.mubr.msk.bf16.mxu1 %vm408_vm0, %v7290_v3  ;;  %v7293_v5 = vld [vmem:[%s7427_s26] sm:$0xff]   ;;  %v7295_v9 = vld [vmem:[%s7427_s26 + $0xc] sm:$0xff]   ;;  %v7299_v12 = vld [vmem:[%s7427_s26 + $0x18] sm:$0xff]  }
  0x13   : > { %6916 = vmatprep.mubr.msk.bf16.mxu0 %vm408_vm0, %v7293_v5  ;;  %7275 = vmatpush3.bf16.msra.mxu1 %v7289_v4  ;;  %v7296_v14 = vld [vmem:[%s7427_s26 + $0x84] sm:$0xff]   ;;  %v7300_v16 = vld [vmem:[%s7427_s26 + $0x90] sm:$0xff]   ;;  %v682_v21 = vld [vmem:[%s7427_s26] sm:$0xf] }
  0x14   : > { %6915 = vmatpush3.bf16.msra.mxu0 %v7289_v4  ;;  %6948 = vmatprep.subr.bf16.mxu1 %v7292_v6  ;;  %v7301_v17 = vld [vmem:[%s7427_s26 + $0x24] sm:$0xff]   ;;  %v7305_v18 = vld [vmem:[%s7427_s26 + $0x30] sm:$0xff]   ;;  %v766_v24 = vshrl.u32 %v682_v21, 16  ;;  %v769_v25 = vshll.u32 %v682_v21, 16  ;;  %v7302_v26 = vld [vmem:[%s7427_s26 + $0x9c] sm:$0xff]  }
  0x15   : > { %6988 = vmatprep.subr.bf16.mxu0 %v7298_v7  ;;  %v683_v22 = vld [vmem:[%s7427_s26 + $0x4] sm:$0xf]  ;;  %v684_v23 = vld [vmem:[%s7427_s26 + $0x8] sm:$0x1]  ;;  %v7307_v27 = vld [vmem:[%s7427_s26 + $0x3c] sm:$0xff]  }
  0x16   : > { %6933 = vmatmul.mubr.msk.bf16.vlgmr.msra.gmra.mrb[0].mxu1 %vm408_vm0, %v7291_v8  ;;  %v775_v28 = vshll.u32 %v683_v22, 16  ;;  %v779_v29 = vshrl.u32 %v683_v22, 16  ;;  %v785_v30 = vshll.u32 %v684_v23, 16  ;;  %v7306_v31 = vld [vmem:[%s7427_s26 + $0xa8] sm:$0xff]   ;;  %v768_v33 = vrot.slane %v766_v24, 4  ;;  %v7308_v1 = vld [vmem:[%s7427_s26 + $0xb4] sm:$0xff]  }
  0x17   : > { %6917 = vmatmul.mubr.msk.bf16.vlgmr.msra.gmra.mrb[0].mxu0 %vm408_vm0, %v7295_v9  ;;  %6949 = vmatpush3.bf16.msra.mxu1 %v7292_v6  ;;  %v7311_v32 = vld [vmem:[%s7427_s26 + $0x48] sm:$0xff]   ;;  %v771_v34 = vrot.slane %v769_v25, 5  ;;  %v686_v39 = vld [vmem:[%s7427_s26 + $0x10] sm:$0xf]  ;;  %v687_v42 = vld [vmem:[%s7427_s26 + $0x14] sm:$0x1] }
  0x18   : > { %6936 = vmatprep.mubr.msk.bf16.mxu1 %vm408_vm0, %v7294_v10  ;;  %6950 = vmatprep.subr.bf16.mxu1 %v7297_v11  ;;  %v685_v35 = vld [vmem:[%s7427_s26 + $0xc] sm:$0xf]  ;;  %v777_v36 = vrot.slane %v775_v28, 5  ;;  %v781_v37 = vrot.slane %v779_v29, 4  ;;  %v787_v38 = vrot.slane %v785_v30, 5  ;;  %v799_v44 = vshll.u32 %v686_v39, 16 }
  0x19   : > { %6989 = vmatpush3.bf16.msra.mxu0 %v7298_v7  ;;  %6920 = vmatprep.mubr.msk.bf16.mxu0 %vm408_vm0, %v7299_v12  ;;  %v790_v40 = vshrl.u32 %v685_v35, 16  ;;  %v772_v41 = vor.u32 %v771_v34, %v768_v33  ;;  %v793_v43 = vshll.u32 %v685_v35, 16  ;;  %v803_v45 = vshrl.u32 %v686_v39, 16  ;;  %v688_v62 = vld [vmem:[%s7427_s26 + $0x18] sm:$0xf] }
  0x1a   : > { %6990 = vmatprep.subr.bf16.mxu0 %v7304_v13  ;;  %v782_v48 = vor.u32 %v781_v37, %v777_v36  ;;  %v809_v50 = vshll.u32 %v687_v42, 16  ;;  %v801_v53 = vrot.slane %v799_v44, 5  ;;  %v689_v63 = vld [vmem:[%s7427_s26 + $0x1c] sm:$0xf]  ;;  %v690_v0 = vld [vmem:[%s7427_s26 + $0x20] sm:$0x1] }
  0x1b   : > { %6951 = vmatpush3.bf16.msra.mxu1 %v7297_v11  ;;  %v792_v49 = vrot.slane %v790_v40, 4  ;;  %v773_v51 = vrot.slane %v772_v41, 4  ;;  %v795_v52 = vrot.slane %v793_v43, 5  ;;  %v805_v54 = vrot.slane %v803_v45, 4  ;;  %v1503_v6 = vld [vmem:[%s7427_s26] sm:$0xe] }
  0x1c   : > { %6952 = vmatprep.subr.bf16.mxu1 %v7303_v15  ;;  %v783_v55 = vrot.slane %v782_v48, 4  ;;  %v811_v56 = vrot.slane %v809_v50, 5  ;;  %v814_v3 = vshrl.u32 %v688_v62, 16  ;;  %v817_v4 = vshll.u32 %v688_v62, 16  ;;  %v7312_v8 = vld [vmem:[%s7427_s26 + $0x54] sm:$0xff]  }
  0x1d   : > { %6991 = vmatpush3.bf16.msra.mxu0 %v7304_v13  ;;  %v778_v59 = vsel %vm7490_vm5, %v773_v51, %v777_v36  ;;  %v796_v60 = vor.u32 %v795_v52, %v792_v49  ;;  %v806_v61 = vor.u32 %v805_v54, %v801_v53  ;;  %v823_v5 = vshll.u32 %v689_v63, 16  ;;  %v1504_v12 = vld [vmem:[%s7427_s26 + $0x4] sm:$0xf]  ;;  %v692_v24 = vld [vmem:[%s7427_s26 + $0x28] sm:$0xf] }
  0x1e   : > { %6937 = vmatmul.mubr.msk.bf16.gmra.mrb[4].mxu1 %vm408_vm0, %v7296_v14  ;;  %6992 = vmatprep.subr.bf16.mxu0 %v7310_v20  ;;  %v788_v2 = vsel %vm7490_vm5, %v783_v55, %v787_v38  ;;  %v827_v11 = vshrl.u32 %v689_v63, 16  ;;  %v816_v13 = vrot.slane %v814_v3, 4  ;;  %v819_v14 = vrot.slane %v817_v4, 5  ;;  %v691_v23 = vld [vmem:[%s7427_s26 + $0x24] sm:$0xf] }
  0x1f   : > { %6921 = vmatmul.mubr.msk.bf16.gmra.mrb[4].mxu0 %vm408_vm0, %v7301_v17  ;;  %6940 = vmatprep.mubr.msk.bf16.mxu1 %vm408_vm0, %v7300_v16  ;;  %v6075_v7 = vcombine.low %v778_v59, %v788_v2  ;;  %v797_v9 = vrot.slane %v796_v60, 4  ;;  %v807_v10 = vrot.slane %v806_v61, 4  ;;  %v833_v16 = vshll.u32 %v690_v0, 16  ;;  %v1505_v17 = vld [vmem:[%s7427_s26 + $0x8] sm:$0x1] }
  0x20   : > { %6953 = vmatpush3.bf16.msra.mxu1 %v7303_v15  ;;  %6924 = vmatprep.mubr.msk.bf16.mxu0 %vm408_vm0, %v7305_v18  ;;  %v825_v15 = vrot.slane %v823_v5, 5  ;;  %v6111_v22 = vrot.slane %v1503_v6, 9  ;;  %v1636_v28 = vrot.slane %v1504_v12, 5  ;;  %v693_v29 = vld [vmem:[%s7427_s26 + $0x2c] sm:$0x1]  ;;  %v841_v33 = vshll.u32 %v691_v23, 16 }
  0x21   : > { %6954 = vmatprep.subr.bf16.mxu1 %v7309_v19  ;;  %6993 = vmatpush3.bf16.msra.mxu0 %v7310_v20  ;;  %v802_v18 = vsel %vm7490_vm5, %v797_v9, %v801_v53  ;;  %v829_v20 = vrot.slane %v827_v11, 4  ;;  %v1506_v34 = vld [vmem:[%s7427_s26 + $0xc] sm:$0xe]  ;;  %v1507_v35 = vld [vmem:[%s7427_s26 + $0x10] sm:$0xf]  ;;  %v847_v39 = vshll.u32 %v692_v24, 16 }
  0x22   : > { %6994 = vmatprep.subr.bf16.mxu0 %v7314_v57  ;;  %v1637_v37 = vsel %vm7526_vm6, %v6111_v22, %v1636_v28  ;;  %v1638_v38 = vrot.slane %v1636_v28, 4  ;;  %v1508_v40 = vld [vmem:[%s7427_s26 + $0x14] sm:$0x1]  ;;  %v843_v43 = vrot.slane %v841_v33, 5  ;;  %v851_v44 = vshrl.u32 %v692_v24, 16  ;;  %v7316_v9 = vld [vmem:[%s9208_s1 + $0x68] sm:$0xff]  }
  0x23   : > { %v830_v30 = vor.u32 %v829_v20, %v825_v15  ;;  %v849_v49 = vrot.slane %v847_v39, 5  ;;  %v857_v50 = vshll.u32 %v693_v29, 16  ;;  %v694_v51 = vld [vmem:[%s7427_s26 + $0x30] sm:$0xf]  ;;  %v6112_v60 = vrot.slane %v1506_v34, 9 }
  0x24   : > { %6955 = vmatpush3.bf16.msra.mxu1 %v7309_v19  ;;  %v812_v19 = vsel %vm7490_vm5, %v807_v10, %v811_v56  ;;  %v853_v55 = vrot.slane %v851_v44, 4  ;;  %v695_v56 = vld [vmem:[%s7427_s26 + $0x34] sm:$0xf]  ;;  %v1643_v61 = vrot.slane %v1507_v35, 5  ;;  %v696_v62 = vld [vmem:[%s7427_s26 + $0x38] sm:$0x1] }
  0x25   : > { %7028 = vmatprep.subr.bf16.mxu1 %v7486_v46  ;;  %6995 = vmatpush3.bf16.msra.mxu0 %v7314_v57  ;;  %v6076_v25 = vcombine.low %v802_v18, %v812_v19  ;;  %v831_v41 = vrot.slane %v830_v30, 4  ;;  %v859_v59 = vrot.slane %v857_v50, 5  ;;  %v862_v2 = vshrl.u32 %v694_v51, 16  ;;  %v1509_v3 = vld [vmem:[%s7427_s26 + $0x18] sm:$0xe] }
  0x26   : > { %6941 = vmatmul.mubr.msk.bf16.gmra.mrb[8].mxu1 %vm408_vm0, %v7302_v26  ;;  %7068 = vmatprep.subr.bf16.mxu0 %v7503_v58  ;;  %v820_v26 = vor.u32 %v819_v14, %v816_v13  ;;  %v854_v0 = vor.u32 %v853_v55, %v849_v49  ;;  %v1644_v4 = vsel %vm7526_vm6, %v6112_v60, %v1643_v61  ;;  %v1645_v5 = vrot.slane %v1643_v61, 4  ;;  %v1511_v14 = vld [vmem:[%s7427_s26 + $0x20] sm:$0x1]  ;;  %v697_v19 = vld [vmem:[%s7427_s26 + $0x3c] sm:$0xf] }
  0x27   : > { %6925 = vmatmul.mubr.msk.bf16.gmra.mrb[8].mxu0 %vm408_vm0, %v7307_v27  ;;  %6944 = vmatprep.mubr.msk.bf16.mxu1 %vm408_vm0, %v7306_v31  ;;  %v835_v27 = vrot.slane %v833_v16, 5  ;;  %v1639_v31 = vrot.slane %v1505_v17, 5  ;;  %v865_v6 = vshll.u32 %v694_v51, 16  ;;  %v864_v12 = vrot.slane %v862_v2, 4  ;;  %v7320_v60 = vld [vmem:[%s9208_s1 + $0x78] sm:$0xff]  }
  0x28   : > { %6928 = vmatprep.mubr.msk.bf16.mxu0 %vm408_vm0, %v7311_v32  ;;  %v838_v32 = vshrl.u32 %v691_v23, 16  ;;  %v821_v36 = vrot.slane %v820_v26, 4  ;;  %v855_v11 = vrot.slane %v854_v0, 4  ;;  %v875_v13 = vshrl.u32 %v695_v56, 16  ;;  %v7317_v26 = vld [vmem:[%s9208_s1 + $0x88] sm:$0xff]  }
  0x29   : > { %v1640_v48 = vsel %vm7526_vm6, %v1638_v38, %v1639_v31  ;;  %v836_v52 = vsel %vm7490_vm5, %v831_v41, %v835_v27  ;;  %v867_v16 = vrot.slane %v865_v6, 5  ;;  %v881_v18 = vshll.u32 %v696_v62, 16  ;;  %v699_v31 = vld [vmem:[%s7427_s26 + $0x44] sm:$0x1]  ;;  %v7319_v41 = vld [vmem:[%s9208_s1 + $0x90] sm:$0xff]  }
  0x2a   : > { %v840_v42 = vrot.slane %v838_v32, 4  ;;  %v826_v45 = vsel %vm7490_vm5, %v821_v36, %v825_v15  ;;  %v6135_v53 = vcombine.low %v1637_v37, %v1640_v48  ;;  %v860_v20 = vsel %vm7490_vm5, %v855_v11, %v859_v59  ;;  %v1512_v36 = vld [vmem:[%s7427_s26 + $0x24] sm:$0xe]  ;;  %v1513_v48 = vld [vmem:[%s7427_s26 + $0x28] sm:$0xf] }
  0x2b   : > { %v6077_v57 = vcombine.low %v826_v45, %v836_v52  ;;  %v877_v23 = vrot.slane %v875_v13, 4  ;;  %v6113_v24 = vrot.slane %v1509_v3, 9  ;;  %v868_v28 = vor.u32 %v867_v16, %v864_v12  ;;  %v1514_v52 = vld [vmem:[%s7427_s26 + $0x2c] sm:$0x1]  ;;  %v1515_v6 = vld [vmem:[%s7427_s26 + $0x30] sm:$0xe] }
  0x2c   : > { %v844_v54 = vor.u32 %v843_v43, %v840_v42  ;;  %v883_v29 = vrot.slane %v881_v18, 5  ;;  %v1653_v33 = vrot.slane %v1511_v14, 5  ;;  %v886_v34 = vshrl.u32 %v697_v19, 16  ;;  %v701_v59 = vld [vmem:[%s7427_s26 + $0x4c] sm:$0xf]  ;;  %v7612_v13 = vld [vmem:[%s9208_s1 + $0xa0] sm:$0xff]  }
  0x2d   : > { %v889_v35 = vshll.u32 %v697_v19, 16  ;;  %v869_v37 = vrot.slane %v868_v28, 4  ;;  %v905_v51 = vshll.u32 %v699_v31, 16  ;;  %v1657_v0 = vrot.slane %v1513_v48, 5  ;;  %v1516_v12 = vld [vmem:[%s7427_s26 + $0x34] sm:$0xf] }
  0x2e   : > { %6945 = vmatmul.mubr.msk.bf16.gmra.mrb[12].mxu1 %vm408_vm0, %v7308_v1  ;;  %v845_v63 = vrot.slane %v844_v54, 4  ;;  %v1646_v1 = vrot.slane %v1508_v40, 5  ;;  %v888_v43 = vrot.slane %v886_v34, 4  ;;  %v919_v11 = vshll.u32 %v701_v59, 16  ;;  %v1517_v18 = vld [vmem:[%s7427_s26 + $0x38] sm:$0x1] }
  0x2f   : > { %6929 = vmatmul.mubr.msk.bf16.gmra.mrb[12].mxu0 %vm408_vm0, %v7312_v8  ;;  %6956 = vmatprep.mubr.msk.bf16.mxu1 %vm408_vm0, %v6075_v7  ;;  %v871_v7 = vshll.u32 %v695_v56, 16  ;;  %v1510_v8 = vld [vmem:[%s7427_s26 + $0x1c] sm:$0xf]  ;;  %v891_v44 = vrot.slane %v889_v35, 5  ;;  %v907_v62 = vrot.slane %v905_v51, 5  ;;  %v6115_v28 = vrot.slane %v1515_v6, 9 }
  0x30   : > { %6996 = vmatprep.mubr.msk.bf16.mxu0 %vm408_vm0, %v6135_v53  ;;  %v850_v10 = vsel %vm7490_vm5, %v845_v63, %v849_v49  ;;  %v1647_v15 = vsel %vm7526_vm6, %v1645_v5, %v1646_v1  ;;  %v1650_v30 = vrot.slane %v1510_v8, 5  ;;  %v700_v53 = vld [vmem:[%s7427_s26 + $0x48] sm:$0xf]  ;;  %v6114_v63 = vrot.slane %v1512_v36, 9  ;;  %v702_v1 = vld [vmem:[%s7427_s26 + $0x50] sm:$0x1] }
  0x31   : > { %v873_v17 = vrot.slane %v871_v7, 5  ;;  %v6136_v22 = vcombine.low %v1644_v4, %v1647_v15  ;;  %v6078_v27 = vcombine.low %v850_v10, %v860_v20  ;;  %v892_v56 = vor.u32 %v891_v44, %v888_v43  ;;  %v7321_v7 = vld [vmem:[%s9208_s1 + $0x98] sm:$0xff]  }
  0x32   : > { %v1651_v38 = vsel %vm7526_vm6, %v6113_v24, %v1650_v30  ;;  %v1652_v39 = vrot.slane %v1650_v30, 4  ;;  %v1660_v4 = vrot.slane %v1514_v52, 5  ;;  %v910_v5 = vshrl.u32 %v700_v53, 16  ;;  %v703_v24 = vld [vmem:[%s7427_s26 + $0x54] sm:$0xf]  ;;  %v7626_v30 = vld [vmem:[%s9208_s1 + $0xc0] sm:$0xff]  }
  0x33   : > { %v878_v32 = vor.u32 %v877_v23, %v873_v17  ;;  %v893_v2 = vrot.slane %v892_v56, 4  ;;  %v1658_v8 = vsel %vm7526_vm6, %v6114_v63, %v1657_v0  ;;  %v913_v10 = vshll.u32 %v700_v53, 16  ;;  %v705_v36 = vld [vmem:[%s7427_s26 + $0x5c] sm:$0x1]  ;;  %v1518_v43 = vld [vmem:[%s7427_s26 + $0x3c] sm:$0xe] }
  0x34   : > { %v1654_v49 = vsel %vm7526_vm6, %v1652_v39, %v1653_v33  ;;  %v912_v16 = vrot.slane %v910_v5, 4  ;;  %v929_v23 = vshll.u32 %v702_v1, 16  ;;  %v1664_v33 = vrot.slane %v1516_v12, 5 }
  0x35   : > { %v879_v42 = vrot.slane %v878_v32, 4  ;;  %v6137_v55 = vcombine.low %v1651_v38, %v1654_v49  ;;  %v915_v20 = vrot.slane %v913_v10, 5  ;;  %v1667_v35 = vrot.slane %v1517_v18, 5  ;;  %v1519_v49 = vld [vmem:[%s7427_s26 + $0x40] sm:$0xf] }
  0x36   : > { %6957 = vmatmul.mubr.msk.bf16.vlgmr.msra.gmra.mrb[16].mxu1 %vm408_vm0, %v6076_v25  ;;  %v698_v25 = vld [vmem:[%s7427_s26 + $0x40] sm:$0xf]  ;;  %v931_v32 = vrot.slane %v929_v23, 5  ;;  %v937_v38 = vshll.u32 %v703_v24, 16  ;;  %v953_v53 = vshll.u32 %v705_v36, 16  ;;  %v6116_v1 = vrot.slane %v1518_v43, 9 }
  0x37   : > { %7029 = vmatpush3.bf16.msra.mxu1 %v7486_v46  ;;  %6960 = vmatprep.mubr.msk.bf16.mxu1 %vm408_vm0, %v6077_v57  ;;  %v7318_v46 = vld [vmem:[%s9208_s1 + $0x70] sm:$0xff]   ;;  %v895_v40 = vshll.u32 %v698_v25, 16  ;;  %v899_v45 = vshrl.u32 %v698_v25, 16  ;;  %v884_v54 = vsel %vm7490_vm5, %v879_v42, %v883_v29  ;;  %v704_v29 = vld [vmem:[%s7427_s26 + $0x58] sm:$0xf] }
  0x38   : > { %7030 = vmatprep.subr.bf16.mxu1 %v7316_v9  ;;  %6997 = vmatmul.mubr.msk.bf16.vlgmr.msra.gmra.mrb[16].mxu0 %vm408_vm0, %v6136_v22  ;;  %v921_v22 = vrot.slane %v919_v11, 5  ;;  %v943_v42 = vshll.u32 %v704_v29, 16  ;;  %v939_v48 = vrot.slane %v937_v38, 5  ;;  %v711_v36 = vld [vmem:[%s7427_s26 + $0x74] sm:$0x1] }
  0x39   : > { %7069 = vmatpush3.bf16.msra.mxu0 %v7503_v58  ;;  %v874_v58 = vsel %vm7490_vm5, %v869_v37, %v873_v17  ;;  %v897_v50 = vrot.slane %v895_v40, 5  ;;  %v901_v57 = vrot.slane %v899_v45, 4  ;;  %7000 = vmatprep.mubr.msk.bf16.mxu0 %vm408_vm0, %v6137_v55  ;;  %v923_v17 = vshrl.u32 %v701_v59, 16  ;;  %v706_v55 = vld [vmem:[%s7427_s26 + $0x60] sm:$0xf] }
  0x3a   : > { %7070 = vmatprep.subr.bf16.mxu0 %v7317_v26  ;;  %v6079_v61 = vcombine.low %v874_v58, %v884_v54  ;;  %v934_v37 = vshrl.u32 %v703_v24, 16  ;;  %v1665_v40 = vsel %vm7526_vm6, %v6115_v28, %v1664_v33  ;;  %v947_v58 = vshrl.u32 %v704_v29, 16  ;;  %v1520_v54 = vld [vmem:[%s7427_s26 + $0x44] sm:$0x1]  ;;  %v1524_v43 = vld [vmem:[%s7427_s26 + $0x54] sm:$0xe] }
  0x3b   : > { %7031 = vmatpush3.bf16.msra.mxu1 %v7316_v9  ;;  %v902_v3 = vor.u32 %v901_v57, %v897_v50  ;;  %v1659_v9 = vrot.slane %v1657_v0, 4  ;;  %v898_v14 = vsel %vm7490_vm5, %v893_v2, %v897_v50  ;;  %v945_v52 = vrot.slane %v943_v42, 5 }
  0x3c   : > { %7032 = vmatprep.subr.bf16.mxu1 %v7318_v46  ;;  %v936_v45 = vrot.slane %v934_v37, 4  ;;  %v955_v0 = vrot.slane %v953_v53, 5  ;;  %v1671_v2 = vrot.slane %v1519_v49, 5  ;;  %v1674_v6 = vrot.slane %v1520_v54, 5  ;;  %v1525_v49 = vld [vmem:[%s7427_s26 + $0x58] sm:$0xf] }
  0x3d   : > { %7071 = vmatpush3.bf16.msra.mxu0 %v7317_v26  ;;  %v903_v15 = vrot.slane %v902_v3, 4  ;;  %v1661_v19 = vsel %vm7526_vm6, %v1659_v9, %v1660_v4  ;;  %v1521_v3 = vld [vmem:[%s7427_s26 + $0x48] sm:$0xe]  ;;  %v961_v11 = vshll.u32 %v706_v55, 16  ;;  %v1001_v53 = vshll.u32 %v711_v36, 16 }
  0x3e   : > { %6961 = vmatmul.mubr.msk.bf16.gmra.mrb[20].mxu1 %vm408_vm0, %v6078_v27  ;;  %7072 = vmatprep.subr.bf16.mxu0 %v7319_v41  ;;  %v6138_v26 = vcombine.low %v1658_v8, %v1661_v19  ;;  %v925_v27 = vrot.slane %v923_v17, 4  ;;  %v940_v59 = vor.u32 %v939_v48, %v936_v45  ;;  %v1522_v8 = vld [vmem:[%s7427_s26 + $0x4c] sm:$0xf]  ;;  %v1672_v9 = vsel %vm7526_vm6, %v6116_v1, %v1671_v2  ;;  %v1526_v54 = vld [vmem:[%s7427_s26 + $0x5c] sm:$0x1] }
  0x3f   : > { %7033 = vmatpush3.bf16.msra.mxu1 %v7318_v46  ;;  %6964 = vmatprep.mubr.msk.bf16.mxu1 %vm408_vm0, %v6079_v61  ;;  %v908_v25 = vsel %vm7490_vm5, %v903_v15, %v907_v62  ;;  %v916_v46 = vor.u32 %v915_v20, %v912_v16  ;;  %v707_v61 = vld [vmem:[%s7427_s26 + $0x64] sm:$0xf]  ;;  %v708_v62 = vld [vmem:[%s7427_s26 + $0x68] sm:$0x1]  ;;  %v1673_v10 = vrot.slane %v1671_v2, 4  ;;  %v6117_v29 = vrot.slane %v1521_v3, 9 }
  0x40   : > { %7034 = vmatprep.subr.bf16.mxu1 %v7320_v60  ;;  %v6080_v31 = vcombine.low %v898_v14, %v908_v25  ;;  %7001 = vmatmul.mubr.msk.bf16.gmra.mrb[20].mxu0 %vm408_vm0, %v6138_v26  ;;  %v926_v34 = vor.u32 %v925_v27, %v921_v22  ;;  %v941_v4 = vrot.slane %v940_v59, 4  ;;  %v967_v12 = vshll.u32 %v707_v61, 16  ;;  %v1523_v14 = vld [vmem:[%s7427_s26 + $0x50] sm:$0x1]  ;;  %v709_v19 = vld [vmem:[%s7427_s26 + $0x6c] sm:$0xf] }
  0x41   : > { %7073 = vmatpush3.bf16.msra.mxu0 %v7319_v41  ;;  %v917_v39 = vrot.slane %v916_v46, 4  ;;  %v1666_v41 = vrot.slane %v1664_v33, 4  ;;  %v971_v18 = vshrl.u32 %v707_v61, 16  ;;  %v1675_v20 = vsel %vm7526_vm6, %v1673_v10, %v1674_v6  ;;  %v710_v25 = vld [vmem:[%s7427_s26 + $0x70] sm:$0xf] }
  0x42   : > { %7074 = vmatprep.subr.bf16.mxu0 %v7321_v7  ;;  %v927_v44 = vrot.slane %v926_v34, 4  ;;  %v946_v15 = vsel %vm7490_vm5, %v941_v4, %v945_v52  ;;  %v969_v23 = vrot.slane %v967_v12, 5  ;;  %v977_v24 = vshll.u32 %v708_v62, 16  ;;  %v713_v61 = vld [vmem:[%s7427_s26 + $0x7c] sm:$0xf] }
  0x43   : > { %7035 = vmatpush3.bf16.msra.mxu1 %v7320_v60  ;;  %v922_v50 = vsel %vm7490_vm5, %v917_v39, %v921_v22  ;;  %v1668_v51 = vsel %vm7526_vm6, %v1666_v41, %v1667_v35  ;;  %v949_v60 = vrot.slane %v947_v58, 4  ;;  %v963_v22 = vrot.slane %v961_v11, 5  ;;  %v714_v62 = vld [vmem:[%s7427_s26 + $0x80] sm:$0x1]  ;;  %v1527_v3 = vld [vmem:[%s7427_s26 + $0x60] sm:$0xe] }
  0x44   : > { %7108 = vmatprep.subr.bf16.mxu1 %v7612_v13  ;;  %v932_v56 = vsel %vm7490_vm5, %v927_v44, %v931_v32  ;;  %v6139_v57 = vcombine.low %v1665_v40, %v1668_v51  ;;  %v6140_v27 = vcombine.low %v1672_v9, %v1675_v20  ;;  %v973_v28 = vrot.slane %v971_v18, 4  ;;  %v717_v36 = vld [vmem:[%s7427_s26 + $0x8c] sm:$0x1] }
  0x45   : > { %7075 = vmatpush3.bf16.msra.mxu0 %v7321_v7  ;;  %v6081_v63 = vcombine.low %v922_v50, %v932_v56  ;;  %v950_v5 = vor.u32 %v949_v60, %v945_v52  ;;  %v958_v7 = vshrl.u32 %v706_v55, 16  ;;  %v979_v32 = vrot.slane %v977_v24, 5  ;;  %v712_v55 = vld [vmem:[%s7427_s26 + $0x78] sm:$0xf] }
  0x46   : > { %6965 = vmatmul.mubr.msk.bf16.gmra.mrb[24].mxu1 %vm408_vm0, %v6080_v31  ;;  %7148 = vmatprep.subr.bf16.mxu0 %v7626_v30  ;;  %v1678_v33 = vrot.slane %v1522_v8, 5  ;;  %v974_v34 = vor.u32 %v973_v28, %v969_v23  ;;  %v1681_v35 = vrot.slane %v1523_v14, 5  ;;  %v982_v37 = vshrl.u32 %v709_v19, 16  ;;  %v1528_v8 = vld [vmem:[%s7427_s26 + $0x64] sm:$0xf] }
  0x47   : > { %7004 = vmatprep.mubr.msk.bf16.mxu0 %vm408_vm0, %v6139_v57  ;;  %6968 = vmatprep.mubr.msk.bf16.mxu1 %vm408_vm0, %v6081_v63  ;;  %v951_v16 = vrot.slane %v950_v5, 4  ;;  %v960_v17 = vrot.slane %v958_v7, 4  ;;  %v985_v38 = vshll.u32 %v709_v19, 16  ;;  %v991_v42 = vshll.u32 %v710_v25, 16  ;;  %v1529_v14 = vld [vmem:[%s7427_s26 + $0x68] sm:$0x1] }
  0x48   : > { %7005 = vmatmul.mubr.msk.bf16.gmra.mrb[24].mxu0 %vm408_vm0, %v6140_v27  ;;  %v1679_v40 = vsel %vm7526_vm6, %v6117_v29, %v1678_v33  ;;  %v1680_v41 = vrot.slane %v1678_v33, 4  ;;  %v975_v44 = vrot.slane %v974_v34, 4  ;;  %v984_v45 = vrot.slane %v982_v37, 4  ;;  %v716_v29 = vld [vmem:[%s7427_s26 + $0x88] sm:$0xf] }
  0x49   : > { %v956_v26 = vsel %vm7490_vm5, %v951_v16, %v955_v0  ;;  %v964_v46 = vor.u32 %v963_v22, %v960_v17  ;;  %v987_v48 = vrot.slane %v985_v38, 5  ;;  %v995_v58 = vshrl.u32 %v710_v25, 16 }
  0x4a   : > { %v6082_v31 = vcombine.low %v946_v15, %v956_v26  ;;  %v1682_v51 = vsel %vm7526_vm6, %v1680_v41, %v1681_v35  ;;  %v993_v52 = vrot.slane %v991_v42, 5  ;;  %v980_v56 = vsel %vm7490_vm5, %v975_v44, %v979_v32  ;;  %v715_v15 = vld [vmem:[%s7427_s26 + $0x84] sm:$0xf] }
  0x4b   : > { %v965_v39 = vrot.slane %v964_v46, 4  ;;  %v6141_v57 = vcombine.low %v1679_v40, %v1682_v51  ;;  %v988_v59 = vor.u32 %v987_v48, %v984_v45  ;;  %v997_v60 = vrot.slane %v995_v58, 4 }
  0x4c   : > { %v1003_v0 = vrot.slane %v1001_v53, 5  ;;  %v6118_v1 = vrot.slane %v1524_v43, 9  ;;  %v1685_v2 = vrot.slane %v1525_v49, 5  ;;  %v1688_v6 = vrot.slane %v1526_v54, 5  ;;  %v1530_v43 = vld [vmem:[%s7427_s26 + $0x6c] sm:$0xe] }
  0x4d   : > { %v970_v50 = vsel %vm7490_vm5, %v965_v39, %v969_v23  ;;  %7008 = vmatprep.mubr.msk.bf16.mxu0 %vm408_vm0, %v6141_v57  ;;  %v989_v4 = vrot.slane %v988_v59, 4  ;;  %v998_v5 = vor.u32 %v997_v60, %v993_v52  ;;  %v1006_v7 = vshrl.u32 %v712_v55, 16  ;;  %v1531_v49 = vld [vmem:[%s7427_s26 + $0x70] sm:$0xf]  ;;  %v1532_v54 = vld [vmem:[%s7427_s26 + $0x74] sm:$0x1] }
  0x4e   : > { %6969 = vmatmul.mubr.msk.bf16.gmra.mrb[28].mxu1 %vm408_vm0, %v6082_v31  ;;  %v6083_v63 = vcombine.low %v970_v50, %v980_v56  ;;  %v1686_v9 = vsel %vm7526_vm6, %v6118_v1, %v1685_v2  ;;  %v1687_v10 = vrot.slane %v1685_v2, 4  ;;  %v1009_v11 = vshll.u32 %v712_v55, 16  ;;  %v718_v55 = vld [vmem:[%s7427_s26 + $0x90] sm:$0xf] }
  0x4f   : > { %v1015_v12 = vshll.u32 %v713_v61, 16  ;;  %v994_v16 = vsel %vm7490_vm5, %v989_v4, %v993_v52  ;;  %v999_v17 = vrot.slane %v998_v5, 4  ;;  %v1008_v18 = vrot.slane %v1006_v7, 4 }
  0x50   : > { %6972 = vmatprep.mubr.msk.bf16.mxu1 %vm408_vm0, %v6083_v63  ;;  %v1019_v19 = vshrl.u32 %v713_v61, 16  ;;  %v1689_v20 = vsel %vm7526_vm6, %v1687_v10, %v1688_v6  ;;  %v1011_v22 = vrot.slane %v1009_v11, 5  ;;  %v1025_v24 = vshll.u32 %v714_v62, 16  ;;  %v719_v61 = vld [vmem:[%s7427_s26 + $0x94] sm:$0xf] }
  0x51   : > { %v1017_v23 = vrot.slane %v1015_v12, 5  ;;  %v1004_v25 = vsel %vm7490_vm5, %v999_v17, %v1003_v0  ;;  %v6142_v26 = vcombine.low %v1686_v9, %v1689_v20  ;;  %v6119_v28 = vrot.slane %v1527_v3, 9  ;;  %v720_v62 = vld [vmem:[%s7427_s26 + $0x98] sm:$0x1]  ;;  %v1533_v3 = vld [vmem:[%s7427_s26 + $0x78] sm:$0xe] }
  0x52   : > { %v1021_v27 = vrot.slane %v1019_v19, 4  ;;  %v6084_v31 = vcombine.low %v994_v16, %v1004_v25  ;;  %v1012_v46 = vor.u32 %v1011_v22, %v1008_v18  ;;  %v1027_v32 = vrot.slane %v1025_v24, 5  ;;  %v1535_v18 = vld [vmem:[%s7427_s26 + $0x80] sm:$0x1]  ;;  %v721_v24 = vld [vmem:[%s7427_s26 + $0x9c] sm:$0xf] }
  0x53   : > { %v1692_v33 = vrot.slane %v1528_v8, 5  ;;  %7009 = vmatmul.mubr.msk.bf16.gmra.mrb[28].mxu0 %vm408_vm0, %v6142_v26  ;;  %v1695_v35 = vrot.slane %v1529_v14, 5  ;;  %v1030_v37 = vshrl.u32 %v715_v15, 16  ;;  %v1033_v38 = vshll.u32 %v715_v15, 16  ;;  %v1534_v8 = vld [vmem:[%s7427_s26 + $0x7c] sm:$0xf] }
  0x54   : > { %v1022_v34 = vor.u32 %v1021_v27, %v1017_v23  ;;  %v1013_v39 = vrot.slane %v1012_v46, 4  ;;  %v1039_v42 = vshll.u32 %v716_v29, 16  ;;  %v1043_v58 = vshrl.u32 %v716_v29, 16  ;;  %v722_v29 = vld [vmem:[%s7427_s26 + $0xa0] sm:$0xf] }
  0x55   : > { %v1693_v40 = vsel %vm7526_vm6, %v6119_v28, %v1692_v33  ;;  %v1694_v41 = vrot.slane %v1692_v33, 4  ;;  %v1032_v45 = vrot.slane %v1030_v37, 4  ;;  %v1035_v48 = vrot.slane %v1033_v38, 5 }
  0x56   : > { %6973 = vmatmul.mubr.msk.bf16.gmra.mrb[32].mxu1 %vm408_vm0, %v6084_v31  ;;  %v1023_v44 = vrot.slane %v1022_v34, 4  ;;  %v1018_v50 = vsel %vm7490_vm5, %v1013_v39, %v1017_v23  ;;  %v1041_v52 = vrot.slane %v1039_v42, 5  ;;  %v1049_v53 = vshll.u32 %v717_v36, 16  ;;  %v723_v34 = vld [vmem:[%s7427_s26 + $0xa4] sm:$0x1] }
  0x57   : > { %v1696_v51 = vsel %vm7526_vm6, %v1694_v41, %v1695_v35  ;;  %v1036_v59 = vor.u32 %v1035_v48, %v1032_v45  ;;  %v1045_v60 = vrot.slane %v1043_v58, 4  ;;  %v6120_v1 = vrot.slane %v1530_v43, 9  ;;  %v1536_v39 = vld [vmem:[%s7427_s26 + $0x84] sm:$0xe] }
  0x58   : > { %v1028_v56 = vsel %vm7490_vm5, %v1023_v44, %v1027_v32  ;;  %v6143_v57 = vcombine.low %v1693_v40, %v1696_v51  ;;  %v1051_v0 = vrot.slane %v1049_v53, 5  ;;  %v1699_v2 = vrot.slane %v1531_v49, 5  ;;  %v1537_v44 = vld [vmem:[%s7427_s26 + $0x88] sm:$0xf] }
  0x59   : > { %v6085_v63 = vcombine.low %v1018_v50, %v1028_v56  ;;  %v1037_v4 = vrot.slane %v1036_v59, 4  ;;  %v1046_v5 = vor.u32 %v1045_v60, %v1041_v52  ;;  %v1702_v6 = vrot.slane %v1532_v54, 5  ;;  %v1538_v50 = vld [vmem:[%s7427_s26 + $0x8c] sm:$0x1] }
  0x5a   : > { %7012 = vmatprep.mubr.msk.bf16.mxu0 %vm408_vm0, %v6143_v57  ;;  %v1054_v7 = vshrl.u32 %v718_v55, 16  ;;  %v1700_v9 = vsel %vm7526_vm6, %v6120_v1, %v1699_v2  ;;  %v1701_v10 = vrot.slane %v1699_v2, 4  ;;  %v1057_v11 = vshll.u32 %v718_v55, 16  ;;  %v724_v55 = vld [vmem:[%s7427_s26 + $0xa8] sm:$0xf] }
  0x5b   : > { %6976 = vmatprep.mubr.msk.bf16.mxu1 %vm408_vm0, %v6085_v63  ;;  %v1063_v12 = vshll.u32 %v719_v61, 16  ;;  %v1042_v14 = vsel %vm7490_vm5, %v1037_v4, %v1041_v52  ;;  %v1047_v15 = vrot.slane %v1046_v5, 4  ;;  %v1067_v17 = vshrl.u32 %v719_v61, 16  ;;  %v725_v56 = vld [vmem:[%s7427_s26 + $0xac] sm:$0xf] }
  0x5c   : > { %v1056_v16 = vrot.slane %v1054_v7, 4  ;;  %v1703_v19 = vsel %vm7526_vm6, %v1701_v10, %v1702_v6  ;;  %v1059_v20 = vrot.slane %v1057_v11, 5  ;;  %v1073_v23 = vshll.u32 %v720_v62, 16  ;;  %v726_v62 = vld [vmem:[%s7427_s26 + $0xb0] sm:$0x1] }
  0x5d   : > { %v1065_v22 = vrot.slane %v1063_v12, 5  ;;  %v1052_v25 = vsel %vm7490_vm5, %v1047_v15, %v1051_v0  ;;  %v6144_v26 = vcombine.low %v1700_v9, %v1703_v19  ;;  %v1069_v27 = vrot.slane %v1067_v17, 4  ;;  %v727_v19 = vld [vmem:[%s7427_s26 + $0xb4] sm:$0xf] }
  0x5e   : > { %v6121_v28 = vrot.slane %v1533_v3, 9  ;;  %v6086_v31 = vcombine.low %v1042_v14, %v1052_v25  ;;  %v1060_v46 = vor.u32 %v1059_v20, %v1056_v16  ;;  %v1075_v32 = vrot.slane %v1073_v23, 5  ;;  %v1539_v3 = vld [vmem:[%s7427_s26 + $0x90] sm:$0xe]  ;;  %v1541_v14 = vld [vmem:[%s7427_s26 + $0x98] sm:$0x1] }
  0x5f   : > { %v1706_v33 = vrot.slane %v1534_v8, 5  ;;  %7013 = vmatmul.mubr.msk.bf16.gmra.mrb[32].mxu0 %vm408_vm0, %v6144_v26  ;;  %v1070_v35 = vor.u32 %v1069_v27, %v1065_v22  ;;  %v1709_v36 = vrot.slane %v1535_v18, 5  ;;  %v1078_v37 = vshrl.u32 %v721_v24, 16  ;;  %v1540_v8 = vld [vmem:[%s7427_s26 + $0x94] sm:$0xf] }
  0x60   : > { %v1081_v38 = vshll.u32 %v721_v24, 16  ;;  %6977 = vmatmul.mubr.msk.bf16.gmra.mrb[36].mxu1 %vm408_vm0, %v6086_v31  ;;  %v1061_v40 = vrot.slane %v1060_v46, 4  ;;  %v1087_v43 = vshll.u32 %v722_v29, 16  ;;  %v1091_v49 = vshrl.u32 %v722_v29, 16  ;;  %v728_v29 = vld [vmem:[%s7427_s26 + $0xb8] sm:$0xf] }
  0x61   : > { %v1707_v41 = vsel %vm7526_vm6, %v6121_v28, %v1706_v33  ;;  %v1708_v42 = vrot.slane %v1706_v33, 4  ;;  %v1071_v45 = vrot.slane %v1070_v35, 4  ;;  %v1080_v48 = vrot.slane %v1078_v37, 4 }
  0x62   : > { %v1083_v58 = vrot.slane %v1081_v38, 5  ;;  %v1066_v51 = vsel %vm7490_vm5, %v1061_v40, %v1065_v22  ;;  %v1089_v53 = vrot.slane %v1087_v43, 5  ;;  %v1097_v54 = vshll.u32 %v723_v34, 16  ;;  %v729_v34 = vld [vmem:[%s7427_s26 + $0xbc] sm:$0x1] }
  0x63   : > { %v1710_v52 = vsel %vm7526_vm6, %v1708_v42, %v1709_v36  ;;  %v1076_v57 = vsel %vm7490_vm5, %v1071_v45, %v1075_v32  ;;  %v1093_v61 = vrot.slane %v1091_v49, 4  ;;  %v6122_v1 = vrot.slane %v1536_v39, 9  ;;  %v1542_v39 = vld [vmem:[%s7427_s26 + $0x9c] sm:$0xe]  ;;  %v1543_v40 = vld [vmem:[%s7427_s26 + $0xa0] sm:$0xf] }
  0x64   : > { %v6145_v59 = vcombine.low %v1707_v41, %v1710_v52  ;;  %v1084_v60 = vor.u32 %v1083_v58, %v1080_v48  ;;  %v6087_v63 = vcombine.low %v1066_v51, %v1076_v57  ;;  %v1099_v0 = vrot.slane %v1097_v54, 5  ;;  %v1544_v45 = vld [vmem:[%s7427_s26 + $0xa4] sm:$0x1]  ;;  %v1545_v48 = vld [vmem:[%s7427_s26 + $0xa8] sm:$0xe] }
  0x65   : > { %v1713_v2 = vrot.slane %v1537_v44, 5  ;;  %v1094_v5 = vor.u32 %v1093_v61, %v1089_v53  ;;  %v1716_v6 = vrot.slane %v1538_v50, 5  ;;  %v1102_v7 = vshrl.u32 %v724_v55, 16  ;;  %v1546_v52 = vld [vmem:[%s7427_s26 + $0xac] sm:$0xf] }
  0x66   : > { %7016 = vmatprep.mubr.msk.bf16.mxu0 %vm408_vm0, %v6145_v59  ;;  %v1085_v4 = vrot.slane %v1084_v60, 4  ;;  %6980 = vmatprep.mubr.msk.bf16.mxu1 %vm408_vm0, %v6087_v63  ;;  %v1105_v11 = vshll.u32 %v724_v55, 16  ;;  %v1111_v12 = vshll.u32 %v725_v56, 16  ;;  %v1115_v18 = vshrl.u32 %v725_v56, 16  ;;  %v1548_v59 = vld [vmem:[%s7427_s26 + $0xb4] sm:$0xe] }
  0x67   : > { %v1714_v9 = vsel %vm7526_vm6, %v6122_v1, %v1713_v2  ;;  %v1715_v10 = vrot.slane %v1713_v2, 4  ;;  %v1095_v16 = vrot.slane %v1094_v5, 4  ;;  %v1104_v17 = vrot.slane %v1102_v7, 4  ;;  %v1550_v5 = vld [vmem:[%s7427_s26 + $0xbc] sm:$0x1] }
  0x68   : > { %v1090_v15 = vsel %vm7490_vm5, %v1085_v4, %v1089_v53  ;;  %v1107_v22 = vrot.slane %v1105_v11, 5  ;;  %v1113_v23 = vrot.slane %v1111_v12, 5  ;;  %v1121_v24 = vshll.u32 %v726_v62, 16  ;;  %v1547_v53 = vld [vmem:[%s7427_s26 + $0xb0] sm:$0x1] }
  0x69   : > { %v1717_v20 = vsel %vm7526_vm6, %v1715_v10, %v1716_v6  ;;  %v1100_v25 = vsel %vm7490_vm5, %v1095_v16, %v1099_v0  ;;  %v1117_v27 = vrot.slane %v1115_v18, 4  ;;  %v6123_v28 = vrot.slane %v1539_v3, 9  ;;  %v1549_v0 = vld [vmem:[%s7427_s26 + $0xb8] sm:$0xf]  ;;  %v6247_v10 = vld [vmem:[%s7427_s26 + $0xc] sm:$0xf] }
  0x6a   : > { %v6146_v26 = vcombine.low %v1714_v9, %v1717_v20  ;;  %v6088_v31 = vcombine.low %v1090_v15, %v1100_v25  ;;  %v1108_v46 = vor.u32 %v1107_v22, %v1104_v17  ;;  %v1123_v32 = vrot.slane %v1121_v24, 5  ;;  %v6248_v16 = vld [vmem:[%s7427_s26 + $0x10] sm:$0xf] }
  0x6b   : > { %v1720_v33 = vrot.slane %v1540_v8, 5  ;;  %v1118_v35 = vor.u32 %v1117_v27, %v1113_v23  ;;  %v1723_v36 = vrot.slane %v1541_v14, 5  ;;  %v1126_v37 = vshrl.u32 %v727_v19, 16  ;;  %v6250_v27 = vld [vmem:[%s7427_s26 + $0x18] sm:$0xf] }
  0x6c   : > { %7017 = vmatmul.mubr.msk.bf16.gmra.mrb[36].mxu0 %vm408_vm0, %v6146_v26  ;;  %v1129_v38 = vshll.u32 %v727_v19, 16  ;;  %6981 = vmatmul.mubr.msk.bf16.gmra.mrb[40].mxu1 %vm408_vm0, %v6088_v31  ;;  %v1109_v41 = vrot.slane %v1108_v46, 4  ;;  %v1135_v44 = vshll.u32 %v728_v29, 16  ;;  %v1139_v51 = vshrl.u32 %v728_v29, 16  ;;  %v6249_v26 = vld [vmem:[%s7427_s26 + $0x14] sm:$0x1] }
  0x6d   : > { %v1721_v42 = vsel %vm7526_vm6, %v6123_v28, %v1720_v33  ;;  %v1722_v43 = vrot.slane %v1720_v33, 4  ;;  %v1119_v58 = vrot.slane %v1118_v35, 4  ;;  %v1128_v49 = vrot.slane %v1126_v37, 4  ;;  %v7322_v31 = vld [vmem:[%s7427_s26 + $0xc] sm:$0xff]   ;;  %v6251_v33 = vld [vmem:[%s7427_s26 + $0x1c] sm:$0xf] }
  0x6e   : > { %v1131_v50 = vrot.slane %v1129_v38, 5  ;;  %v1114_v54 = vsel %vm7490_vm5, %v1109_v41, %v1113_v23  ;;  %v1137_v56 = vrot.slane %v1135_v44, 5  ;;  %v1145_v57 = vshll.u32 %v729_v34, 16 }
  0x6f   : > { %v1724_v55 = vsel %vm7526_vm6, %v1722_v43, %v1723_v36  ;;  %v1124_v60 = vsel %vm7490_vm5, %v1119_v58, %v1123_v32  ;;  %v1141_v63 = vrot.slane %v1139_v51, 4  ;;  %v6124_v3 = vrot.slane %v1542_v39, 9  ;;  %v6253_v58 = vld [vmem:[%s7427_s26 + $0x24] sm:$0xf] }
  0x70   : > { %v6147_v61 = vcombine.low %v1721_v42, %v1724_v55  ;;  %v1132_v62 = vor.u32 %v1131_v50, %v1128_v49  ;;  %v6089_v1 = vcombine.low %v1114_v54, %v1124_v60  ;;  %v1147_v2 = vrot.slane %v1145_v57, 5  ;;  %v6252_v42 = vld [vmem:[%s7427_s26 + $0x20] sm:$0x1]  ;;  %v7323_v54 = vld [vmem:[%s7427_s26 + $0x18] sm:$0xff]   ;;  %v7325_v60 = vld [vmem:[%s7427_s26 + $0x24] sm:$0xff]  }
  0x71   : > { %v1727_v4 = vrot.slane %v1543_v40, 5  ;;  %v1142_v7 = vor.u32 %v1141_v63, %v1137_v56  ;;  %v1730_v8 = vrot.slane %v1544_v45, 5  ;;  %v6125_v9 = vrot.slane %v1545_v48, 9 }
  0x72   : > { %7020 = vmatprep.mubr.msk.bf16.mxu0 %vm408_vm0, %v6147_v61  ;;  %v1133_v6 = vrot.slane %v1132_v62, 4  ;;  %6984 = vmatprep.mubr.msk.bf16.mxu1 %vm408_vm0, %v6089_v1  ;;  %v1734_v14 = vrot.slane %v1546_v52, 5  ;;  %v1737_v15 = vrot.slane %v1547_v53, 5  ;;  %v6126_v19 = vrot.slane %v1548_v59, 9  ;;  %v6254_v53 = vld [vmem:[%s7427_s26 + $0x28] sm:$0xf] }
  0x73   : > { %v1728_v11 = vsel %vm7526_vm6, %v6124_v3, %v1727_v4  ;;  %v1729_v12 = vrot.slane %v1727_v4, 4  ;;  %v1143_v18 = vrot.slane %v1142_v7, 4  ;;  %v1741_v20 = vrot.slane %v1549_v0, 5  ;;  %v6255_v4 = vld [vmem:[%s7427_s26 + $0x2c] sm:$0x1] }
  0x74   : > { %v1138_v17 = vsel %vm7490_vm5, %v1133_v6, %v1137_v56  ;;  %v1735_v23 = vsel %vm7526_vm6, %v6125_v9, %v1734_v14  ;;  %v1736_v24 = vrot.slane %v1734_v14, 4  ;;  %v1744_v25 = vrot.slane %v1550_v5, 5 }
  0x75   : > { %v1731_v22 = vsel %vm7526_vm6, %v1729_v12, %v1730_v8  ;;  %v1148_v28 = vsel %vm7490_vm5, %v1143_v18, %v1147_v2  ;;  %v1742_v46 = vsel %vm7526_vm6, %v6126_v19, %v1741_v20  ;;  %v1743_v32 = vrot.slane %v1741_v20, 4 }
  0x76   : > { %v6148_v29 = vcombine.low %v1728_v11, %v1731_v22  ;;  %v6090_v34 = vcombine.low %v1138_v17, %v1148_v28  ;;  %v1738_v35 = vsel %vm7526_vm6, %v1736_v24, %v1737_v15  ;;  %v2632_v36 = vshrl.u32 %v6247_v10, 16  ;;  %v7330_v11 = vld [vmem:[%s9208_s1 + $0xa8] sm:$0xff]   ;;  %v6257_v17 = vld [vmem:[%s7427_s26 + $0x34] sm:$0xf] }
  0x77   : > { %v2635_v37 = vshll.u32 %v6247_v10, 16  ;;  %v6149_v38 = vcombine.low %v1735_v23, %v1738_v35  ;;  %v1745_v39 = vsel %vm7526_vm6, %v1743_v32, %v1744_v25  ;;  %v2641_v40 = vshll.u32 %v6248_v16, 16  ;;  %v6256_v10 = vld [vmem:[%s7427_s26 + $0x30] sm:$0xf] }
  0x78   : > { %7021 = vmatmul.mubr.msk.bf16.gmra.mrb[40].mxu0 %vm408_vm0, %v6148_v29  ;;  %v2645_v41 = vshrl.u32 %v6248_v16, 16  ;;  %6985 = vmatmul.mubr.msk.bf16.gmra.mrb[44].mxu1 %vm408_vm0, %v6090_v34  ;;  %v6150_v43 = vcombine.low %v1742_v46, %v1745_v39  ;;  %v2634_v44 = vrot.slane %v2632_v36, 4  ;;  %v2651_v48 = vshll.u32 %v6249_v26, 16  ;;  %v7326_v32 = vld [vmem:[%s7427_s26 + $0x30] sm:$0xff]   ;;  %v6259_v36 = vld [vmem:[%s7427_s26 + $0x3c] sm:$0xf] }
  0x79   : > { %v2637_v45 = vrot.slane %v2635_v37, 5  ;;  %7024 = vmatprep.mubr.msk.bf16.mxu0 %vm408_vm0, %v6149_v38  ;;  %7036 = vmatprep.mubr.msk.bf16.mxu1 %vm408_vm0, %v7322_v31  ;;  %v2643_v49 = vrot.slane %v2641_v40, 5  ;;  %v2656_v51 = vshrl.u32 %v6250_v27, 16  ;;  %v2659_v52 = vshll.u32 %v6250_v27, 16  ;;  %v6258_v31 = vld [vmem:[%s7427_s26 + $0x38] sm:$0x1] }
  0x7a   : > { %v2647_v50 = vrot.slane %v2645_v41, 4  ;;  %v2653_v56 = vrot.slane %v2651_v48, 5  ;;  %v2665_v57 = vshll.u32 %v6251_v33, 16  ;;  %v2669_v59 = vshrl.u32 %v6251_v33, 16  ;;  %v7336_v37 = vld [vmem:[%s9208_s1 + $0xb0] sm:$0xff]   ;;  %v7328_v39 = vld [vmem:[%s7427_s26 + $0x3c] sm:$0xff]  }
  0x7b   : > { %v2638_v55 = vor.u32 %v2637_v45, %v2634_v44  ;;  %v2658_v62 = vrot.slane %v2656_v51, 4  ;;  %v2661_v63 = vrot.slane %v2659_v52, 5  ;;  %v2675_v0 = vshll.u32 %v6252_v42, 16  ;;  %v6261_v51 = vld [vmem:[%s7427_s26 + $0x44] sm:$0x1] }
  0x7c   : > { %v2648_v61 = vor.u32 %v2647_v50, %v2643_v49  ;;  %v2667_v2 = vrot.slane %v2665_v57, 5  ;;  %v2671_v3 = vrot.slane %v2669_v59, 4  ;;  %v2680_v5 = vshrl.u32 %v6253_v58, 16 }
  0x7d   : > { %v2639_v1 = vrot.slane %v2638_v55, 4  ;;  %v2662_v7 = vor.u32 %v2661_v63, %v2658_v62  ;;  %v2677_v8 = vrot.slane %v2675_v0, 5  ;;  %v2683_v9 = vshll.u32 %v6253_v58, 16 }
  0x7e   : > { %v2649_v6 = vrot.slane %v2648_v61, 4  ;;  %v2672_v14 = vor.u32 %v2671_v3, %v2667_v2  ;;  %v2682_v15 = vrot.slane %v2680_v5, 4  ;;  %v2689_v16 = vshll.u32 %v6254_v53, 16 }
  0x7f   : > { %v2644_v12 = vsel %vm7490_vm5, %v2639_v1, %v2643_v49  ;;  %v2663_v19 = vrot.slane %v2662_v7, 4  ;;  %v2685_v20 = vrot.slane %v2683_v9, 5  ;;  %v2693_v22 = vshrl.u32 %v6254_v53, 16  ;;  %v6263_v1 = vld [vmem:[%s7427_s26 + $0x4c] sm:$0xf] }
  0x80   : > { %7025 = vmatmul.mubr.msk.bf16.gmra.mrb[44].mxu0 %vm408_vm0, %v6150_v43  ;;  %v2654_v18 = vsel %vm7490_vm5, %v2649_v6, %v2653_v56  ;;  %7037 = vmatmul.mubr.msk.bf16.vlgmr.msra.gmra.mrb[48].mxu1 %vm408_vm0, %v7323_v54  ;;  %v2673_v24 = vrot.slane %v2672_v14, 4  ;;  %v2691_v25 = vrot.slane %v2689_v16, 5  ;;  %v2699_v26 = vshll.u32 %v6255_v4, 16  ;;  %v6260_v43 = vld [vmem:[%s7427_s26 + $0x40] sm:$0xf]  ;;  %v7333_v54 = vld [vmem:[%s9208_s1 + $0xc8] sm:$0xff]  }
  0x81   : > { %v6303_v23 = vcombine.low %v2644_v12, %v2654_v18  ;;  %7109 = vmatpush3.bf16.msra.mxu1 %v7612_v13  ;;  %7040 = vmatprep.mubr.msk.bf16.mxu1 %vm408_vm0, %v7325_v60  ;;  %v2668_v27 = vsel %vm7490_vm5, %v2663_v19, %v2667_v2  ;;  %v2686_v28 = vor.u32 %v2685_v20, %v2682_v15  ;;  %v2695_v29 = vrot.slane %v2693_v22, 4  ;;  %v6262_v60 = vld [vmem:[%s7427_s26 + $0x48] sm:$0xf]  ;;  %v7342_v2 = vld [vmem:[%s9208_s1 + $0xb8] sm:$0xff]   ;;  %v6264_v7 = vld [vmem:[%s7427_s26 + $0x50] sm:$0x1] }
  0x82   : > { %v2704_v46 = vshrl.u32 %v6256_v10, 16  ;;  %v2678_v33 = vsel %vm7490_vm5, %v2673_v24, %v2677_v8  ;;  %v2701_v34 = vrot.slane %v2699_v26, 5  ;;  %v2707_v35 = vshll.u32 %v6256_v10, 16  ;;  %7110 = vmatprep.subr.bf16.mxu1 %v7330_v11  ;;  %v7339_v12 = vld [vmem:[%s9208_s1 + $0xd0] sm:$0xff]  }
  0x83   : > { %7076 = vmatprep.mubr.msk.bf16.mxu0 %vm408_vm0, %v6303_v23  ;;  %v2713_v13 = vshll.u32 %v6257_v17, 16  ;;  %v6304_v38 = vcombine.low %v2668_v27, %v2678_v33  ;;  %v2687_v40 = vrot.slane %v2686_v28, 4  ;;  %v2696_v41 = vor.u32 %v2695_v29, %v2691_v25  ;;  %v7331_v18 = vld [vmem:[%s7427_s26 + $0x54] sm:$0xff]  }
  0x84   : > { %v2706_v42 = vrot.slane %v2704_v46, 4  ;;  %v2709_v44 = vrot.slane %v2707_v35, 5  ;;  %v2717_v48 = vshrl.u32 %v6257_v17, 16  ;;  %v2723_v58 = vshll.u32 %v6258_v31, 16  ;;  %v6265_v24 = vld [vmem:[%s7427_s26 + $0x54] sm:$0xf] }
  0x85   : > { %v2715_v45 = vrot.slane %v2713_v13, 5  ;;  %v2692_v49 = vsel %vm7490_vm5, %v2687_v40, %v2691_v25  ;;  %v2697_v50 = vrot.slane %v2696_v41, 4  ;;  %7111 = vmatpush3.bf16.msra.mxu1 %v7330_v11  ;;  %v2728_v52 = vshrl.u32 %v6259_v36, 16  ;;  %v7868_v25 = vld [vmem:[%s9208_s1 + $0xe0] sm:$0xff]   ;;  %v6266_v31 = vld [vmem:[%s7427_s26 + $0x58] sm:$0xf] }
  0x86   : > { %v2731_v53 = vshll.u32 %v6259_v36, 16  ;;  %v2710_v55 = vor.u32 %v2709_v44, %v2706_v42  ;;  %v2719_v56 = vrot.slane %v2717_v48, 4  ;;  %v2725_v57 = vrot.slane %v2723_v58, 5  ;;  %7112 = vmatprep.subr.bf16.mxu1 %v7336_v37  ;;  %v7345_v46 = vld [vmem:[%s9208_s1 + $0xd8] sm:$0xff]   ;;  %v6268_v44 = vld [vmem:[%s7427_s26 + $0x60] sm:$0xf] }
  0x87   : > { %v2737_v59 = vshll.u32 %v6260_v43, 16  ;;  %v2702_v61 = vsel %vm7490_vm5, %v2697_v50, %v2701_v34  ;;  %v2730_v62 = vrot.slane %v2728_v52, 4  ;;  %v2741_v0 = vshrl.u32 %v6260_v43, 16  ;;  %v6267_v13 = vld [vmem:[%s7427_s26 + $0x5c] sm:$0x1] }
  0x88   : > { %7077 = vmatmul.mubr.msk.bf16.vlgmr.msra.gmra.mrb[48].mxu0 %vm408_vm0, %v6304_v38  ;;  %v2733_v63 = vrot.slane %v2731_v53, 5  ;;  %7041 = vmatmul.mubr.msk.bf16.gmra.mrb[52].mxu1 %vm408_vm0, %v7326_v32  ;;  %v6305_v3 = vcombine.low %v2692_v49, %v2702_v61  ;;  %v2711_v4 = vrot.slane %v2710_v55, 4  ;;  %v2720_v5 = vor.u32 %v2719_v56, %v2715_v45  ;;  %v6269_v50 = vld [vmem:[%s7427_s26 + $0x64] sm:$0xf]  ;;  %v6270_v56 = vld [vmem:[%s7427_s26 + $0x68] sm:$0x1] }
  0x89   : > { %7149 = vmatpush3.bf16.msra.mxu0 %v7626_v30  ;;  %v2739_v6 = vrot.slane %v2737_v59, 5  ;;  %7044 = vmatprep.mubr.msk.bf16.mxu1 %vm408_vm0, %v7328_v39  ;;  %v2743_v9 = vrot.slane %v2741_v0, 4  ;;  %v2747_v10 = vshll.u32 %v6261_v51, 16  ;;  %v2752_v11 = vshrl.u32 %v6262_v60, 16  ;;  %v7329_v30 = vld [vmem:[%s7427_s26 + $0x48] sm:$0xff]   ;;  %v7889_v51 = vld [vmem:[%s9208_s1 + $0x100] sm:$0xff]  }
  0x8a   : > { %v2734_v8 = vor.u32 %v2733_v63, %v2730_v62  ;;  %7150 = vmatprep.subr.bf16.mxu0 %v7333_v54  ;;  %7080 = vmatprep.mubr.msk.bf16.mxu0 %vm408_vm0, %v6305_v3  ;;  %v2716_v14 = vsel %vm7490_vm5, %v2711_v4, %v2715_v45  ;;  %v2721_v15 = vrot.slane %v2720_v5, 4  ;;  %v2755_v16 = vshll.u32 %v6262_v60, 16 }
  0x8b   : > { %v2761_v17 = vshll.u32 %v6263_v1, 16  ;;  %7113 = vmatpush3.bf16.msra.mxu1 %v7336_v37  ;;  %v2744_v20 = vor.u32 %v2743_v9, %v2739_v6  ;;  %v2749_v22 = vrot.slane %v2747_v10, 5  ;;  %v2754_v23 = vrot.slane %v2752_v11, 4  ;;  %v7334_v9 = vld [vmem:[%s7427_s26 + $0x6c] sm:$0xff]  }
  0x8c   : > { %v2735_v19 = vrot.slane %v2734_v8, 4  ;;  %7114 = vmatprep.subr.bf16.mxu1 %v7342_v2  ;;  %v2726_v26 = vsel %vm7490_vm5, %v2721_v15, %v2725_v57  ;;  %v2757_v27 = vrot.slane %v2755_v16, 5  ;;  %v2765_v29 = vshrl.u32 %v6263_v1, 16 }
  0x8d   : > { %v2763_v28 = vrot.slane %v2761_v17, 5  ;;  %7151 = vmatpush3.bf16.msra.mxu0 %v7333_v54  ;;  %v6306_v32 = vcombine.low %v2716_v14, %v2726_v26  ;;  %v2745_v34 = vrot.slane %v2744_v20, 4  ;;  %v2771_v35 = vshll.u32 %v6264_v7, 16  ;;  %v6271_v7 = vld [vmem:[%s7427_s26 + $0x6c] sm:$0xf] }
  0x8e   : > { %v2740_v33 = vsel %vm7490_vm5, %v2735_v19, %v2739_v6  ;;  %7152 = vmatprep.subr.bf16.mxu0 %v7339_v12  ;;  %v2758_v36 = vor.u32 %v2757_v27, %v2754_v23  ;;  %v2767_v37 = vrot.slane %v2765_v29, 4  ;;  %v2776_v38 = vshrl.u32 %v6265_v24, 16  ;;  %v6273_v17 = vld [vmem:[%s7427_s26 + $0x74] sm:$0x1]  ;;  %v6274_v29 = vld [vmem:[%s7427_s26 + $0x78] sm:$0xf] }
  0x8f   : > { %v2779_v39 = vshll.u32 %v6265_v24, 16  ;;  %7115 = vmatpush3.bf16.msra.mxu1 %v7342_v2  ;;  %v2750_v40 = vsel %vm7490_vm5, %v2745_v34, %v2749_v22  ;;  %v2773_v41 = vrot.slane %v2771_v35, 5  ;;  %v2785_v42 = vshll.u32 %v6266_v31, 16  ;;  %v7332_v2 = vld [vmem:[%s7427_s26 + $0x60] sm:$0xff]  }
  0x90   : > { %7081 = vmatmul.mubr.msk.bf16.gmra.mrb[52].mxu0 %vm408_vm0, %v6306_v32  ;;  %v2789_v43 = vshrl.u32 %v6266_v31, 16  ;;  %7188 = vmatprep.subr.bf16.mxu1 %v7868_v25  ;;  %v6307_v45 = vcombine.low %v2740_v33, %v2750_v40  ;;  %v2759_v48 = vrot.slane %v2758_v36, 4  ;;  %v2768_v58 = vor.u32 %v2767_v37, %v2763_v28  ;;  %v6275_v31 = vld [vmem:[%s7427_s26 + $0x7c] sm:$0xf]  ;;  %v6276_v35 = vld [vmem:[%s7427_s26 + $0x80] sm:$0x1] }
  0x91   : > { %7045 = vmatmul.mubr.msk.bf16.gmra.mrb[56].mxu1 %vm408_vm0, %v7329_v30  ;;  %v2778_v49 = vrot.slane %v2776_v38, 4  ;;  %7153 = vmatpush3.bf16.msra.mxu0 %v7339_v12  ;;  %v2781_v52 = vrot.slane %v2779_v39, 5  ;;  %v2787_v53 = vrot.slane %v2785_v42, 5  ;;  %v2795_v55 = vshll.u32 %v6267_v13, 16  ;;  %v6272_v30 = vld [vmem:[%s7427_s26 + $0x70] sm:$0xf] }
  0x92   : > { %7048 = vmatprep.mubr.msk.bf16.mxu1 %vm408_vm0, %v7331_v18  ;;  %v2791_v54 = vrot.slane %v2789_v43, 4  ;;  %7154 = vmatprep.subr.bf16.mxu0 %v7345_v46  ;;  %v2764_v57 = vsel %vm7490_vm5, %v2759_v48, %v2763_v28  ;;  %v2769_v59 = vrot.slane %v2768_v58, 4  ;;  %v2800_v60 = vshrl.u32 %v6268_v44, 16  ;;  %v7335_v39 = vld [vmem:[%s7427_s26 + $0x78] sm:$0xff]  }
  0x93   : > { %7084 = vmatprep.mubr.msk.bf16.mxu0 %vm408_vm0, %v6307_v45  ;;  %v2803_v61 = vshll.u32 %v6268_v44, 16  ;;  %v2782_v62 = vor.u32 %v2781_v52, %v2778_v49  ;;  %v2797_v0 = vrot.slane %v2795_v55, 5  ;;  %v2809_v1 = vshll.u32 %v6269_v50, 16  ;;  %v7337_v45 = vld [vmem:[%s7427_s26 + $0x84] sm:$0xff]  }
  0x94   : > { %v2792_v63 = vor.u32 %v2791_v54, %v2787_v53  ;;  %v2774_v3 = vsel %vm7490_vm5, %v2769_v59, %v2773_v41  ;;  %v2802_v4 = vrot.slane %v2800_v60, 4  ;;  %v2813_v6 = vshrl.u32 %v6269_v50, 16  ;;  %v6277_v55 = vld [vmem:[%s7427_s26 + $0x84] sm:$0xf]  ;;  %v6278_v60 = vld [vmem:[%s7427_s26 + $0x88] sm:$0xf] }
  0x95   : > { %v2805_v5 = vrot.slane %v2803_v61, 5  ;;  %7155 = vmatpush3.bf16.msra.mxu0 %v7345_v46  ;;  %v6308_v8 = vcombine.low %v2764_v57, %v2774_v3  ;;  %v2783_v10 = vrot.slane %v2782_v62, 4  ;;  %v2811_v12 = vrot.slane %v2809_v1, 5  ;;  %v6279_v1 = vld [vmem:[%s7427_s26 + $0x8c] sm:$0x1] }
  0x96   : > { %v2793_v11 = vrot.slane %v2792_v63, 4  ;;  %7228 = vmatprep.subr.bf16.mxu0 %v7889_v51  ;;  %v2815_v15 = vrot.slane %v2813_v6, 4  ;;  %v2819_v16 = vshll.u32 %v6270_v56, 16  ;;  %v2824_v18 = vshrl.u32 %v6271_v7, 16 }
  0x97   : > { %v2806_v14 = vor.u32 %v2805_v5, %v2802_v4  ;;  %v2788_v19 = vsel %vm7490_vm5, %v2783_v10, %v2787_v53  ;;  %v2827_v22 = vshll.u32 %v6271_v7, 16  ;;  %v2833_v23 = vshll.u32 %v6272_v30, 16 }
  0x98   : > { %7085 = vmatmul.mubr.msk.bf16.gmra.mrb[56].mxu0 %vm408_vm0, %v6308_v8  ;;  %v2798_v20 = vsel %vm7490_vm5, %v2793_v11, %v2797_v0  ;;  %v2816_v27 = vor.u32 %v2815_v15, %v2811_v12  ;;  %v2821_v28 = vrot.slane %v2819_v16, 5  ;;  %v2826_v46 = vrot.slane %v2824_v18, 4  ;;  %v6280_v11 = vld [vmem:[%s7427_s26 + $0x90] sm:$0xf] }
  0x99   : > { %7049 = vmatmul.mubr.msk.bf16.gmra.mrb[60].mxu1 %vm408_vm0, %v7332_v2  ;;  %v6309_v24 = vcombine.low %v2788_v19, %v2798_v20  ;;  %v2807_v26 = vrot.slane %v2806_v14, 4  ;;  %v2829_v32 = vrot.slane %v2827_v22, 5  ;;  %v2835_v33 = vrot.slane %v2833_v23, 5  ;;  %v6282_v22 = vld [vmem:[%s7427_s26 + $0x98] sm:$0x1] }
  0x9a   : > { %7052 = vmatprep.mubr.msk.bf16.mxu1 %vm408_vm0, %v7334_v9  ;;  %v2837_v34 = vshrl.u32 %v6272_v30, 16  ;;  %v2817_v36 = vrot.slane %v2816_v27, 4  ;;  %v2843_v37 = vshll.u32 %v6273_v17, 16  ;;  %v2848_v38 = vshrl.u32 %v6274_v29, 16  ;;  %v7338_v30 = vld [vmem:[%s7427_s26 + $0x90] sm:$0xff]  }
  0x9b   : > { %7088 = vmatprep.mubr.msk.bf16.mxu0 %vm408_vm0, %v6309_v24  ;;  %v2812_v13 = vsel %vm7490_vm5, %v2807_v26, %v2811_v12  ;;  %v2830_v40 = vor.u32 %v2829_v32, %v2826_v46  ;;  %v2851_v42 = vshll.u32 %v6274_v29, 16  ;;  %v2857_v43 = vshll.u32 %v6275_v31, 16  ;;  %v6281_v17 = vld [vmem:[%s7427_s26 + $0x94] sm:$0xf]  ;;  %v7340_v26 = vld [vmem:[%s7427_s26 + $0x9c] sm:$0xff]  }
  0x9c   : > { %v2839_v41 = vrot.slane %v2837_v34, 4  ;;  %v2822_v44 = vsel %vm7490_vm5, %v2817_v36, %v2821_v28  ;;  %v2845_v48 = vrot.slane %v2843_v37, 5  ;;  %v2850_v58 = vrot.slane %v2848_v38, 4  ;;  %v6283_v37 = vld [vmem:[%s7427_s26 + $0x9c] sm:$0xf] }
  0x9d   : > { %v2861_v49 = vshrl.u32 %v6275_v31, 16  ;;  %v6310_v50 = vcombine.low %v2812_v13, %v2822_v44  ;;  %v2831_v52 = vrot.slane %v2830_v40, 4  ;;  %v2853_v54 = vrot.slane %v2851_v42, 5  ;;  %v6284_v40 = vld [vmem:[%s7427_s26 + $0xa0] sm:$0xf] }
  0x9e   : > { %v2840_v53 = vor.u32 %v2839_v41, %v2835_v33  ;;  %v2859_v56 = vrot.slane %v2857_v43, 5  ;;  %v2867_v59 = vshll.u32 %v6276_v35, 16  ;;  %v2872_v61 = vshrl.u32 %v6277_v55, 16  ;;  %v6285_v41 = vld [vmem:[%s7427_s26 + $0xa4] sm:$0x1] }
  0x9f   : > { %v2863_v57 = vrot.slane %v2861_v49, 4  ;;  %v2836_v62 = vsel %vm7490_vm5, %v2831_v52, %v2835_v33  ;;  %v2854_v0 = vor.u32 %v2853_v54, %v2850_v58  ;;  %v2875_v2 = vshll.u32 %v6277_v55, 16  ;;  %v7341_v54 = vld [vmem:[%s7427_s26 + $0xa8] sm:$0xff]  }
  0xa0   : > { %7089 = vmatmul.mubr.msk.bf16.gmra.mrb[60].mxu0 %vm408_vm0, %v6310_v50  ;;  %v2841_v63 = vrot.slane %v2840_v53, 4  ;;  %v2869_v4 = vrot.slane %v2867_v59, 5  ;;  %v2874_v5 = vrot.slane %v2872_v61, 4  ;;  %v2881_v6 = vshll.u32 %v6278_v60, 16  ;;  %v6286_v59 = vld [vmem:[%s7427_s26 + $0xa8] sm:$0xf] }
  0xa1   : > { %7053 = vmatmul.mubr.msk.bf16.gmra.mrb[64].mxu1 %vm408_vm0, %v7335_v39  ;;  %v2864_v3 = vor.u32 %v2863_v57, %v2859_v56  ;;  %v2855_v8 = vrot.slane %v2854_v0, 4  ;;  %v2877_v9 = vrot.slane %v2875_v2, 5  ;;  %v2885_v10 = vshrl.u32 %v6278_v60, 16  ;;  %v6287_v60 = vld [vmem:[%s7427_s26 + $0xac] sm:$0xf] }
  0xa2   : > { %7056 = vmatprep.mubr.msk.bf16.mxu1 %vm408_vm0, %v7337_v45  ;;  %v2846_v7 = vsel %vm7490_vm5, %v2841_v63, %v2845_v48  ;;  %v2883_v15 = vrot.slane %v2881_v6, 5  ;;  %v2891_v16 = vshll.u32 %v6279_v1, 16  ;;  %v2896_v23 = vshrl.u32 %v6280_v11, 16  ;;  %v6288_v0 = vld [vmem:[%s7427_s26 + $0xb0] sm:$0x1]  ;;  %v7343_v6 = vld [vmem:[%s7427_s26 + $0xb4] sm:$0xff]  }
  0xa3   : > { %v6311_v12 = vcombine.low %v2836_v62, %v2846_v7  ;;  %v2865_v14 = vrot.slane %v2864_v3, 4  ;;  %v2860_v18 = vsel %vm7490_vm5, %v2855_v8, %v2859_v56  ;;  %v2878_v19 = vor.u32 %v2877_v9, %v2874_v5 }
  0xa4   : > { %v2887_v20 = vrot.slane %v2885_v10, 4  ;;  %v2893_v27 = vrot.slane %v2891_v16, 5  ;;  %v2899_v28 = vshll.u32 %v6280_v11, 16  ;;  %v2905_v29 = vshll.u32 %v6281_v17, 16  ;;  %v6289_v11 = vld [vmem:[%s7427_s26 + $0xb4] sm:$0xf] }
  0xa5   : > { %7092 = vmatprep.mubr.msk.bf16.mxu0 %vm408_vm0, %v6311_v12  ;;  %v2870_v24 = vsel %vm7490_vm5, %v2865_v14, %v2869_v4  ;;  %v2879_v46 = vrot.slane %v2878_v19, 4  ;;  %v2898_v33 = vrot.slane %v2896_v23, 4  ;;  %v2909_v13 = vshrl.u32 %v6281_v17, 16  ;;  %v6290_v16 = vld [vmem:[%s7427_s26 + $0xb8] sm:$0xf] }
  0xa6   : > { %v6312_v31 = vcombine.low %v2860_v18, %v2870_v24  ;;  %v2888_v32 = vor.u32 %v2887_v20, %v2883_v15  ;;  %v2901_v34 = vrot.slane %v2899_v28, 5  ;;  %v2907_v35 = vrot.slane %v2905_v29, 5  ;;  %v6339_v28 = vld [vmem:[%s7427_s26 + $0xc] sm:$0xe] }
  0xa7   : > { %v2915_v36 = vshll.u32 %v6282_v22, 16  ;;  %v2884_v38 = vsel %vm7490_vm5, %v2879_v46, %v2883_v15  ;;  %v2920_v42 = vshrl.u32 %v6283_v37, 16  ;;  %v2911_v44 = vrot.slane %v2909_v13, 4 }
  0xa8   : > { %7093 = vmatmul.mubr.msk.bf16.gmra.mrb[64].mxu0 %vm408_vm0, %v6312_v31  ;;  %v2889_v39 = vrot.slane %v2888_v32, 4  ;;  %v2902_v43 = vor.u32 %v2901_v34, %v2898_v33  ;;  %v2923_v48 = vshll.u32 %v6283_v37, 16  ;;  %v2929_v50 = vshll.u32 %v6284_v40, 16  ;;  %v6340_v33 = vld [vmem:[%s7427_s26 + $0x10] sm:$0xf] }
  0xa9   : > { %7057 = vmatmul.mubr.msk.bf16.gmra.mrb[68].mxu1 %vm408_vm0, %v7338_v30  ;;  %v2917_v45 = vrot.slane %v2915_v36, 5  ;;  %v2922_v49 = vrot.slane %v2920_v42, 4  ;;  %v2933_v52 = vshrl.u32 %v6284_v40, 16  ;;  %v2912_v56 = vor.u32 %v2911_v44, %v2907_v35  ;;  %v6341_v37 = vld [vmem:[%s7427_s26 + $0x14] sm:$0x1] }
  0xaa   : > { %7060 = vmatprep.mubr.msk.bf16.mxu1 %vm408_vm0, %v7340_v26  ;;  %v2894_v58 = vsel %vm7490_vm5, %v2889_v39, %v2893_v27  ;;  %v2903_v55 = vrot.slane %v2902_v43, 4  ;;  %v2925_v57 = vrot.slane %v2923_v48, 5  ;;  %v2931_v61 = vrot.slane %v2929_v50, 5  ;;  %v6291_v26 = vld [vmem:[%s7427_s26 + $0xbc] sm:$0x1]  ;;  %v7344_v43 = vld [vmem:[%s7427_s26 + $0xc0] sm:$0xff]  }
  0xab   : > { %v6313_v53 = vcombine.low %v2884_v38, %v2894_v58  ;;  %v2935_v62 = vrot.slane %v2933_v52, 4  ;;  %v2939_v63 = vshll.u32 %v6285_v41, 16  ;;  %v2944_v1 = vshrl.u32 %v6286_v59, 16  ;;  %v6292_v42 = vld [vmem:[%s7427_s26 + $0xc0] sm:$0xf] }
  0xac   : > { %v2908_v2 = vsel %vm7490_vm5, %v2903_v55, %v2907_v35  ;;  %v2913_v3 = vrot.slane %v2912_v56, 4  ;;  %v2926_v4 = vor.u32 %v2925_v57, %v2922_v49  ;;  %v2947_v5 = vshll.u32 %v6286_v59, 16  ;;  %v6293_v49 = vld [vmem:[%s7427_s26 + $0xc4] sm:$0xf]  ;;  %v6294_v55 = vld [vmem:[%s7427_s26 + $0xc8] sm:$0x1] }
  0xad   : > { %7096 = vmatprep.mubr.msk.bf16.mxu0 %vm408_vm0, %v6313_v53  ;;  %v2936_v7 = vor.u32 %v2935_v62, %v2931_v61  ;;  %v2941_v8 = vrot.slane %v2939_v63, 5  ;;  %v2946_v9 = vrot.slane %v2944_v1, 4  ;;  %v2953_v10 = vshll.u32 %v6287_v60, 16  ;;  %v6342_v56 = vld [vmem:[%s7427_s26 + $0x18] sm:$0xe] }
  0xae   : > { %v2918_v12 = vsel %vm7490_vm5, %v2913_v3, %v2917_v45  ;;  %v2927_v30 = vrot.slane %v2926_v4, 4  ;;  %v2949_v14 = vrot.slane %v2947_v5, 5  ;;  %v2957_v15 = vshrl.u32 %v6287_v60, 16  ;;  %v6343_v62 = vld [vmem:[%s7427_s26 + $0x1c] sm:$0xf] }
  0xaf   : > { %v6314_v17 = vcombine.low %v2908_v2, %v2918_v12  ;;  %v2937_v18 = vrot.slane %v2936_v7, 4  ;;  %v2955_v19 = vrot.slane %v2953_v10, 5  ;;  %v2963_v20 = vshll.u32 %v6288_v0, 16  ;;  %v6344_v63 = vld [vmem:[%s7427_s26 + $0x20] sm:$0x1] }
  0xb0   : > { %v2932_v22 = vsel %vm7490_vm5, %v2927_v30, %v2931_v61  ;;  %v2950_v23 = vor.u32 %v2949_v14, %v2946_v9  ;;  %v2959_v24 = vrot.slane %v2957_v15, 4  ;;  %v2968_v27 = vshrl.u32 %v6289_v11, 16  ;;  %v6345_v4 = vld [vmem:[%s7427_s26 + $0x24] sm:$0xe]  ;;  %v6346_v9 = vld [vmem:[%s7427_s26 + $0x28] sm:$0xf] }
  0xb1   : > { %7061 = vmatmul.mubr.msk.bf16.gmra.mrb[72].mxu1 %vm408_vm0, %v7341_v54  ;;  %7097 = vmatmul.mubr.msk.bf16.gmra.mrb[68].mxu0 %vm408_vm0, %v6314_v17  ;;  %v2942_v29 = vsel %vm7490_vm5, %v2937_v18, %v2941_v8  ;;  %v2965_v31 = vrot.slane %v2963_v20, 5  ;;  %v2971_v46 = vshll.u32 %v6289_v11, 16  ;;  %v2977_v32 = vshll.u32 %v6290_v16, 16  ;;  %v6347_v14 = vld [vmem:[%s7427_s26 + $0x2c] sm:$0x1] }
  0xb2   : > { %7064 = vmatprep.mubr.msk.bf16.mxu1 %vm408_vm0, %v7343_v6  ;;  %v6315_v34 = vcombine.low %v2932_v22, %v2942_v29  ;;  %v2951_v35 = vrot.slane %v2950_v23, 4  ;;  %v2960_v13 = vor.u32 %v2959_v24, %v2955_v19  ;;  %v2970_v36 = vrot.slane %v2968_v27, 4  ;;  %v6348_v24 = vld [vmem:[%s7427_s26 + $0x30] sm:$0xe] }
  0xb3   : > { %v2973_v38 = vrot.slane %v2971_v46, 5  ;;  %v2979_v39 = vrot.slane %v2977_v32, 5  ;;  %v2981_v40 = vshrl.u32 %v6290_v16, 16  ;;  %v2987_v41 = vshll.u32 %v6291_v26, 16  ;;  %v6349_v26 = vld [vmem:[%s7427_s26 + $0x34] sm:$0xf] }
  0xb4   : > { %7100 = vmatprep.mubr.msk.bf16.mxu0 %vm408_vm0, %v6315_v34  ;;  %v2956_v44 = vsel %vm7490_vm5, %v2951_v35, %v2955_v19  ;;  %v2961_v45 = vrot.slane %v2960_v13, 4  ;;  %v6387_v48 = vrot.slane %v6339_v28, 9  ;;  %v3499_v58 = vrot.slane %v6340_v33, 5  ;;  %v6350_v46 = vld [vmem:[%s7427_s26 + $0x38] sm:$0x1] }
  0xb5   : > { %v2974_v50 = vor.u32 %v2973_v38, %v2970_v36  ;;  %v2983_v52 = vrot.slane %v2981_v40, 4  ;;  %v2989_v53 = vrot.slane %v2987_v41, 5  ;;  %v3502_v54 = vrot.slane %v6341_v37, 5 }
  0xb6   : > { %v2966_v57 = vsel %vm7490_vm5, %v2961_v45, %v2965_v31  ;;  %v3500_v59 = vsel %vm7526_vm6, %v6387_v48, %v3499_v58  ;;  %v3501_v60 = vrot.slane %v3499_v58, 4  ;;  %v2992_v61 = vshrl.u32 %v6292_v42, 16 }
  0xb7   : > { %v6316_v0 = vcombine.low %v2956_v44, %v2966_v57  ;;  %v2975_v1 = vrot.slane %v2974_v50, 4  ;;  %v2984_v2 = vor.u32 %v2983_v52, %v2979_v39  ;;  %v2995_v3 = vshll.u32 %v6292_v42, 16  ;;  %v6351_v44 = vld [vmem:[%s7427_s26 + $0x3c] sm:$0xe]  ;;  %v6353_v50 = vld [vmem:[%s7427_s26 + $0x44] sm:$0x1] }
  0xb8   : > { %v3503_v5 = vsel %vm7526_vm6, %v3501_v60, %v3502_v54  ;;  %v2994_v6 = vrot.slane %v2992_v61, 4  ;;  %v3001_v7 = vshll.u32 %v6293_v49, 16  ;;  %v3005_v8 = vshrl.u32 %v6293_v49, 16  ;;  %v6352_v49 = vld [vmem:[%s7427_s26 + $0x40] sm:$0xf]  ;;  %v7352_v52 = vld [vmem:[%s9208_s1 + $0xe8] sm:$0xff]  }
  0xb9   : > { %7065 = vmatmul.mubr.msk.bf16.gmra.mrb[76].mxu1 %vm408_vm0, %v7344_v43  ;;  %7101 = vmatmul.mubr.msk.bf16.gmra.mrb[72].mxu0 %vm408_vm0, %v6316_v0  ;;  %v2980_v10 = vsel %vm7490_vm5, %v2975_v1, %v2979_v39  ;;  %v2985_v11 = vrot.slane %v2984_v2, 4  ;;  %v6411_v12 = vcombine.low %v3500_v59, %v3503_v5  ;;  %v2997_v30 = vrot.slane %v2995_v3, 5  ;;  %v7347_v43 = vld [vmem:[%s7427_s26 + $0x18] sm:$0xff]   ;;  %v8025_v61 = vld [vmem:[%s7427_s26 + $0x48] sm:$0xe] }
  0xba   : > { %v3003_v15 = vrot.slane %v3001_v7, 5  ;;  %v3007_v16 = vrot.slane %v3005_v8, 4  ;;  %v3011_v17 = vshll.u32 %v6294_v55, 16  ;;  %v6388_v18 = vrot.slane %v6342_v56, 9  ;;  %v8041_v1 = vld [vmem:[%s7427_s26 + $0x50] sm:$0x1] }
  0xbb   : > { %v2990_v19 = vsel %vm7490_vm5, %v2985_v11, %v2989_v53  ;;  %7116 = vmatprep.mubr.msk.bf16.mxu1 %vm408_vm0, %v6411_v12  ;;  %v2998_v20 = vor.u32 %v2997_v30, %v2994_v6  ;;  %v3506_v22 = vrot.slane %v6343_v62, 5  ;;  %v3509_v23 = vrot.slane %v6344_v63, 5  ;;  %v8028_v62 = vld [vmem:[%s7427_s26 + $0x4c] sm:$0xf]  ;;  %v7348_v5 = vld [vmem:[%s7427_s26 + $0x24] sm:$0xff]  }
  0xbc   : > { %v6317_v27 = vcombine.low %v2980_v10, %v2990_v19  ;;  %v3008_v28 = vor.u32 %v3007_v16, %v3003_v15  ;;  %v3013_v29 = vrot.slane %v3011_v17, 5  ;;  %v6389_v31 = vrot.slane %v6345_v4, 9  ;;  %v8051_v4 = vld [vmem:[%s9208_s1 + $0xf0] sm:$0xff]   ;;  %v6358_v11 = vld [vmem:[%s7427_s26 + $0x58] sm:$0xf] }
  0xbd   : > { %v2999_v32 = vrot.slane %v2998_v20, 4  ;;  %v3507_v33 = vsel %vm7526_vm6, %v6388_v18, %v3506_v22  ;;  %v3508_v34 = vrot.slane %v3506_v22, 4  ;;  %v3513_v35 = vrot.slane %v6346_v9, 5  ;;  %v8056_v7 = vld [vmem:[%s7427_s26 + $0x54] sm:$0xe] }
  0xbe   : > { %7104 = vmatprep.mubr.msk.bf16.mxu0 %vm408_vm0, %v6317_v27  ;;  %v3009_v13 = vrot.slane %v3008_v28, 4  ;;  %v3516_v36 = vrot.slane %v6347_v14, 5  ;;  %v6390_v37 = vrot.slane %v6348_v24, 9  ;;  %v3520_v38 = vrot.slane %v6349_v26, 5  ;;  %v6359_v12 = vld [vmem:[%s7427_s26 + $0x5c] sm:$0x1] }
  0xbf   : > { %v3004_v39 = vsel %vm7490_vm5, %v2999_v32, %v3003_v15  ;;  %v3510_v40 = vsel %vm7526_vm6, %v3508_v34, %v3509_v23  ;;  %v3514_v41 = vsel %vm7526_vm6, %v6389_v31, %v3513_v35  ;;  %v3515_v42 = vrot.slane %v3513_v35, 4  ;;  %v7350_v17 = vld [vmem:[%s7427_s26 + $0x30] sm:$0xff]   ;;  %v6361_v20 = vld [vmem:[%s7427_s26 + $0x64] sm:$0xf]  ;;  %v7355_v23 = vld [vmem:[%s9208_s1 + $0x108] sm:$0xff]  }
  0xc0   : > { %v3014_v45 = vsel %vm7490_vm5, %v3009_v13, %v3013_v29  ;;  %v6412_v48 = vcombine.low %v3507_v33, %v3510_v40  ;;  %v3522_v58 = vrot.slane %v3520_v38, 4  ;;  %v3523_v55 = vrot.slane %v6350_v46, 5  ;;  %v7364_v24 = vld [vmem:[%s9208_s1 + $0xf8] sm:$0xff]   ;;  %v6360_v26 = vld [vmem:[%s7427_s26 + $0x60] sm:$0xe] }
  0xc1   : > { %v6318_v53 = vcombine.low %v3004_v39, %v3014_v45  ;;  %v3517_v54 = vsel %vm7526_vm6, %v3515_v42, %v3516_v36  ;;  %v6391_v56 = vrot.slane %v6351_v44, 9  ;;  %v3527_v59 = vrot.slane %v6352_v49, 5  ;;  %v6362_v29 = vld [vmem:[%s7427_s26 + $0x68] sm:$0x1]  ;;  %v6363_v33 = vld [vmem:[%s7427_s26 + $0x6c] sm:$0xe] }
  0xc2   : > { %7117 = vmatmul.mubr.msk.bf16.vlgmr.msra.gmra.mrb[80].mxu1 %vm408_vm0, %v6412_v48  ;;  %v6413_v57 = vcombine.low %v3514_v41, %v3517_v54  ;;  %v3530_v60 = vrot.slane %v6353_v50, 5  ;;  %v8034_v63 = vsel %vm7526_vm6, %v6390_v37, %v3520_v38  ;;  %v8038_v0 = vsel %vm7526_vm6, %v3522_v58, %v3523_v55  ;;  %v6364_v34 = vld [vmem:[%s7427_s26 + $0x70] sm:$0xf]  ;;  %v6365_v35 = vld [vmem:[%s7427_s26 + $0x74] sm:$0x1]  ;;  %v7351_v37 = vld [vmem:[%s7427_s26 + $0x3c] sm:$0xff]  }
  0xc3   : > { %7105 = vmatmul.mubr.msk.bf16.gmra.mrb[76].mxu0 %vm408_vm0, %v6318_v53  ;;  %7189 = vmatpush3.bf16.msra.mxu1 %v7868_v25  ;;  %v3534_v2 = vrot.slane %v8028_v62, 5  ;;  %v3528_v25 = vsel %vm7526_vm6, %v6391_v56, %v3527_v59  ;;  %v3529_v3 = vrot.slane %v3527_v59, 4  ;;  %v6392_v6 = vrot.slane %v8025_v61, 9  ;;  %v7353_v38 = vld [vmem:[%s7427_s26 + $0x48] sm:$0xff]   ;;  %v6367_v41 = vld [vmem:[%s7427_s26 + $0x7c] sm:$0xf] }
  0xc4   : > { %7120 = vmatprep.mubr.msk.bf16.mxu1 %vm408_vm0, %v6413_v57  ;;  %7156 = vmatprep.mubr.msk.bf16.mxu0 %vm408_vm0, %v7347_v43  ;;  %v6414_v8 = vcombine.low %v8034_v63, %v8038_v0  ;;  %v3537_v10 = vrot.slane %v8041_v1, 5  ;;  %v3541_v15 = vrot.slane %v6358_v11, 5  ;;  %v7378_v16 = vmov 0.0   ;;  %v6366_v45 = vld [vmem:[%s7427_s26 + $0x78] sm:$0xe] }
  0xc5   : > { %7190 = vmatprep.subr.bf16.mxu1 %v7352_v52  ;;  %v3531_v9 = vsel %vm7526_vm6, %v3529_v3, %v3530_v60  ;;  %v3536_v14 = vrot.slane %v3534_v2, 4  ;;  %218 = vst.msk [vmem:[#allocation2 + $0x90] sm:$0xff] %vm199_vm7, %v7378_v16  ;;  %200 = vst.msk [vmem:[#allocation2] sm:$0xff] %vm199_vm7, %v7378_v16  ;;  %v6393_v18 = vrot.slane %v8056_v7, 9  ;;  %v3544_v19 = vrot.slane %v6359_v12, 5  ;;  %v7354_v7 = vld [vmem:[%s7427_s26 + $0x54] sm:$0xff]  }
  0xc6   : > { %v6415_v30 = vcombine.low %v3528_v25, %v3531_v9  ;;  %201 = vst.msk [vmem:[#allocation2 + $0x8] sm:$0xff] %vm199_vm7, %v7378_v16  ;;  %202 = vst.msk [vmem:[#allocation2 + $0x10] sm:$0xff] %vm199_vm7, %v7378_v16  ;;  %v3543_v22 = vrot.slane %v3541_v15, 4  ;;  %v3535_v27 = vsel %vm7526_vm6, %v6392_v6, %v3534_v2  ;;  %v3548_v31 = vrot.slane %v6361_v20, 5  ;;  %v6368_v49 = vld [vmem:[%s7427_s26 + $0x80] sm:$0x1] }
  0xc7   : > { %7191 = vmatpush3.bf16.msra.mxu1 %v7352_v52  ;;  %203 = vst.msk [vmem:[#allocation2 + $0x18] sm:$0xff] %vm199_vm7, %v7378_v16  ;;  %204 = vst.msk [vmem:[#allocation2 + $0x20] sm:$0xff] %vm199_vm7, %v7378_v16  ;;  %v3538_v28 = vsel %vm7526_vm6, %v3536_v14, %v3537_v10  ;;  %v3542_v46 = vsel %vm7526_vm6, %v6393_v18, %v3541_v15  ;;  %v3555_v13 = vrot.slane %v6364_v34, 5  ;;  %v6394_v39 = vrot.slane %v6360_v26, 9  ;;  %v7367_v52 = vld [vmem:[%s9208_s1 + $0x118] sm:$0xff]   ;;  %v7356_v9 = vld [vmem:[%s7427_s26 + $0x60] sm:$0xff]  }
  0xc8   : > { %205 = vst.msk [vmem:[#allocation2 + $0x28] sm:$0xff] %vm199_vm7, %v7378_v16  ;;  %206 = vst.msk [vmem:[#allocation2 + $0x30] sm:$0xff] %vm199_vm7, %v7378_v16  ;;  %7192 = vmatprep.subr.bf16.mxu1 %v8051_v4  ;;  %v3545_v32 = vsel %vm7526_vm6, %v3543_v22, %v3544_v19  ;;  %v6416_v36 = vcombine.low %v3535_v27, %v3538_v28  ;;  %v3551_v40 = vrot.slane %v6362_v29, 5  ;;  %v3550_v43 = vrot.slane %v3548_v31, 4  ;;  %v6369_v53 = vld [vmem:[%s7427_s26 + $0x84] sm:$0xe] }
  0xc9   : > { %207 = vst.msk [vmem:[#allocation2 + $0x38] sm:$0xff] %vm199_vm7, %v7378_v16  ;;  %208 = vst.msk [vmem:[#allocation2 + $0x40] sm:$0xff] %vm199_vm7, %v7378_v16  ;;  %v6417_v42 = vcombine.low %v3542_v46, %v3545_v32  ;;  %v6395_v44 = vrot.slane %v6363_v33, 9  ;;  %v3557_v48 = vrot.slane %v3555_v13, 4  ;;  %v3558_v58 = vrot.slane %v6365_v35, 5  ;;  %v7357_v35 = vld [vmem:[%s7427_s26 + $0x6c] sm:$0xff]  }
  0xca   : > { %209 = vst.msk [vmem:[#allocation2 + $0x48] sm:$0xff] %vm199_vm7, %v7378_v16  ;;  %210 = vst.msk [vmem:[#allocation2 + $0x50] sm:$0xff] %vm199_vm7, %v7378_v16  ;;  %7121 = vmatmul.mubr.msk.bf16.gmra.mrb[84].mxu1 %vm408_vm0, %v6414_v8  ;;  %v3562_v50 = vrot.slane %v6367_v41, 5  ;;  %v6370_v54 = vld [vmem:[%s7427_s26 + $0x88] sm:$0xf]  ;;  %v3549_v56 = vsel %vm7526_vm6, %v6394_v39, %v3548_v31  ;;  %v3552_v57 = vsel %vm7526_vm6, %v3550_v43, %v3551_v40  ;;  %v6396_v62 = vrot.slane %v6366_v45, 9 }
  0xcb   : > { %211 = vst.msk [vmem:[#allocation2 + $0x58] sm:$0xff] %vm199_vm7, %v7378_v16  ;;  %212 = vst.msk [vmem:[#allocation2 + $0x60] sm:$0xff] %vm199_vm7, %v7378_v16  ;;  %7157 = vmatmul.mubr.msk.bf16.vlgmr.msra.gmra.mrb[80].mxu0 %vm408_vm0, %v7348_v5  ;;  %7124 = vmatprep.mubr.msk.bf16.mxu1 %vm408_vm0, %v6415_v30  ;;  %v6371_v55 = vld [vmem:[%s7427_s26 + $0x8c] sm:$0x1]  ;;  %v3569_v59 = vrot.slane %v6370_v54, 5  ;;  %v3556_v60 = vsel %vm7526_vm6, %v6395_v44, %v3555_v13  ;;  %v3559_v61 = vsel %vm7526_vm6, %v3557_v48, %v3558_v58  ;;  %v7359_v40 = vld [vmem:[%s7427_s26 + $0x78] sm:$0xff]  }
  0xcc   : > { %213 = vst.msk [vmem:[#allocation2 + $0x68] sm:$0xff] %vm199_vm7, %v7378_v16  ;;  %214 = vst.msk [vmem:[#allocation2 + $0x70] sm:$0xff] %vm199_vm7, %v7378_v16  ;;  %7229 = vmatpush3.bf16.msra.mxu0 %v7889_v51  ;;  %7160 = vmatprep.mubr.msk.bf16.mxu0 %vm408_vm0, %v7350_v17  ;;  %v7361_v51 = vld [vmem:[%s9208_s1 + $0x110] sm:$0xff]   ;;  %v3565_v63 = vrot.slane %v6368_v49, 5  ;;  %v3564_v2 = vrot.slane %v3562_v50, 4  ;;  %v6397_v25 = vrot.slane %v6369_v53, 9  ;;  %v6419_v8 = vcombine.low %v3556_v60, %v3559_v61 }
  0xcd   : > { %215 = vst.msk [vmem:[#allocation2 + $0x78] sm:$0xff] %vm199_vm7, %v7378_v16  ;;  %216 = vst.msk [vmem:[#allocation2 + $0x80] sm:$0xff] %vm199_vm7, %v7378_v16  ;;  %7230 = vmatprep.subr.bf16.mxu0 %v7355_v23  ;;  %7193 = vmatpush3.bf16.msra.mxu1 %v8051_v4  ;;  %v6372_v0 = vld [vmem:[%s7427_s26 + $0x90] sm:$0xe]  ;;  %v6373_v1 = vld [vmem:[%s7427_s26 + $0x94] sm:$0xf]  ;;  %v6418_v4 = vcombine.low %v3549_v56, %v3552_v57  ;;  %v3563_v17 = vsel %vm7526_vm6, %v6396_v62, %v3562_v50 }
  0xce   : > { %217 = vst.msk [vmem:[#allocation2 + $0x88] sm:$0xff] %vm199_vm7, %v7378_v16  ;;  %219 = vst.msk [vmem:[#allocation2 + $0x98] sm:$0xff] %vm199_vm7, %v7378_v16  ;;  %7194 = vmatprep.subr.bf16.mxu1 %v7364_v24  ;;  %v6374_v3 = vld [vmem:[%s7427_s26 + $0x98] sm:$0x1]  ;;  %v3571_v5 = vrot.slane %v3569_v59, 4  ;;  %v3572_v6 = vrot.slane %v6371_v55, 5  ;;  %v3566_v18 = vsel %vm7526_vm6, %v3564_v2, %v3565_v63  ;;  %v8171_v19 = vsel %vm7526_vm6, %v6397_v25, %v3569_v59 }
  0xcf   : > { %220 = vst.msk [vmem:[#allocation2 + $0xa0] sm:$0xff] %vm199_vm7, %v7378_v16  ;;  %221 = vst.msk [vmem:[#allocation2 + $0xa8] sm:$0xff] %vm199_vm7, %v7378_v16  ;;  %v6398_v10 = vrot.slane %v6372_v0, 9  ;;  %v3576_v11 = vrot.slane %v6373_v1, 5  ;;  %v6375_v12 = vld [vmem:[%s7427_s26 + $0x9c] sm:$0xe] }
  0xd0   : > { %222 = vst.msk [vmem:[#allocation2 + $0xb0] sm:$0xff] %vm199_vm7, %v7378_v16  ;;  %223 = vst.msk [vmem:[#allocation2 + $0xb8] sm:$0xff] %vm199_vm7, %v7378_v16  ;;  %7231 = vmatpush3.bf16.msra.mxu0 %v7355_v23  ;;  %v6376_v30 = vld [vmem:[%s7427_s26 + $0xa0] sm:$0xf]  ;;  %v6377_v14 = vld [vmem:[%s7427_s26 + $0xa4] sm:$0x1]  ;;  %v3573_v20 = vsel %vm7526_vm6, %v3571_v5, %v3572_v6 }
  0xd1   : > { %224 = vst.msk [vmem:[#allocation2 + $0xc0] sm:$0xff] %vm199_vm7, %v7378_v16  ;;  %225 = vst.msk [vmem:[#allocation2 + $0xc8] sm:$0xff] %vm199_vm7, %v7378_v16  ;;  %7232 = vmatprep.subr.bf16.mxu0 %v7361_v51  ;;  %7195 = vmatpush3.bf16.msra.mxu1 %v7364_v24  ;;  %v3579_v15 = vrot.slane %v6374_v3, 5  ;;  %v6378_v22 = vld [vmem:[%s7427_s26 + $0xa8] sm:$0xe]  ;;  %v3578_v26 = vrot.slane %v3576_v11, 4  ;;  %v6421_v39 = vcombine.low %v8171_v19, %v3573_v20 }
  0xd2   : > { %226 = vst.msk [vmem:[#allocation2 + $0xd0] sm:$0xff] %vm199_vm7, %v7378_v16  ;;  %227 = vst.msk [vmem:[#allocation2 + $0xd8] sm:$0xff] %vm199_vm7, %v7378_v16  ;;  %7125 = vmatmul.mubr.msk.bf16.gmra.mrb[88].mxu1 %vm408_vm0, %v6416_v36  ;;  %v6379_v23 = vld [vmem:[%s7427_s26 + $0xac] sm:$0xf]  ;;  %v6380_v24 = vld [vmem:[%s7427_s26 + $0xb0] sm:$0x1]  ;;  %v8187_v41 = vsel %vm7526_vm6, %v6398_v10, %v3576_v11 }
  0xd3   : > { %228 = vst.msk [vmem:[#allocation2 + $0xe0] sm:$0xff] %vm199_vm7, %v7378_v16  ;;  %229 = vst.msk [vmem:[#allocation2 + $0xe8] sm:$0xff] %vm199_vm7, %v7378_v16  ;;  %7161 = vmatmul.mubr.msk.bf16.gmra.mrb[84].mxu0 %vm408_vm0, %v7351_v37  ;;  %7128 = vmatprep.mubr.msk.bf16.mxu1 %vm408_vm0, %v6417_v42  ;;  %v6399_v27 = vrot.slane %v6375_v12, 9  ;;  %v3586_v28 = vrot.slane %v6377_v14, 5  ;;  %v3590_v29 = vrot.slane %v6379_v23, 5  ;;  %v282_v31 = vld [vmem:[#allocation2 + $0x90] sm:$0xff]  ;;  %v8193_v58 = vsel %vm7526_vm6, %v3578_v26, %v3579_v15 }
  0xd4   : > { %230 = vst.msk [vmem:[#allocation2 + $0xf0] sm:$0xff] %vm199_vm7, %v7378_v16  ;;  %231 = vst.msk [vmem:[#allocation2 + $0xf8] sm:$0xff] %vm199_vm7, %v7378_v16  ;;  %7164 = vmatprep.mubr.msk.bf16.mxu0 %vm408_vm0, %v7353_v38  ;;  %7233 = vmatpush3.bf16.msra.mxu0 %v7361_v51  ;;  %v3583_v16 = vrot.slane %v6376_v30, 5  ;;  %v266_v46 = vld [vmem:[#allocation2 + $0x10] sm:$0xff]  ;;  %v6400_v33 = vrot.slane %v6378_v22, 9  ;;  %v280_v34 = vld [vmem:[#allocation2 + $0x80] sm:$0xff]  ;;  %v6420_v38 = vcombine.low %v3563_v17, %v3566_v18 }
  0xd5   : > { %7234 = vmatprep.subr.bf16.mxu0 %v7367_v52  ;;  %v3592_v13 = vrot.slane %v3590_v29, 4  ;;  %v3593_v51 = vrot.slane %v6380_v24, 5  ;;  %v283_v36 = vld [vmem:[#allocation2 + $0x98] sm:$0xff]  ;;  %v6381_v37 = vld [vmem:[%s7427_s26 + $0xb4] sm:$0xe]  ;;  %v281_v42 = vld [vmem:[#allocation2 + $0x88] sm:$0xff]  ;;  %v6422_v14 = vcombine.low %v8187_v41, %v8193_v58 }
  0xd6   : > { %v3585_v32 = vrot.slane %v3583_v16, 4  ;;  %v6382_v43 = vld [vmem:[%s7427_s26 + $0xb8] sm:$0xf]  ;;  %v6383_v44 = vld [vmem:[%s7427_s26 + $0xbc] sm:$0x1]  ;;  %v6401_v45 = vrot.slane %v6381_v37, 9  ;;  %v8197_v49 = vsel %vm7526_vm6, %v6399_v27, %v3583_v16  ;;  %v8205_v56 = vsel %vm7526_vm6, %v6400_v33, %v3590_v29 }
  0xd7   : > { %v264_v48 = vld [vmem:[#allocation2] sm:$0xff]  ;;  %v3600_v53 = vrot.slane %v6383_v44, 5  ;;  %v267_v63 = vld [vmem:[#allocation2 + $0x18] sm:$0xff]  ;;  %v8210_v0 = vsel %vm7526_vm6, %v3592_v13, %v3593_v51  ;;  %v265_v6 = vld [vmem:[#allocation2 + $0x8] sm:$0xff] }
  0xd8   : > { %7235 = vmatpush3.bf16.msra.mxu0 %v7367_v52  ;;  %v3597_v52 = vrot.slane %v6382_v43, 5  ;;  %v8201_v55 = vsel %vm7526_vm6, %v3585_v32, %v3586_v28  ;;  %v6384_v60 = vld [vmem:[%s7427_s26 + $0xc0] sm:$0xe]  ;;  %v6385_v3 = vld [vmem:[%s7427_s26 + $0xc4] sm:$0xf]  ;;  %v286_v30 = vld [vmem:[#allocation2 + $0xb0] sm:$0xff]  ;;  %v6424_v23 = vcombine.low %v8205_v56, %v8210_v0 }
  0xd9   : > { %v3604_v10 = vrot.slane %v6385_v3, 5  ;;  %v284_v18 = vld [vmem:[#allocation2 + $0xa0] sm:$0xff]  ;;  %v6423_v22 = vcombine.low %v8197_v49, %v8201_v55  ;;  %v287_v27 = vld [vmem:[#allocation2 + $0xb8] sm:$0xff]  ;;  %v6527_v55 = vld [vmem:[%s7427_s26 + $0x28] sm:$0xf] }
  0xda   : > { %7129 = vmatmul.mubr.msk.bf16.gmra.mrb[92].mxu1 %vm408_vm0, %v6418_v4  ;;  %v3599_v25 = vrot.slane %v3597_v52, 4  ;;  %v6386_v4 = vld [vmem:[%s7427_s26 + $0xc8] sm:$0x1]  ;;  %v8227_v15 = vsel %vm7526_vm6, %v6401_v45, %v3597_v52  ;;  %v6523_v29 = vld [vmem:[%s7427_s26 + $0x18] sm:$0xf]  ;;  %v4528_v3 = vshll.u32 %v6527_v55, 16 }
  0xdb   : > { %7165 = vmatmul.mubr.msk.bf16.gmra.mrb[88].mxu0 %vm408_vm0, %v7354_v7  ;;  %7132 = vmatprep.mubr.msk.bf16.mxu1 %vm408_vm0, %v6419_v8  ;;  %v3607_v11 = vrot.slane %v6386_v4, 5  ;;  %v3606_v17 = vrot.slane %v3604_v10, 4  ;;  %v7360_v20 = vld [vmem:[%s7427_s26 + $0x84] sm:$0xff]   ;;  %v4495_v13 = vshrl.u32 %v6523_v29, 16  ;;  %v4498_v51 = vshll.u32 %v6523_v29, 16 }
  0xdc   : > { %7168 = vmatprep.mubr.msk.bf16.mxu0 %vm408_vm0, %v7356_v9  ;;  %v6402_v9 = vrot.slane %v6384_v60, 9  ;;  %v8231_v16 = vsel %vm7526_vm6, %v3599_v25, %v3600_v53  ;;  %v4532_v4 = vshrl.u32 %v6527_v55, 16 }
  0xdd   : > { %v8248_v32 = vsel %vm7526_vm6, %v3606_v17, %v3607_v11  ;;  %v4497_v44 = vrot.slane %v4495_v13, 4  ;;  %v4500_v45 = vrot.slane %v4498_v51, 5  ;;  %v6530_v13 = vld [vmem:[%s7427_s26 + $0x34] sm:$0xf] }
  0xde   : > { %v8241_v24 = vsel %vm7526_vm6, %v6402_v9, %v3604_v10 }
  0xdf   : > { %v6426_v41 = vcombine.low %v8241_v24, %v8248_v32  ;;  %v4501_v60 = vor.u32 %v4500_v45, %v4497_v44 }
  0xe2   : > { %7133 = vmatmul.mubr.msk.bf16.gmra.mrb[96].mxu1 %vm408_vm0, %v6420_v38 }
  0xe3   : > { %7169 = vmatmul.mubr.msk.bf16.gmra.mrb[92].mxu0 %vm408_vm0, %v7357_v35  ;;  %7136 = vmatprep.mubr.msk.bf16.mxu1 %vm408_vm0, %v6421_v39  ;;  %v6525_v35 = vld [vmem:[%s7427_s26 + $0x20] sm:$0x1] }
  0xe4   : > { %7172 = vmatprep.mubr.msk.bf16.mxu0 %vm408_vm0, %v7359_v40  ;;  %v4514_v40 = vshll.u32 %v6525_v35, 16  ;;  %v6529_v35 = vld [vmem:[%s7427_s26 + $0x30] sm:$0xf] }
  0xe9   : > { %v6934_v50 = vpop.f32.mrb[0].mxu1 }
  0xea   : > { %v6918_v54 = vpop.f32.mrb[0].mxu0  ;;  %v636_v57 = vadd.f32 %v6934_v50, %v282_v31  ;;  %v555_v59 = vpop.f32.mrb[1].mxu1  ;;  %v6524_v31 = vld [vmem:[%s7427_s26 + $0x1c] sm:$0xf]  ;;  %7137 = vmatmul.mubr.msk.bf16.gmra.mrb[100].mxu1 %vm408_vm0, %v6422_v14 }
  0xeb   : > { %v620_v61 = vadd.f32 %v6918_v54, %v266_v46  ;;  %v491_v62 = vpop.f32.mrb[1].mxu0  ;;  %v634_v1 = vadd.f32 %v555_v59, %v280_v34  ;;  %v6935_v2 = vpop.f32.mrb[2].mxu1  ;;  %v7362_v46 = vld [vmem:[%s7427_s26 + $0x90] sm:$0xff]   ;;  %v285_v34 = vld [vmem:[#allocation2 + $0xa8] sm:$0xff]  ;;  %v4504_v38 = vshll.u32 %v6524_v31, 16  ;;  %v4508_v39 = vshrl.u32 %v6524_v31, 16  ;;  %7173 = vmatmul.mubr.msk.bf16.gmra.mrb[96].mxu0 %vm408_vm0, %v7360_v20  ;;  %7140 = vmatprep.mubr.msk.bf16.mxu1 %vm408_vm0, %v6423_v22 }
  0xec   : > { %v618_v5 = vadd.f32 %v491_v62, %v264_v48  ;;  %668 = vst.msk [vmem:[#allocation2 + $0x90] sm:$0xff] %vm199_vm7, %v636_v57  ;;  %v637_v7 = vadd.f32 %v6935_v2, %v283_v36  ;;  %v558_v8 = vpop.f32.mrb[3].mxu1  ;;  %v6919_v19 = vpop.f32.mrb[2].mxu0  ;;  %v6425_v36 = vcombine.low %v8227_v15, %v8231_v16  ;;  %v6526_v48 = vld [vmem:[%s7427_s26 + $0x24] sm:$0xf]  ;;  %v4516_v54 = vrot.slane %v4514_v40, 5  ;;  %7176 = vmatprep.mubr.msk.bf16.mxu0 %vm408_vm0, %v7362_v46 }
  0xed   : > { %652 = vst.msk [vmem:[#allocation2 + $0x10] sm:$0xff] %vm199_vm7, %v620_v61  ;;  %666 = vst.msk [vmem:[#allocation2 + $0x80] sm:$0xff] %vm199_vm7, %v634_v1  ;;  %v635_v12 = vadd.f32 %v558_v8, %v281_v42  ;;  %v621_v26 = vadd.f32 %v6919_v19, %v267_v63  ;;  %v494_v28 = vpop.f32.mrb[3].mxu0  ;;  %v4506_v52 = vrot.slane %v4504_v38, 5  ;;  %v4510_v53 = vrot.slane %v4508_v39, 4  ;;  %v270_v1 = vld [vmem:[#allocation2 + $0x30] sm:$0xff] }
  0xee   : > { %650 = vst.msk [vmem:[#allocation2] sm:$0xff] %vm199_vm7, %v618_v5  ;;  %669 = vst.msk [vmem:[#allocation2 + $0x98] sm:$0xff] %vm199_vm7, %v637_v7  ;;  %v619_v33 = vadd.f32 %v494_v28, %v265_v6  ;;  %v6528_v61 = vld [vmem:[%s7427_s26 + $0x2c] sm:$0x1]  ;;  %v4519_v62 = vshrl.u32 %v6526_v48, 16  ;;  %v4522_v63 = vshll.u32 %v6526_v48, 16 }
  0xef   : > { %667 = vst.msk [vmem:[#allocation2 + $0x88] sm:$0xff] %vm199_vm7, %v635_v12  ;;  %653 = vst.msk [vmem:[#allocation2 + $0x18] sm:$0xff] %vm199_vm7, %v621_v26  ;;  %v4511_v25 = vor.u32 %v4510_v53, %v4506_v52  ;;  %v290_v5 = vld [vmem:[#allocation2 + $0xd0] sm:$0xff]  ;;  %v268_v6 = vld [vmem:[#allocation2 + $0x20] sm:$0xff]  ;;  %v4502_v8 = vrot.slane %v4501_v60, 4  ;;  %v4538_v11 = vshll.u32 %v6528_v61, 16 }
  0xf0   : > { %651 = vst.msk [vmem:[#allocation2 + $0x8] sm:$0xff] %vm199_vm7, %v619_v33  ;;  %v4521_v9 = vrot.slane %v4519_v62, 4  ;;  %v4524_v10 = vrot.slane %v4522_v63, 5  ;;  %v271_v12 = vld [vmem:[#allocation2 + $0x38] sm:$0xff]  ;;  %v4534_v19 = vrot.slane %v4532_v4, 4  ;;  %v288_v22 = vld [vmem:[#allocation2 + $0xc0] sm:$0xff] }
  0xf1   : > { %v6938_v37 = vpop.f32.mrb[4].mxu1  ;;  %v7363_v14 = vld [vmem:[%s7427_s26 + $0x9c] sm:$0xff]   ;;  %v4512_v17 = vrot.slane %v4511_v25, 4  ;;  %v269_v26 = vld [vmem:[#allocation2 + $0x28] sm:$0xff]  ;;  %v4507_v29 = vsel %vm7490_vm5, %v4502_v8, %v4506_v52  ;;  %v4540_v46 = vrot.slane %v4538_v11, 5  ;;  %v4543_v52 = vshrl.u32 %v6529_v35, 16 }
  0xf2   : > { %v640_v42 = vadd.f32 %v6938_v37, %v286_v30  ;;  %v571_v43 = vpop.f32.mrb[5].mxu1  ;;  %v6922_v58 = vpop.f32.mrb[4].mxu0  ;;  %v7365_v28 = vld [vmem:[%s7427_s26 + $0xa8] sm:$0xff]   ;;  %v4525_v31 = vor.u32 %v4524_v10, %v4521_v9  ;;  %v6616_v53 = vld [vmem:[%s7427_s26 + $0x1c] sm:$0xf]  ;;  %v4552_v60 = vshll.u32 %v6530_v13, 16  ;;  %7141 = vmatmul.mubr.msk.bf16.gmra.mrb[104].mxu1 %vm408_vm0, %v6424_v23 }
  0xf3   : > { %v638_v49 = vadd.f32 %v571_v43, %v284_v18  ;;  %v6939_v50 = vpop.f32.mrb[6].mxu1  ;;  %v507_v7 = vpop.f32.mrb[5].mxu0  ;;  %v4530_v18 = vrot.slane %v4528_v3, 5  ;;  %v624_v20 = vadd.f32 %v6922_v58, %v270_v1  ;;  %v4517_v51 = vsel %vm7490_vm5, %v4512_v17, %v4516_v54  ;;  %v6615_v43 = vld [vmem:[%s7427_s26 + $0x18] sm:$0xe]  ;;  %7177 = vmatmul.mubr.msk.bf16.gmra.mrb[100].mxu0 %vm408_vm0, %v7363_v14  ;;  %7144 = vmatprep.mubr.msk.bf16.mxu1 %vm408_vm0, %v6425_v36 }
  0xf4   : > { %672 = vst.msk [vmem:[#allocation2 + $0xb0] sm:$0xff] %vm199_vm7, %v640_v42  ;;  %v641_v57 = vadd.f32 %v6939_v50, %v287_v27  ;;  %v574_v59 = vpop.f32.mrb[7].mxu1  ;;  %v6923_v30 = vpop.f32.mrb[6].mxu0  ;;  %v622_v33 = vadd.f32 %v507_v7, %v268_v6  ;;  %v6531_v42 = vld [vmem:[%s7427_s26 + $0x38] sm:$0x1]  ;;  %v8281_v45 = vcombine.low %v4507_v29, %v4517_v51  ;;  %v4526_v48 = vrot.slane %v4525_v31, 4  ;;  %7180 = vmatprep.mubr.msk.bf16.mxu0 %vm408_vm0, %v7365_v28 }
  0xf5   : > { %670 = vst.msk [vmem:[#allocation2 + $0xa0] sm:$0xff] %vm199_vm7, %v638_v49  ;;  %v639_v2 = vadd.f32 %v574_v59, %v285_v34  ;;  %v510_v27 = vpop.f32.mrb[7].mxu0  ;;  %v291_v34 = vld [vmem:[#allocation2 + $0xd8] sm:$0xff]  ;;  %v4535_v37 = vor.u32 %v4534_v19, %v4530_v18  ;;  %656 = vst.msk [vmem:[#allocation2 + $0x30] sm:$0xff] %vm199_vm7, %v624_v20  ;;  %v625_v39 = vadd.f32 %v6923_v30, %v271_v12  ;;  %v289_v50 = vld [vmem:[#allocation2 + $0xc8] sm:$0xff]  ;;  %v4546_v59 = vshll.u32 %v6529_v35, 16 }
  0xf6   : > { %673 = vst.msk [vmem:[#allocation2 + $0xb8] sm:$0xff] %vm199_vm7, %v641_v57  ;;  %v623_v40 = vadd.f32 %v510_v27, %v269_v26  ;;  %654 = vst.msk [vmem:[#allocation2 + $0x20] sm:$0xff] %vm199_vm7, %v622_v33  ;;  %v6617_v61 = vld [vmem:[%s7427_s26 + $0x20] sm:$0x1]  ;;  %v4531_v62 = vsel %vm7490_vm5, %v4526_v48, %v4530_v18  ;;  %v4556_v25 = vshrl.u32 %v6530_v13, 16  ;;  %v4554_v4 = vrot.slane %v4552_v60, 5 }
  0xf7   : > { %671 = vst.msk [vmem:[#allocation2 + $0xa8] sm:$0xff] %vm199_vm7, %v639_v2  ;;  %v4536_v54 = vrot.slane %v4535_v37, 4  ;;  %657 = vst.msk [vmem:[#allocation2 + $0x38] sm:$0xff] %vm199_vm7, %v625_v39  ;;  %v4545_v2 = vrot.slane %v4543_v52, 4  ;;  %v6532_v3 = vld [vmem:[%s7427_s26 + $0x3c] sm:$0xf] }
  0xf8   : > { %655 = vst.msk [vmem:[#allocation2 + $0x28] sm:$0xff] %vm199_vm7, %v623_v40  ;;  %v4548_v23 = vrot.slane %v4546_v59, 5  ;;  %v4558_v15 = vrot.slane %v4556_v25, 4  ;;  %v4562_v16 = vshll.u32 %v6531_v42, 16  ;;  %v6663_v36 = vrot.slane %v6615_v43, 9  ;;  %v7366_v26 = vld [vmem:[%s7427_s26 + $0xb4] sm:$0xff]  }
  0xf9   : > { %v6942_v38 = vpop.f32.mrb[8].mxu1  ;;  %v4541_v56 = vsel %vm7490_vm5, %v4536_v54, %v4540_v46  ;;  %v6534_v7 = vld [vmem:[%s7427_s26 + $0x44] sm:$0x1]  ;;  %v5362_v10 = vrot.slane %v6616_v53, 5  ;;  %v5365_v11 = vrot.slane %v6617_v61, 5  ;;  %v4567_v12 = vshrl.u32 %v6532_v3, 16 }
  0xfa   : > { %v8279_v44 = vpop.f32.mrb[8].mxu0  ;;  %v644_v58 = vadd.f32 %v6942_v38, %v290_v5  ;;  %v587_v49 = vpop.f32.mrb[9].mxu1  ;;  %v6533_v5 = vld [vmem:[%s7427_s26 + $0x40] sm:$0xf]  ;;  %v8306_v6 = vcombine.low %v4531_v62, %v4541_v56  ;;  %v4549_v9 = vor.u32 %v4548_v23, %v4545_v2  ;;  %v6618_v30 = vld [vmem:[%s7427_s26 + $0x24] sm:$0xe]  ;;  %v4559_v14 = vor.u32 %v4558_v15, %v4554_v4  ;;  %7145 = vmatmul.mubr.msk.bf16.gmra.mrb[108].mxu1 %vm408_vm0, %v6426_v41 }
  0xfb   : > { %v642_v55 = vadd.f32 %v587_v49, %v288_v22  ;;  %v6943_v57 = vpop.f32.mrb[10].mxu1  ;;  %v523_v8 = vpop.f32.mrb[9].mxu0  ;;  %v4564_v17 = vrot.slane %v4562_v16, 5  ;;  %v4570_v18 = vshll.u32 %v6532_v3, 16  ;;  %v4576_v19 = vshll.u32 %v6533_v5, 16  ;;  %v274_v48 = vld [vmem:[#allocation2 + $0x50] sm:$0xff]  ;;  %7181 = vmatmul.mubr.msk.bf16.gmra.mrb[104].mxu0 %vm408_vm0, %v7366_v26  ;;  %7196 = vmatprep.mubr.msk.bf16.mxu1 %vm408_vm0, %v8281_v45 }
  0xfc   : > { %676 = vst.msk [vmem:[#allocation2 + $0xd0] sm:$0xff] %vm199_vm7, %v644_v58  ;;  %v645_v63 = vadd.f32 %v6943_v57, %v291_v34  ;;  %v590_v1 = vpop.f32.mrb[11].mxu1  ;;  %v6619_v20 = vld [vmem:[%s7427_s26 + $0x28] sm:$0xf]  ;;  %v8314_v22 = vld [vmem:[%s7427_s26 + $0x2c] sm:$0x1]  ;;  %v8319_v28 = vsel %vm7526_vm6, %v6663_v36, %v5362_v10  ;;  %v628_v45 = vadd.f32 %v8279_v44, %v274_v48 }
  0xfd   : > { %674 = vst.msk [vmem:[#allocation2 + $0xc0] sm:$0xff] %vm199_vm7, %v642_v55  ;;  %v643_v0 = vadd.f32 %v590_v1, %v289_v50  ;;  %v4550_v27 = vrot.slane %v4549_v9, 4  ;;  %v5364_v29 = vrot.slane %v5362_v10, 4  ;;  %v4569_v31 = vrot.slane %v4567_v12, 4  ;;  %v6927_v33 = vpop.f32.mrb[10].mxu0  ;;  %v7368_v34 = vld [vmem:[%s7427_s26 + $0xc0] sm:$0xff]  }
  0xfe   : > { %677 = vst.msk [vmem:[#allocation2 + $0xd8] sm:$0xff] %vm199_vm7, %v645_v63  ;;  %v4560_v35 = vrot.slane %v4559_v14, 4  ;;  %v4572_v13 = vrot.slane %v4570_v18, 5  ;;  %v8322_v51 = vrot.slane %v4576_v19, 5  ;;  %v4580_v37 = vshrl.u32 %v6533_v5, 16  ;;  %v294_v58 = vld [vmem:[#allocation2 + $0xf0] sm:$0xff]  ;;  %7184 = vmatprep.mubr.msk.bf16.mxu0 %vm408_vm0, %v7368_v34 }
  0xff   : > { %675 = vst.msk [vmem:[#allocation2 + $0xc8] sm:$0xff] %vm199_vm7, %v643_v0  ;;  %v4555_v39 = vsel %vm7490_vm5, %v4550_v27, %v4554_v4  ;;  %v8328_v40 = vsel %vm7526_vm6, %v5364_v29, %v5365_v11  ;;  %v4586_v42 = vshll.u32 %v6534_v7, 16  ;;  %v6664_v43 = vrot.slane %v6618_v30, 9  ;;  %v526_v50 = vpop.f32.mrb[11].mxu0  ;;  %v272_v57 = vld [vmem:[#allocation2 + $0x40] sm:$0xff]  ;;  %v275_v62 = vld [vmem:[#allocation2 + $0x58] sm:$0xff] }
 0x100   : > { %v4565_v52 = vsel %vm7490_vm5, %v4560_v35, %v4564_v17  ;;  %v6687_v53 = vcombine.low %v8319_v28, %v8328_v40  ;;  %v4573_v54 = vor.u32 %v4572_v13, %v4569_v31  ;;  %v4582_v55 = vrot.slane %v4580_v37, 4  ;;  %v292_v59 = vld [vmem:[#allocation2 + $0xe0] sm:$0xff]  ;;  %v295_v63 = vld [vmem:[#allocation2 + $0xf8] sm:$0xff]  ;;  %v273_v56 = vld [vmem:[#allocation2 + $0x48] sm:$0xff]  ;;  %660 = vst.msk [vmem:[#allocation2 + $0x50] sm:$0xff] %vm199_vm7, %v628_v45 }
 0x101   : > { %v6946_v46 = vpop.f32.mrb[12].mxu1  ;;  %v8341_v24 = vcombine.low %v4555_v39, %v4565_v52  ;;  %v4588_v32 = vrot.slane %v4586_v42, 5  ;;  %v5369_v41 = vrot.slane %v6619_v20, 5  ;;  %v5372_v61 = vrot.slane %v8314_v22, 5  ;;  %v293_v0 = vld [vmem:[#allocation2 + $0xe8] sm:$0xff] }
 0x102   : > { %v603_v38 = vpop.f32.mrb[13].mxu1  ;;  %v8344_v1 = vpop.f32.mrb[12].mxu0  ;;  %v4574_v2 = vrot.slane %v4573_v54, 4  ;;  %v4583_v25 = vor.u32 %v4582_v55, %v8322_v51  ;;  %v648_v3 = vadd.f32 %v6946_v46, %v294_v58  ;;  %v6535_v23 = vld [vmem:[%s7427_s26 + $0x48] sm:$0xf]  ;;  %v7369_v4 = vld [vmem:[%s7427_s26 + $0xcc] sm:$0xff]   ;;  %v626_v16 = vadd.f32 %v523_v8, %v272_v57  ;;  %7197 = vmatmul.mubr.msk.bf16.vlgmr.msra.gmra.mrb[112].mxu1 %vm408_vm0, %v8306_v6 }
 0x103   : > { %v6947_v49 = vpop.f32.mrb[14].mxu1  ;;  %v8353_v5 = vsel %vm7526_vm6, %v6664_v43, %v5369_v41  ;;  %v5371_v15 = vrot.slane %v5369_v41, 4  ;;  %v646_v36 = vadd.f32 %v603_v38, %v292_v59  ;;  %v6536_v7 = vld [vmem:[%s7427_s26 + $0x4c] sm:$0xf]  ;;  %v6537_v9 = vld [vmem:[%s7427_s26 + $0x50] sm:$0x1]  ;;  %v629_v11 = vadd.f32 %v6927_v33, %v275_v62  ;;  %7185 = vmatmul.mubr.msk.bf16.gmra.mrb[108].mxu0 %vm408_vm0, %v7369_v4  ;;  %7200 = vmatprep.mubr.msk.bf16.mxu1 %vm408_vm0, %v8341_v24 }
 0x104   : > { %v606_v60 = vpop.f32.mrb[15].mxu1  ;;  %v4579_v44 = vsel %vm7490_vm5, %v4574_v2, %v8322_v51  ;;  %v4584_v10 = vrot.slane %v4583_v25, 4  ;;  %680 = vst.msk [vmem:[#allocation2 + $0xf0] sm:$0xff] %vm199_vm7, %v648_v3  ;;  %v649_v12 = vadd.f32 %v6947_v49, %v295_v63  ;;  %v6621_v30 = vld [vmem:[%s7427_s26 + $0x30] sm:$0xe]  ;;  %v8364_v17 = vpop.f32.mrb[13].mxu0  ;;  %v627_v18 = vadd.f32 %v526_v50, %v273_v56  ;;  %7236 = vmatprep.mubr.msk.bf16.mxu0 %vm408_vm0, %v6687_v53 }
 0x105   : > { %v6622_v14 = vld [vmem:[%s7427_s26 + $0x34] sm:$0xf]  ;;  %v8368_v8 = vsel %vm7526_vm6, %v5371_v15, %v5372_v61  ;;  %658 = vst.msk [vmem:[#allocation2 + $0x40] sm:$0xff] %vm199_vm7, %v626_v16  ;;  %678 = vst.msk [vmem:[#allocation2 + $0xe0] sm:$0xff] %vm199_vm7, %v646_v36  ;;  %v647_v19 = vadd.f32 %v606_v60, %v293_v0  ;;  %v4591_v20 = vshrl.u32 %v6535_v23, 16  ;;  %v4594_v46 = vshll.u32 %v6535_v23, 16 }
 0x106   : > { %v6623_v22 = vld [vmem:[%s7427_s26 + $0x38] sm:$0x1]  ;;  %v6538_v26 = vld [vmem:[%s7427_s26 + $0x54] sm:$0xf]  ;;  %v4589_v29 = vsel %vm7490_vm5, %v4584_v10, %v4588_v32  ;;  %v6688_v31 = vcombine.low %v8353_v5, %v8368_v8  ;;  %661 = vst.msk [vmem:[#allocation2 + $0x58] sm:$0xff] %vm199_vm7, %v629_v11  ;;  %681 = vst.msk [vmem:[#allocation2 + $0xf8] sm:$0xff] %vm199_vm7, %v649_v12 }
 0x107   : > { %v4600_v33 = vshll.u32 %v6536_v7, 16  ;;  %v6539_v34 = vld [vmem:[%s7427_s26 + $0x58] sm:$0xf]  ;;  %v6582_v13 = vcombine.low %v4579_v44, %v4589_v29  ;;  %659 = vst.msk [vmem:[#allocation2 + $0x48] sm:$0xff] %vm199_vm7, %v627_v18  ;;  %679 = vst.msk [vmem:[#allocation2 + $0xe8] sm:$0xff] %vm199_vm7, %v647_v19  ;;  %v4593_v51 = vrot.slane %v4591_v20, 4 }
 0x108   : > { %v4604_v37 = vshrl.u32 %v6536_v7, 16  ;;  %v4610_v38 = vshll.u32 %v6537_v9, 16  ;;  %v6540_v39 = vld [vmem:[%s7427_s26 + $0x5c] sm:$0x1]  ;;  %v8388_v42 = vpop.f32.mrb[14].mxu0  ;;  %v4596_v43 = vrot.slane %v4594_v46, 5 }
 0x109   : > { %v8374_v27 = vpop.f32.mrb[16].mxu1  ;;  %v4602_v48 = vrot.slane %v4600_v33, 5  ;;  %v6665_v58 = vrot.slane %v6621_v30, 9  ;;  %v5376_v49 = vrot.slane %v6622_v14, 5  ;;  %v5379_v55 = vrot.slane %v6623_v22, 5  ;;  %v8397_v59 = vpop.f32.mrb[15].mxu0 }
 0x10a   : > { %v8383_v35 = vpop.f32.mrb[17].mxu1  ;;  %v4606_v52 = vrot.slane %v4604_v37, 4  ;;  %v4612_v54 = vrot.slane %v4610_v38, 5  ;;  %v4615_v57 = vshrl.u32 %v6538_v26, 16  ;;  %v4597_v6 = vor.u32 %v4596_v43, %v4593_v51  ;;  %v6624_v24 = vld [vmem:[%s7427_s26 + $0x3c] sm:$0xe]  ;;  %7201 = vmatmul.mubr.msk.bf16.gmra.mrb[116].mxu1 %vm408_vm0, %v6582_v13 }
 0x10b   : > { %v8392_v50 = vpop.f32.mrb[18].mxu1  ;;  %v5377_v60 = vsel %vm7526_vm6, %v6665_v58, %v5376_v49  ;;  %v5378_v32 = vrot.slane %v5376_v49, 4  ;;  %v4618_v41 = vshll.u32 %v6538_v26, 16  ;;  %v4624_v2 = vshll.u32 %v6539_v34, 16  ;;  %v6625_v45 = vld [vmem:[%s7427_s26 + $0x40] sm:$0xf]  ;;  %7237 = vmatmul.mubr.msk.bf16.vlgmr.msra.gmra.mrb[112].mxu0 %vm408_vm0, %v6688_v31 }
 0x10c   : > { %v8406_v61 = vpop.f32.mrb[19].mxu1  ;;  %v4607_v62 = vor.u32 %v4606_v52, %v4602_v48  ;;  %v4617_v63 = vrot.slane %v4615_v57, 4  ;;  %v4628_v25 = vshrl.u32 %v6539_v34, 16  ;;  %v8409_v3 = vpop.f32.mrb[16].mxu0  ;;  %v4598_v28 = vrot.slane %v4597_v6, 4  ;;  %v278_v36 = vld [vmem:[#allocation2 + $0x70] sm:$0xff] }
 0x10d   : > { %v5380_v40 = vsel %vm7526_vm6, %v5378_v32, %v5379_v55  ;;  %v4620_v53 = vrot.slane %v4618_v41, 5  ;;  %v4634_v56 = vshll.u32 %v6540_v39, 16  ;;  %v6626_v0 = vld [vmem:[%s7427_s26 + $0x44] sm:$0x1]  ;;  %v4626_v15 = vrot.slane %v4624_v2, 5  ;;  %v732_v12 = vld [vmem:[#allocation2 + $0x10] sm:$0xff] }
 0x10e   : > { %v4608_v23 = vrot.slane %v4607_v62, 4  ;;  %v6689_v4 = vcombine.low %v5377_v60, %v5380_v40  ;;  %v4630_v16 = vrot.slane %v4628_v25, 4  ;;  %v4603_v9 = vsel %vm7490_vm5, %v4598_v28, %v4602_v48  ;;  %v276_v30 = vld [vmem:[#allocation2 + $0x60] sm:$0xff]  ;;  %v279_v26 = vld [vmem:[#allocation2 + $0x78] sm:$0xff]  ;;  %v277_v38 = vld [vmem:[#allocation2 + $0x68] sm:$0xff]  ;;  %v8445_v55 = vpop.f32.mrb[17].mxu0 }
 0x10f   : > { %v4621_v44 = vor.u32 %v4620_v53, %v4617_v63  ;;  %v4636_v10 = vrot.slane %v4634_v56, 5  ;;  %v6666_v11 = vrot.slane %v6624_v24, 9  ;;  %v5383_v19 = vrot.slane %v6625_v45, 5  ;;  %v730_v22 = vld [vmem:[#allocation2] sm:$0xff]  ;;  %v733_v37 = vld [vmem:[#allocation2 + $0x18] sm:$0xff]  ;;  %v8458_v24 = vpop.f32.mrb[18].mxu0 }
 0x110   : > { %v4613_v14 = vsel %vm7490_vm5, %v4608_v23, %v4612_v54  ;;  %v4631_v18 = vor.u32 %v4630_v16, %v4626_v15  ;;  %v5386_v20 = vrot.slane %v6626_v0, 5  ;;  %v6541_v29 = vld [vmem:[%s7427_s26 + $0x60] sm:$0xf]  ;;  %v632_v34 = vadd.f32 %v8344_v1, %v278_v36  ;;  %v6542_v39 = vld [vmem:[%s7427_s26 + $0x64] sm:$0xf]  ;;  %7240 = vmatprep.mubr.msk.bf16.mxu0 %vm408_vm0, %v6689_v4 }
 0x111   : > { %v8414_v7 = vpop.f32.mrb[20].mxu1  ;;  %v6583_v46 = vcombine.low %v4603_v9, %v4613_v14  ;;  %v4622_v33 = vrot.slane %v4621_v44, 4  ;;  %v1441_v51 = vadd.f32 %v8374_v27, %v732_v12  ;;  %v5384_v13 = vsel %vm7526_vm6, %v6666_v11, %v5383_v19  ;;  %v6543_v49 = vld [vmem:[%s7427_s26 + $0x68] sm:$0x1]  ;;  %v6627_v27 = vld [vmem:[%s7427_s26 + $0x48] sm:$0xe] }
 0x112   : > { %v8425_v43 = vpop.f32.mrb[21].mxu1  ;;  %v4632_v48 = vrot.slane %v4631_v18, 4  ;;  %v5385_v58 = vrot.slane %v5383_v19, 4  ;;  %v630_v1 = vadd.f32 %v8364_v17, %v276_v30  ;;  %664 = vst.msk [vmem:[#allocation2 + $0x70] sm:$0xff] %vm199_vm7, %v632_v34  ;;  %v1439_v8 = vadd.f32 %v8383_v35, %v730_v22  ;;  %v731_v17 = vld [vmem:[#allocation2 + $0x8] sm:$0xff] }
 0x113   : > { %7204 = vmatprep.mubr.msk.bf16.mxu1 %vm408_vm0, %v6583_v46  ;;  %v4627_v5 = vsel %vm7490_vm5, %v4622_v33, %v4626_v15  ;;  %1473 = vst.msk [vmem:[#allocation2 + $0x10] sm:$0xff] %vm199_vm7, %v1441_v51  ;;  %v633_v31 = vadd.f32 %v8388_v42, %v279_v26  ;;  %v4639_v52 = vshrl.u32 %v6541_v29, 16  ;;  %v6628_v54 = vld [vmem:[%s7427_s26 + $0x4c] sm:$0xf]  ;;  %v8447_v57 = vpop.f32.mrb[22].mxu1  ;;  %v1442_v32 = vadd.f32 %v8392_v50, %v733_v37  ;;  %v8465_v50 = vpop.f32.mrb[19].mxu0 }
 0x114   : > { %v4637_v6 = vsel %vm7490_vm5, %v4632_v48, %v4636_v10  ;;  %v5387_v60 = vsel %vm7526_vm6, %v5385_v58, %v5386_v20  ;;  %662 = vst.msk [vmem:[#allocation2 + $0x60] sm:$0xff] %vm199_vm7, %v630_v1  ;;  %v631_v35 = vadd.f32 %v8397_v59, %v277_v38  ;;  %v6629_v42 = vld [vmem:[%s7427_s26 + $0x50] sm:$0x1]  ;;  %v6544_v41 = vld [vmem:[%s7427_s26 + $0x6c] sm:$0xf]  ;;  %v8460_v62 = vpop.f32.mrb[23].mxu1  ;;  %v1440_v25 = vadd.f32 %v8406_v61, %v731_v17 }
 0x115   : > { %v6584_v63 = vcombine.low %v4627_v5, %v4637_v6  ;;  %v6690_v2 = vcombine.low %v5384_v13, %v5387_v60  ;;  %1471 = vst.msk [vmem:[#allocation2] sm:$0xff] %vm199_vm7, %v1439_v8  ;;  %665 = vst.msk [vmem:[#allocation2 + $0x78] sm:$0xff] %vm199_vm7, %v633_v31  ;;  %v4641_v45 = vrot.slane %v4639_v52, 4  ;;  %v4642_v59 = vshll.u32 %v6541_v29, 16  ;;  %v6545_v56 = vld [vmem:[%s7427_s26 + $0x70] sm:$0xf] }
 0x116   : > { %1474 = vst.msk [vmem:[#allocation2 + $0x18] sm:$0xff] %vm199_vm7, %v1442_v32  ;;  %663 = vst.msk [vmem:[#allocation2 + $0x68] sm:$0xff] %vm199_vm7, %v631_v35  ;;  %v4648_v28 = vshll.u32 %v6542_v39, 16  ;;  %v4652_v40 = vshrl.u32 %v6542_v39, 16  ;;  %v4658_v53 = vshll.u32 %v6543_v49, 16  ;;  %v6667_v0 = vrot.slane %v6627_v27, 9 }
 0x117   : > { %1472 = vst.msk [vmem:[#allocation2 + $0x8] sm:$0xff] %vm199_vm7, %v1440_v25  ;;  %v5390_v23 = vrot.slane %v6628_v54, 5  ;;  %v5393_v4 = vrot.slane %v6629_v42, 5  ;;  %v6546_v15 = vld [vmem:[%s7427_s26 + $0x74] sm:$0x1]  ;;  %v4663_v61 = vshrl.u32 %v6544_v41, 16  ;;  %7205 = vmatmul.mubr.msk.bf16.gmra.mrb[120].mxu1 %vm408_vm0, %v6584_v63  ;;  %7241 = vmatmul.mubr.msk.bf16.gmra.mrb[116].mxu0 %vm408_vm0, %v6690_v2 }
 0x118   : > { %v4644_v16 = vrot.slane %v4642_v59, 5  ;;  %v4650_v36 = vrot.slane %v4648_v28, 5  ;;  %v4654_v9 = vrot.slane %v4652_v40, 4  ;;  %v4660_v44 = vrot.slane %v4658_v53, 5  ;;  %v6630_v10 = vld [vmem:[%s7427_s26 + $0x54] sm:$0xe] }
 0x119   : > { %v5391_v11 = vsel %vm7526_vm6, %v6667_v0, %v5390_v23  ;;  %v5392_v12 = vrot.slane %v5390_v23, 4  ;;  %v4665_v30 = vrot.slane %v4663_v61, 4  ;;  %v4666_v14 = vshll.u32 %v6544_v41, 16  ;;  %v8476_v18 = vpop.f32.mrb[24].mxu1  ;;  %v6631_v29 = vld [vmem:[%s7427_s26 + $0x58] sm:$0xf] }
 0x11a   : > { %v4645_v19 = vor.u32 %v4644_v16, %v4641_v45  ;;  %v4655_v20 = vor.u32 %v4654_v9, %v4650_v36  ;;  %v4672_v22 = vshll.u32 %v6545_v56, 16  ;;  %v4676_v26 = vshrl.u32 %v6545_v56, 16  ;;  %v8480_v46 = vpop.f32.mrb[20].mxu0  ;;  %v6632_v37 = vld [vmem:[%s7427_s26 + $0x5c] sm:$0x1]  ;;  %v736_v8 = vld [vmem:[#allocation2 + $0x30] sm:$0xff] }
 0x11b   : > { %v5394_v33 = vsel %vm7526_vm6, %v5392_v12, %v5393_v4  ;;  %v4668_v34 = vrot.slane %v4666_v14, 5  ;;  %v4682_v51 = vshll.u32 %v6546_v15, 16  ;;  %v6668_v38 = vrot.slane %v6630_v10, 9  ;;  %v1553_v31 = vld [vmem:[#allocation2 + $0x10] sm:$0xff]  ;;  %v734_v32 = vld [vmem:[#allocation2 + $0x20] sm:$0xff]  ;;  %v8491_v42 = vpop.f32.mrb[25].mxu1 }
 0x11c   : > { %v4646_v39 = vrot.slane %v4645_v19, 4  ;;  %v4656_v48 = vrot.slane %v4655_v20, 4  ;;  %v6691_v13 = vcombine.low %v5391_v11, %v5394_v33  ;;  %v4674_v58 = vrot.slane %v4672_v22, 5  ;;  %v1551_v17 = vld [vmem:[#allocation2] sm:$0xff]  ;;  %v8493_v41 = vpop.f32.mrb[21].mxu0  ;;  %v8498_v40 = vpop.f32.mrb[26].mxu1 }
 0x11d   : > { %v4669_v1 = vor.u32 %v4668_v34, %v4665_v30  ;;  %v4678_v49 = vrot.slane %v4676_v26, 4  ;;  %v4684_v27 = vrot.slane %v4682_v51, 5  ;;  %v5397_v5 = vrot.slane %v6631_v29, 5  ;;  %v1554_v35 = vld [vmem:[#allocation2 + $0x18] sm:$0xff]  ;;  %v8500_v53 = vpop.f32.mrb[22].mxu0  ;;  %v8507_v61 = vpop.f32.mrb[27].mxu1 }
 0x11e   : > { %v4651_v52 = vsel %vm7490_vm5, %v4646_v39, %v4650_v36  ;;  %v4661_v54 = vsel %vm7490_vm5, %v4656_v48, %v4660_v44  ;;  %7244 = vmatprep.mubr.msk.bf16.mxu0 %vm408_vm0, %v6691_v13  ;;  %v5400_v6 = vrot.slane %v6632_v37, 5  ;;  %v1445_v60 = vadd.f32 %v8414_v7, %v736_v8  ;;  %v1552_v59 = vld [vmem:[#allocation2 + $0x8] sm:$0xff]  ;;  %v6547_v28 = vld [vmem:[%s7427_s26 + $0x78] sm:$0xf]  ;;  %v6548_v15 = vld [vmem:[%s7427_s26 + $0x7c] sm:$0xf] }
 0x11f   : > { %v6585_v63 = vcombine.low %v4651_v52, %v4661_v54  ;;  %v4670_v2 = vrot.slane %v4669_v1, 4  ;;  %v4679_v25 = vor.u32 %v4678_v49, %v4674_v58  ;;  %v5398_v45 = vsel %vm7526_vm6, %v6668_v38, %v5397_v5  ;;  %v737_v4 = vld [vmem:[#allocation2 + $0x38] sm:$0xff]  ;;  %v8509_v16 = vpop.f32.mrb[23].mxu0  ;;  %v735_v44 = vld [vmem:[#allocation2 + $0x28] sm:$0xff]  ;;  %v6633_v30 = vld [vmem:[%s7427_s26 + $0x60] sm:$0xe] }
 0x120   : > { %v5399_v7 = vrot.slane %v5397_v5, 4  ;;  %1477 = vst.msk [vmem:[#allocation2 + $0x30] sm:$0xff] %vm199_vm7, %v1445_v60  ;;  %v2038_v56 = vadd.f32 %v8409_v3, %v1553_v31  ;;  %v1443_v0 = vadd.f32 %v8425_v43, %v734_v32  ;;  %v2036_v23 = vadd.f32 %v8445_v55, %v1551_v17  ;;  %v6549_v55 = vld [vmem:[%s7427_s26 + $0x80] sm:$0x1]  ;;  %v8517_v10 = vpop.f32.mrb[24].mxu0 }
 0x121   : > { %7208 = vmatprep.mubr.msk.bf16.mxu1 %vm408_vm0, %v6585_v63  ;;  %v4675_v36 = vsel %vm7490_vm5, %v4670_v2, %v4674_v58  ;;  %v4680_v9 = vrot.slane %v4679_v25, 4  ;;  %v1446_v3 = vadd.f32 %v8447_v57, %v737_v4  ;;  %v2039_v43 = vadd.f32 %v8458_v24, %v1554_v35  ;;  %v6634_v14 = vld [vmem:[%s7427_s26 + $0x64] sm:$0xf]  ;;  %v8528_v19 = vpop.f32.mrb[28].mxu1  ;;  %v6551_v38 = vld [vmem:[%s7427_s26 + $0x88] sm:$0xf] }
 0x122   : > { %v5401_v11 = vsel %vm7526_vm6, %v5399_v7, %v5400_v6  ;;  %2070 = vst.msk [vmem:[#allocation2 + $0x10] sm:$0xff] %vm199_vm7, %v2038_v56  ;;  %1475 = vst.msk [vmem:[#allocation2 + $0x20] sm:$0xff] %vm199_vm7, %v1443_v0  ;;  %v1444_v12 = vadd.f32 %v8460_v62, %v735_v44  ;;  %v2037_v57 = vadd.f32 %v8465_v50, %v1552_v59  ;;  %v4687_v24 = vshrl.u32 %v6547_v28, 16  ;;  %v6635_v62 = vld [vmem:[%s7427_s26 + $0x68] sm:$0x1]  ;;  %v8539_v39 = vpop.f32.mrb[29].mxu1 }
 0x123   : > { %2068 = vst.msk [vmem:[#allocation2] sm:$0xff] %vm199_vm7, %v2036_v23  ;;  %v4685_v20 = vsel %vm7490_vm5, %v4680_v9, %v4684_v27  ;;  %v6692_v22 = vcombine.low %v5398_v45, %v5401_v11  ;;  %1478 = vst.msk [vmem:[#allocation2 + $0x38] sm:$0xff] %vm199_vm7, %v1446_v3  ;;  %v4690_v26 = vshll.u32 %v6547_v28, 16  ;;  %v4696_v29 = vshll.u32 %v6548_v15, 16  ;;  %v6550_v33 = vld [vmem:[%s7427_s26 + $0x84] sm:$0xf] }
 0x124   : > { %2071 = vst.msk [vmem:[#allocation2 + $0x18] sm:$0xff] %vm199_vm7, %v2039_v43  ;;  %v6586_v50 = vcombine.low %v4675_v36, %v4685_v20  ;;  %1476 = vst.msk [vmem:[#allocation2 + $0x28] sm:$0xff] %vm199_vm7, %v1444_v12  ;;  %v4689_v34 = vrot.slane %v4687_v24, 4  ;;  %v4700_v51 = vshrl.u32 %v6548_v15, 16  ;;  %v4706_v37 = vshll.u32 %v6549_v55, 16  ;;  %v8548_v35 = vpop.f32.mrb[25].mxu0 }
 0x125   : > { %2069 = vst.msk [vmem:[#allocation2 + $0x8] sm:$0xff] %vm199_vm7, %v2037_v57  ;;  %7245 = vmatmul.mubr.msk.bf16.gmra.mrb[120].mxu0 %vm408_vm0, %v6692_v22  ;;  %v4692_v48 = vrot.slane %v4690_v26, 5  ;;  %v4698_v13 = vrot.slane %v4696_v29, 5  ;;  %v6669_v58 = vrot.slane %v6633_v30, 9  ;;  %v5404_v1 = vrot.slane %v6634_v14, 5  ;;  %v8550_v59 = vpop.f32.mrb[30].mxu1 }
 0x126   : > { %v6552_v49 = vld [vmem:[%s7427_s26 + $0x8c] sm:$0x1]  ;;  %7209 = vmatmul.mubr.msk.bf16.gmra.mrb[124].mxu1 %vm408_vm0, %v6586_v50  ;;  %v4702_v27 = vrot.slane %v4700_v51, 4  ;;  %v4708_v5 = vrot.slane %v4706_v37, 5  ;;  %v5407_v8 = vrot.slane %v6635_v62, 5  ;;  %v4711_v31 = vshrl.u32 %v6550_v33, 16 }
 0x127   : > { %v6636_v17 = vld [vmem:[%s7427_s26 + $0x6c] sm:$0xe]  ;;  %v4693_v52 = vor.u32 %v4692_v48, %v4689_v34  ;;  %v5405_v54 = vsel %vm7526_vm6, %v6669_v58, %v5404_v1  ;;  %v5406_v6 = vrot.slane %v5404_v1, 4  ;;  %v4714_v60 = vshll.u32 %v6550_v33, 16  ;;  %v6637_v32 = vld [vmem:[%s7427_s26 + $0x70] sm:$0xf] }
 0x128   : > { %v4703_v63 = vor.u32 %v4702_v27, %v4698_v13  ;;  %v4713_v2 = vrot.slane %v4711_v31, 4  ;;  %v4720_v25 = vshll.u32 %v6551_v38, 16  ;;  %v4724_v45 = vshrl.u32 %v6551_v38, 16  ;;  %v8552_v28 = vpop.f32.mrb[26].mxu0  ;;  %v6638_v4 = vld [vmem:[%s7427_s26 + $0x74] sm:$0x1] }
 0x129   : > { %v4694_v7 = vrot.slane %v4693_v52, 4  ;;  %v5408_v56 = vsel %vm7526_vm6, %v5406_v6, %v5407_v8  ;;  %v4716_v0 = vrot.slane %v4714_v60, 5  ;;  %v4730_v23 = vshll.u32 %v6552_v49, 16  ;;  %v8557_v15 = vpop.f32.mrb[31].mxu1  ;;  %v1557_v44 = vld [vmem:[#allocation2 + $0x30] sm:$0xff]  ;;  %v8559_v55 = vpop.f32.mrb[27].mxu0 }
 0x12a   : > { %v4704_v36 = vrot.slane %v4703_v63, 4  ;;  %v6693_v9 = vcombine.low %v5405_v54, %v5408_v56  ;;  %v4722_v3 = vrot.slane %v4720_v25, 5  ;;  %v4726_v43 = vrot.slane %v4724_v45, 4  ;;  %v740_v30 = vld [vmem:[#allocation2 + $0x50] sm:$0xff]  ;;  %v738_v29 = vld [vmem:[#allocation2 + $0x40] sm:$0xff]  ;;  %v1558_v33 = vld [vmem:[#allocation2 + $0x38] sm:$0xff] }
 0x12b   : > { %v4699_v11 = vsel %vm7490_vm5, %v4694_v7, %v4698_v13  ;;  %v4717_v12 = vor.u32 %v4716_v0, %v4713_v2  ;;  %v4732_v57 = vrot.slane %v4730_v23, 5  ;;  %v6670_v24 = vrot.slane %v6636_v17, 9  ;;  %v1555_v62 = vld [vmem:[#allocation2 + $0x20] sm:$0xff]  ;;  %v741_v38 = vld [vmem:[#allocation2 + $0x58] sm:$0xff]  ;;  %v739_v48 = vld [vmem:[#allocation2 + $0x48] sm:$0xff]  ;;  %v8568_v58 = vpop.f32.mrb[28].mxu0 }
 0x12c   : > { %v4709_v14 = vsel %vm7490_vm5, %v4704_v36, %v4708_v5  ;;  %7248 = vmatprep.mubr.msk.bf16.mxu0 %vm408_vm0, %v6693_v9  ;;  %v4727_v20 = vor.u32 %v4726_v43, %v4722_v3  ;;  %v5411_v22 = vrot.slane %v6637_v32, 5  ;;  %v5414_v26 = vrot.slane %v6638_v4, 5  ;;  %v1556_v13 = vld [vmem:[#allocation2 + $0x28] sm:$0xff]  ;;  %v6553_v8 = vld [vmem:[%s7427_s26 + $0x90] sm:$0xf]  ;;  %v8595_v25 = vpop.f32.mrb[32].mxu1 }
 0x12d   : > { %v6587_v50 = vcombine.low %v4699_v11, %v4709_v14  ;;  %v4718_v34 = vrot.slane %v4717_v12, 4  ;;  %v1449_v51 = vadd.f32 %v8476_v18, %v740_v30  ;;  %v2042_v37 = vadd.f32 %v8480_v46, %v1557_v44  ;;  %v6554_v31 = vld [vmem:[%s7427_s26 + $0x94] sm:$0xf]  ;;  %v6639_v54 = vld [vmem:[%s7427_s26 + $0x78] sm:$0xe] }
 0x12e   : > { %v4728_v1 = vrot.slane %v4727_v20, 4  ;;  %v5412_v49 = vsel %vm7526_vm6, %v6670_v24, %v5411_v22  ;;  %v5413_v27 = vrot.slane %v5411_v22, 4  ;;  %v1447_v5 = vadd.f32 %v8491_v42, %v738_v29  ;;  %v6555_v42 = vld [vmem:[%s7427_s26 + $0x98] sm:$0x1]  ;;  %v6640_v6 = vld [vmem:[%s7427_s26 + $0x7c] sm:$0xf] }
 0x12f   : > { %7212 = vmatprep.mubr.msk.bf16.mxu1 %vm408_vm0, %v6587_v50  ;;  %v4723_v18 = vsel %vm7490_vm5, %v4718_v34, %v4722_v3  ;;  %1481 = vst.msk [vmem:[#allocation2 + $0x50] sm:$0xff] %vm199_vm7, %v1449_v51  ;;  %2074 = vst.msk [vmem:[#allocation2 + $0x30] sm:$0xff] %vm199_vm7, %v2042_v37  ;;  %v2040_v46 = vadd.f32 %v8493_v41, %v1555_v62  ;;  %v1450_v17 = vadd.f32 %v8498_v40, %v741_v38  ;;  %v6641_v2 = vld [vmem:[%s7427_s26 + $0x80] sm:$0x1]  ;;  %v6556_v40 = vld [vmem:[%s7427_s26 + $0x9c] sm:$0xf] }
 0x130   : > { %v2043_v52 = vadd.f32 %v8500_v53, %v1558_v33  ;;  %v4733_v60 = vsel %vm7490_vm5, %v4728_v1, %v4732_v57  ;;  %v5415_v32 = vsel %vm7526_vm6, %v5413_v27, %v5414_v26  ;;  %1479 = vst.msk [vmem:[#allocation2 + $0x40] sm:$0xff] %vm199_vm7, %v1447_v5  ;;  %v1448_v63 = vadd.f32 %v8507_v61, %v739_v48  ;;  %v8597_v53 = vpop.f32.mrb[29].mxu0  ;;  %v6557_v23 = vld [vmem:[%s7427_s26 + $0xa0] sm:$0xf]  ;;  %v8603_v61 = vpop.f32.mrb[33].mxu1 }
 0x131   : > { %v2041_v41 = vadd.f32 %v8509_v16, %v1556_v13  ;;  %v6588_v45 = vcombine.low %v4723_v18, %v4733_v60  ;;  %v6694_v7 = vcombine.low %v5412_v49, %v5415_v32  ;;  %2072 = vst.msk [vmem:[#allocation2 + $0x20] sm:$0xff] %vm199_vm7, %v2040_v46  ;;  %1482 = vst.msk [vmem:[#allocation2 + $0x58] sm:$0xff] %vm199_vm7, %v1450_v17  ;;  %v4735_v56 = vshrl.u32 %v6553_v8, 16  ;;  %v8605_v16 = vpop.f32.mrb[30].mxu0  ;;  %v8609_v43 = vpop.f32.mrb[34].mxu1 }
 0x132   : > { %2075 = vst.msk [vmem:[#allocation2 + $0x38] sm:$0xff] %vm199_vm7, %v2043_v52  ;;  %v4738_v0 = vshll.u32 %v6553_v8, 16  ;;  %1480 = vst.msk [vmem:[#allocation2 + $0x48] sm:$0xff] %vm199_vm7, %v1448_v63  ;;  %v4744_v4 = vshll.u32 %v6554_v31, 16  ;;  %v4748_v36 = vshrl.u32 %v6554_v31, 16  ;;  %v4754_v9 = vshll.u32 %v6555_v42, 16 }
 0x133   : > { %2073 = vst.msk [vmem:[#allocation2 + $0x28] sm:$0xff] %vm199_vm7, %v2041_v41  ;;  %v6671_v3 = vrot.slane %v6639_v54, 9  ;;  %v8611_v44 = vpop.f32.mrb[31].mxu0  ;;  %7213 = vmatmul.mubr.msk.bf16.gmra.mrb[128].mxu1 %vm408_vm0, %v6588_v45  ;;  %7249 = vmatmul.mubr.msk.bf16.gmra.mrb[124].mxu0 %vm408_vm0, %v6694_v7  ;;  %v4737_v11 = vrot.slane %v4735_v56, 4  ;;  %v5418_v57 = vrot.slane %v6640_v6, 5  ;;  %v5421_v24 = vrot.slane %v6641_v2, 5 }
 0x134   : > { %v4740_v12 = vrot.slane %v4738_v0, 5  ;;  %v8615_v30 = vpop.f32.mrb[35].mxu1  ;;  %v4746_v14 = vrot.slane %v4744_v4, 5  ;;  %v4750_v20 = vrot.slane %v4748_v36, 4  ;;  %v4756_v22 = vrot.slane %v4754_v9, 5  ;;  %v744_v63 = vld [vmem:[#allocation2 + $0x70] sm:$0xff] }
 0x135   : > { %v6558_v26 = vld [vmem:[%s7427_s26 + $0xa4] sm:$0x1]  ;;  %v4759_v29 = vshrl.u32 %v6556_v40, 16  ;;  %v5419_v33 = vsel %vm7526_vm6, %v6671_v3, %v5418_v57  ;;  %v5420_v50 = vrot.slane %v5418_v57, 4  ;;  %v4762_v34 = vshll.u32 %v6556_v40, 16  ;;  %v8627_v41 = vpop.f32.mrb[32].mxu0 }
 0x136   : > { %v4741_v62 = vor.u32 %v4740_v12, %v4737_v11  ;;  %v6642_v51 = vld [vmem:[%s7427_s26 + $0x84] sm:$0xe]  ;;  %v4751_v37 = vor.u32 %v4750_v20, %v4746_v14  ;;  %v4768_v48 = vshll.u32 %v6557_v23, 16  ;;  %v4772_v13 = vshrl.u32 %v6557_v23, 16  ;;  %v6643_v1 = vld [vmem:[%s7427_s26 + $0x88] sm:$0xf] }
 0x137   : > { %v4761_v38 = vrot.slane %v4759_v29, 4  ;;  %v5422_v27 = vsel %vm7526_vm6, %v5420_v50, %v5421_v24  ;;  %v4764_v5 = vrot.slane %v4762_v34, 5  ;;  %v4778_v8 = vshll.u32 %v6558_v26, 16  ;;  %v6644_v31 = vld [vmem:[%s7427_s26 + $0x8c] sm:$0x1]  ;;  %v1561_v42 = vld [vmem:[#allocation2 + $0x50] sm:$0xff] }
 0x138   : > { %v4742_v49 = vrot.slane %v4741_v62, 4  ;;  %v4752_v18 = vrot.slane %v4751_v37, 4  ;;  %v6695_v46 = vcombine.low %v5419_v33, %v5422_v27  ;;  %v4770_v17 = vrot.slane %v4768_v48, 5  ;;  %v742_v56 = vld [vmem:[#allocation2 + $0x60] sm:$0xff]  ;;  %v1562_v23 = vld [vmem:[#allocation2 + $0x58] sm:$0xff]  ;;  %v8635_v24 = vpop.f32.mrb[36].mxu1 }
 0x139   : > { %v4774_v52 = vrot.slane %v4772_v13, 4  ;;  %v4765_v6 = vor.u32 %v4764_v5, %v4761_v38  ;;  %v4780_v60 = vrot.slane %v4778_v8, 5  ;;  %v6672_v32 = vrot.slane %v6642_v51, 9  ;;  %v1559_v0 = vld [vmem:[#allocation2 + $0x40] sm:$0xff]  ;;  %v745_v11 = vld [vmem:[#allocation2 + $0x78] sm:$0xff]  ;;  %v1560_v12 = vld [vmem:[#allocation2 + $0x48] sm:$0xff] }
 0x13a   : > { %v4747_v54 = vsel %vm7490_vm5, %v4742_v49, %v4746_v14  ;;  %v4757_v2 = vsel %vm7490_vm5, %v4752_v18, %v4756_v22  ;;  %7252 = vmatprep.mubr.msk.bf16.mxu0 %vm408_vm0, %v6695_v46  ;;  %v5425_v45 = vrot.slane %v6643_v1, 5  ;;  %v5428_v7 = vrot.slane %v6644_v31, 5  ;;  %v6559_v57 = vld [vmem:[%s7427_s26 + $0xa8] sm:$0xf]  ;;  %v6560_v62 = vld [vmem:[%s7427_s26 + $0xac] sm:$0xf] }
 0x13b   : > { %v4775_v40 = vor.u32 %v4774_v52, %v4770_v17  ;;  %v6589_v4 = vcombine.low %v4747_v54, %v4757_v2  ;;  %v4766_v36 = vrot.slane %v4765_v6, 4  ;;  %v1453_v9 = vadd.f32 %v8528_v19, %v744_v63  ;;  %v743_v29 = vld [vmem:[#allocation2 + $0x68] sm:$0xff]  ;;  %v8641_v33 = vpop.f32.mrb[37].mxu1  ;;  %v6561_v34 = vld [vmem:[%s7427_s26 + $0xb0] sm:$0x1]  ;;  %v8653_v37 = vpop.f32.mrb[33].mxu0 }
 0x13c   : > { %v2046_v3 = vadd.f32 %v8517_v10, %v1561_v42  ;;  %v5426_v20 = vsel %vm7526_vm6, %v6672_v32, %v5425_v45  ;;  %v5427_v22 = vrot.slane %v5425_v45, 4  ;;  %v1451_v26 = vadd.f32 %v8539_v39, %v742_v56  ;;  %v6645_v51 = vld [vmem:[%s7427_s26 + $0x90] sm:$0xe]  ;;  %v8655_v38 = vpop.f32.mrb[38].mxu1  ;;  %v6647_v1 = vld [vmem:[%s7427_s26 + $0x98] sm:$0x1] }
 0x13d   : > { %v4776_v14 = vrot.slane %v4775_v40, 4  ;;  %7216 = vmatprep.mubr.msk.bf16.mxu1 %vm408_vm0, %v6589_v4  ;;  %v4771_v10 = vsel %vm7490_vm5, %v4766_v36, %v4770_v17  ;;  %1485 = vst.msk [vmem:[#allocation2 + $0x70] sm:$0xff] %vm199_vm7, %v1453_v9  ;;  %v2044_v19 = vadd.f32 %v8548_v35, %v1559_v0  ;;  %v1454_v50 = vadd.f32 %v8550_v59, %v745_v11  ;;  %v8666_v49 = vpop.f32.mrb[34].mxu0  ;;  %v8668_v27 = vpop.f32.mrb[39].mxu1  ;;  %v6563_v63 = vld [vmem:[%s7427_s26 + $0xb8] sm:$0xf] }
 0x13e   : > { %2078 = vst.msk [vmem:[#allocation2 + $0x50] sm:$0xff] %vm199_vm7, %v2046_v3  ;;  %v2047_v39 = vadd.f32 %v8552_v28, %v1562_v23  ;;  %v5429_v13 = vsel %vm7526_vm6, %v5427_v22, %v5428_v7  ;;  %1483 = vst.msk [vmem:[#allocation2 + $0x60] sm:$0xff] %vm199_vm7, %v1451_v26  ;;  %v1452_v35 = vadd.f32 %v8557_v15, %v743_v29  ;;  %v6646_v28 = vld [vmem:[%s7427_s26 + $0x94] sm:$0xf]  ;;  %v4783_v31 = vshrl.u32 %v6559_v57, 16  ;;  %v8674_v46 = vpop.f32.mrb[35].mxu0 }
 0x13f   : > { %v4781_v48 = vsel %vm7490_vm5, %v4776_v14, %v4780_v60  ;;  %v2045_v59 = vadd.f32 %v8559_v55, %v1560_v12  ;;  %v6696_v8 = vcombine.low %v5426_v20, %v5429_v13  ;;  %2076 = vst.msk [vmem:[#allocation2 + $0x40] sm:$0xff] %vm199_vm7, %v2044_v19  ;;  %1486 = vst.msk [vmem:[#allocation2 + $0x78] sm:$0xff] %vm199_vm7, %v1454_v50  ;;  %v4786_v18 = vshll.u32 %v6559_v57, 16  ;;  %v6562_v15 = vld [vmem:[%s7427_s26 + $0xb4] sm:$0xf] }
 0x140   : > { %v6590_v5 = vcombine.low %v4771_v10, %v4781_v48  ;;  %2079 = vst.msk [vmem:[#allocation2 + $0x58] sm:$0xff] %vm199_vm7, %v2047_v39  ;;  %1484 = vst.msk [vmem:[#allocation2 + $0x68] sm:$0xff] %vm199_vm7, %v1452_v35  ;;  %v4792_v55 = vshll.u32 %v6560_v62, 16  ;;  %v4796_v17 = vshrl.u32 %v6560_v62, 16  ;;  %v4802_v52 = vshll.u32 %v6561_v34, 16  ;;  %v8689_v10 = vpop.f32.mrb[36].mxu0 }
 0x141   : > { %2077 = vst.msk [vmem:[#allocation2 + $0x48] sm:$0xff] %vm199_vm7, %v2045_v59  ;;  %v6673_v42 = vrot.slane %v6645_v51, 9  ;;  %7253 = vmatmul.mubr.msk.bf16.gmra.mrb[128].mxu0 %vm408_vm0, %v6696_v8  ;;  %v4785_v54 = vrot.slane %v4783_v31, 4  ;;  %v4788_v6 = vrot.slane %v4786_v18, 5  ;;  %v5432_v60 = vrot.slane %v6646_v28, 5  ;;  %v8691_v48 = vpop.f32.mrb[40].mxu1 }
 0x142   : > { %7217 = vmatmul.mubr.msk.bf16.gmra.mrb[132].mxu1 %vm408_vm0, %v6590_v5  ;;  %v5435_v32 = vrot.slane %v6647_v1, 5  ;;  %v4794_v2 = vrot.slane %v4792_v55, 5  ;;  %v4798_v40 = vrot.slane %v4796_v17, 4  ;;  %v4804_v45 = vrot.slane %v4802_v52, 5  ;;  %v6564_v7 = vld [vmem:[%s7427_s26 + $0xbc] sm:$0x1] }
 0x143   : > { %v4807_v56 = vshrl.u32 %v6562_v15, 16  ;;  %v4789_v0 = vor.u32 %v4788_v6, %v4785_v54  ;;  %v5433_v23 = vsel %vm7526_vm6, %v6673_v42, %v5432_v60  ;;  %v5434_v4 = vrot.slane %v5432_v60, 4  ;;  %v6648_v9 = vld [vmem:[%s7427_s26 + $0x9c] sm:$0xe]  ;;  %v6649_v14 = vld [vmem:[%s7427_s26 + $0xa0] sm:$0xf] }
 0x144   : > { %v4810_v36 = vshll.u32 %v6562_v15, 16  ;;  %v4799_v3 = vor.u32 %v4798_v40, %v4794_v2  ;;  %v4816_v12 = vshll.u32 %v6563_v63, 16  ;;  %v4820_v57 = vshrl.u32 %v6563_v63, 16  ;;  %v6650_v62 = vld [vmem:[%s7427_s26 + $0xa4] sm:$0x1]  ;;  %v1565_v51 = vld [vmem:[#allocation2 + $0x70] sm:$0xff] }
 0x145   : > { %v4809_v11 = vrot.slane %v4807_v56, 4  ;;  %v4790_v20 = vrot.slane %v4789_v0, 4  ;;  %v5436_v22 = vsel %vm7526_vm6, %v5434_v4, %v5435_v32  ;;  %v4826_v29 = vshll.u32 %v6564_v7, 16  ;;  %v8693_v13 = vpop.f32.mrb[37].mxu0  ;;  %v748_v5 = vld [vmem:[#allocation2 + $0x90] sm:$0xff]  ;;  %v8697_v8 = vpop.f32.mrb[41].mxu1 }
 0x146   : > { %v4812_v26 = vrot.slane %v4810_v36, 5  ;;  %v4800_v19 = vrot.slane %v4799_v3, 4  ;;  %v6697_v50 = vcombine.low %v5433_v23, %v5436_v22  ;;  %v4818_v39 = vrot.slane %v4816_v12, 5  ;;  %v8699_v31 = vpop.f32.mrb[38].mxu0  ;;  %v1563_v52 = vld [vmem:[#allocation2 + $0x60] sm:$0xff]  ;;  %v1566_v42 = vld [vmem:[#allocation2 + $0x78] sm:$0xff] }
 0x147   : > { %v4822_v34 = vrot.slane %v4820_v57, 4  ;;  %v4795_v35 = vsel %vm7490_vm5, %v4790_v20, %v4794_v2  ;;  %v4828_v28 = vrot.slane %v4826_v29, 5  ;;  %v6674_v1 = vrot.slane %v6648_v9, 9  ;;  %v8704_v54 = vpop.f32.mrb[42].mxu1  ;;  %v8706_v6 = vpop.f32.mrb[39].mxu0  ;;  %v746_v40 = vld [vmem:[#allocation2 + $0x80] sm:$0xff] }
 0x148   : > { %v4813_v59 = vor.u32 %v4812_v26, %v4809_v11  ;;  %v4805_v18 = vsel %vm7490_vm5, %v4800_v19, %v4804_v45  ;;  %7256 = vmatprep.mubr.msk.bf16.mxu0 %vm408_vm0, %v6697_v50  ;;  %v5439_v55 = vrot.slane %v6649_v14, 5  ;;  %v5442_v17 = vrot.slane %v6650_v62, 5  ;;  %v1564_v45 = vld [vmem:[#allocation2 + $0x68] sm:$0xff]  ;;  %v8710_v7 = vpop.f32.mrb[43].mxu1  ;;  %v749_v36 = vld [vmem:[#allocation2 + $0x98] sm:$0xff] }
 0x149   : > { %v4823_v15 = vor.u32 %v4822_v34, %v4818_v39  ;;  %v6591_v60 = vcombine.low %v4795_v35, %v4805_v18  ;;  %v1457_v63 = vadd.f32 %v8595_v25, %v748_v5  ;;  %v2050_v2 = vadd.f32 %v8568_v58, %v1565_v51  ;;  %v747_v9 = vld [vmem:[#allocation2 + $0x88] sm:$0xff]  ;;  %v6565_v3 = vld [vmem:[%s7427_s26 + $0xc0] sm:$0xf]  ;;  %v6566_v12 = vld [vmem:[%s7427_s26 + $0xc4] sm:$0xf] }
 0x14a   : > { %v4814_v32 = vrot.slane %v4813_v59, 4  ;;  %v5440_v0 = vsel %vm7526_vm6, %v6674_v1, %v5439_v55  ;;  %v5441_v23 = vrot.slane %v5439_v55, 4  ;;  %v1455_v4 = vadd.f32 %v8603_v61, %v746_v40  ;;  %v6567_v57 = vld [vmem:[%s7427_s26 + $0xc8] sm:$0x1]  ;;  %v6651_v14 = vld [vmem:[%s7427_s26 + $0xa8] sm:$0xe] }
 0x14b   : > { %v4824_v56 = vrot.slane %v4823_v15, 4  ;;  %7220 = vmatprep.mubr.msk.bf16.mxu1 %vm408_vm0, %v6591_v60  ;;  %1489 = vst.msk [vmem:[#allocation2 + $0x90] sm:$0xff] %vm199_vm7, %v1457_v63  ;;  %2082 = vst.msk [vmem:[#allocation2 + $0x70] sm:$0xff] %vm199_vm7, %v2050_v2  ;;  %v2048_v25 = vadd.f32 %v8597_v53, %v1563_v52  ;;  %v1458_v11 = vadd.f32 %v8609_v43, %v749_v36  ;;  %v6652_v29 = vld [vmem:[%s7427_s26 + $0xac] sm:$0xf]  ;;  %v4831_v19 = vshrl.u32 %v6565_v3, 16 }
 0x14c   : > { %v4819_v58 = vsel %vm7490_vm5, %v4814_v32, %v4818_v39  ;;  %v2051_v61 = vadd.f32 %v8605_v16, %v1566_v42  ;;  %v5443_v22 = vsel %vm7526_vm6, %v5441_v23, %v5442_v17  ;;  %1487 = vst.msk [vmem:[#allocation2 + $0x80] sm:$0xff] %vm199_vm7, %v1455_v4  ;;  %v1456_v26 = vadd.f32 %v8615_v30, %v747_v9  ;;  %v6653_v43 = vld [vmem:[%s7427_s26 + $0xb0] sm:$0x1]  ;;  %v6568_v39 = vld [vmem:[%s7427_s26 + $0xcc] sm:$0xf]  ;;  %v8755_v9 = vpop.f32.mrb[44].mxu1 }
 0x14d   : > { %v4829_v20 = vsel %vm7490_vm5, %v4824_v56, %v4828_v28  ;;  %v2049_v53 = vadd.f32 %v8611_v44, %v1564_v45  ;;  %v6698_v62 = vcombine.low %v5440_v0, %v5443_v22  ;;  %2080 = vst.msk [vmem:[#allocation2 + $0x60] sm:$0xff] %vm199_vm7, %v2048_v25  ;;  %1490 = vst.msk [vmem:[#allocation2 + $0x98] sm:$0xff] %vm199_vm7, %v1458_v11  ;;  %v4834_v50 = vshll.u32 %v6565_v3, 16  ;;  %v6569_v35 = vld [vmem:[%s7427_s26 + $0xd0] sm:$0xf]  ;;  %v8753_v56 = vpop.f32.mrb[40].mxu0 }
 0x14e   : > { %v6592_v16 = vcombine.low %v4819_v58, %v4829_v20  ;;  %2083 = vst.msk [vmem:[#allocation2 + $0x78] sm:$0xff] %vm199_vm7, %v2051_v61  ;;  %1488 = vst.msk [vmem:[#allocation2 + $0x88] sm:$0xff] %vm199_vm7, %v1456_v26  ;;  %v4840_v44 = vshll.u32 %v6566_v12, 16  ;;  %v4844_v30 = vshrl.u32 %v6566_v12, 16  ;;  %v4850_v34 = vshll.u32 %v6567_v57, 16  ;;  %v8757_v3 = vpop.f32.mrb[41].mxu0 }
 0x14f   : > { %2081 = vst.msk [vmem:[#allocation2 + $0x68] sm:$0xff] %vm199_vm7, %v2049_v53  ;;  %v6675_v51 = vrot.slane %v6651_v14, 9  ;;  %7257 = vmatmul.mubr.msk.bf16.gmra.mrb[132].mxu0 %vm408_vm0, %v6698_v62  ;;  %v4833_v59 = vrot.slane %v4831_v19, 4  ;;  %v4836_v28 = vrot.slane %v4834_v50, 5  ;;  %v5446_v1 = vrot.slane %v6652_v29, 5  ;;  %v8761_v12 = vpop.f32.mrb[45].mxu1 }
 0x150   : > { %7221 = vmatmul.mubr.msk.bf16.gmra.mrb[136].mxu1 %vm408_vm0, %v6592_v16  ;;  %v5449_v5 = vrot.slane %v6653_v43, 5  ;;  %v6570_v18 = vld [vmem:[%s7427_s26 + $0xd4] sm:$0x1]  ;;  %v4842_v15 = vrot.slane %v4840_v44, 5  ;;  %v4846_v55 = vrot.slane %v4844_v30, 4  ;;  %v4852_v17 = vrot.slane %v4850_v34, 5 }
 0x151   : > { %v4855_v52 = vshrl.u32 %v6568_v39, 16  ;;  %v6654_v42 = vld [vmem:[%s7427_s26 + $0xb4] sm:$0xe]  ;;  %v4837_v60 = vor.u32 %v4836_v28, %v4833_v59  ;;  %v5447_v32 = vsel %vm7526_vm6, %v6675_v51, %v5446_v1  ;;  %v5448_v63 = vrot.slane %v5446_v1, 4  ;;  %v6655_v40 = vld [vmem:[%s7427_s26 + $0xb8] sm:$0xf] }
 0x152   : > { %v4858_v2 = vshll.u32 %v6568_v39, 16  ;;  %v8751_v45 = vld [vmem:[%s7427_s26 + $0xbc] sm:$0x1]  ;;  %v4847_v0 = vor.u32 %v4846_v55, %v4842_v15  ;;  %v4864_v4 = vshll.u32 %v6569_v35, 16  ;;  %v4868_v36 = vshrl.u32 %v6569_v35, 16  ;;  %v8763_v57 = vpop.f32.mrb[42].mxu0 }
 0x153   : > { %v4857_v23 = vrot.slane %v4855_v52, 4  ;;  %v4838_v58 = vrot.slane %v4837_v60, 4  ;;  %v5450_v25 = vsel %vm7526_vm6, %v5448_v63, %v5449_v5  ;;  %v4874_v61 = vshll.u32 %v6570_v18, 16  ;;  %v1569_v53 = vld [vmem:[#allocation2 + $0x90] sm:$0xff]  ;;  %v8765_v29 = vpop.f32.mrb[46].mxu1  ;;  %v8767_v43 = vpop.f32.mrb[43].mxu0 }
 0x154   : > { %v4860_v11 = vrot.slane %v4858_v2, 5  ;;  %v4848_v14 = vrot.slane %v4847_v0, 4  ;;  %v6699_v20 = vcombine.low %v5447_v32, %v5450_v25  ;;  %v4866_v22 = vrot.slane %v4864_v4, 5  ;;  %v752_v39 = vld [vmem:[#allocation2 + $0xb0] sm:$0xff]  ;;  %v750_v44 = vld [vmem:[#allocation2 + $0xa0] sm:$0xff]  ;;  %v8771_v30 = vpop.f32.mrb[47].mxu1 }
 0x155   : > { %v4870_v26 = vrot.slane %v4868_v36, 4  ;;  %v4843_v16 = vsel %vm7490_vm5, %v4838_v58, %v4842_v15  ;;  %v4876_v19 = vrot.slane %v4874_v61, 5  ;;  %v6676_v50 = vrot.slane %v6654_v42, 9  ;;  %v1567_v28 = vld [vmem:[#allocation2 + $0x80] sm:$0xff]  ;;  %v753_v1 = vld [vmem:[#allocation2 + $0xb8] sm:$0xff]  ;;  %v1568_v42 = vld [vmem:[#allocation2 + $0x88] sm:$0xff] }
 0x156   : > { %v4861_v62 = vor.u32 %v4860_v11, %v4857_v23  ;;  %v4853_v34 = vsel %vm7490_vm5, %v4848_v14, %v4852_v17  ;;  %7260 = vmatprep.mubr.msk.bf16.mxu0 %vm408_vm0, %v6699_v20  ;;  %v5453_v35 = vrot.slane %v6655_v40, 5  ;;  %v5456_v59 = vrot.slane %v8751_v45, 5  ;;  %v1570_v5 = vld [vmem:[#allocation2 + $0x98] sm:$0xff]  ;;  %v6657_v60 = vld [vmem:[%s7427_s26 + $0xc0] sm:$0xe]  ;;  %v751_v36 = vld [vmem:[#allocation2 + $0xa8] sm:$0xff] }
 0x157   : > { %v4871_v51 = vor.u32 %v4870_v26, %v4866_v22  ;;  %v6593_v18 = vcombine.low %v4843_v16, %v4853_v34  ;;  %v1461_v55 = vadd.f32 %v8635_v24, %v752_v39  ;;  %v2054_v52 = vadd.f32 %v8627_v41, %v1569_v53  ;;  %v6658_v17 = vld [vmem:[%s7427_s26 + $0xc4] sm:$0xf]  ;;  %v6659_v45 = vld [vmem:[%s7427_s26 + $0xc8] sm:$0x1]  ;;  %v6660_v0 = vld [vmem:[%s7427_s26 + $0xcc] sm:$0xe] }
 0x158   : > { %v4862_v15 = vrot.slane %v4861_v62, 4  ;;  %v5454_v63 = vsel %vm7526_vm6, %v6676_v50, %v5453_v35  ;;  %v5455_v2 = vrot.slane %v5453_v35, 4  ;;  %v1459_v40 = vadd.f32 %v8641_v33, %v750_v44  ;;  %v6661_v58 = vld [vmem:[%s7427_s26 + $0xd0] sm:$0xf]  ;;  %v6662_v33 = vld [vmem:[%s7427_s26 + $0xd4] sm:$0x1] }
 0x159   : > { %v4872_v32 = vrot.slane %v4871_v51, 4  ;;  %7224 = vmatprep.mubr.msk.bf16.mxu1 %vm408_vm0, %v6593_v18  ;;  %1493 = vst.msk [vmem:[#allocation2 + $0xb0] sm:$0xff] %vm199_vm7, %v1461_v55  ;;  %2086 = vst.msk [vmem:[#allocation2 + $0x90] sm:$0xff] %vm199_vm7, %v2054_v52  ;;  %v2052_v41 = vadd.f32 %v8653_v37, %v1567_v28  ;;  %v1462_v23 = vadd.f32 %v8655_v38, %v753_v1  ;;  %v8796_v25 = vpop.f32.mrb[44].mxu0  ;;  %v7038_v38 = vpop.f32.mrb[48].mxu1  ;;  %v6677_v47 = vrot.slane %v6657_v60, 9 }
 0x15a   : > { %v4867_v24 = vsel %vm7490_vm5, %v4862_v15, %v4866_v22  ;;  %v2055_v4 = vadd.f32 %v8666_v49, %v1570_v5  ;;  %v5457_v61 = vsel %vm7526_vm6, %v5455_v2, %v5456_v59  ;;  %1491 = vst.msk [vmem:[#allocation2 + $0xa0] sm:$0xff] %vm199_vm7, %v1459_v40  ;;  %v1460_v14 = vadd.f32 %v8668_v27, %v751_v36  ;;  %v8805_v20 = vpop.f32.mrb[45].mxu0  ;;  %v756_v53 = vld [vmem:[#allocation2 + $0xd0] sm:$0xff]  ;;  %v754_v16 = vld [vmem:[#allocation2 + $0xc0] sm:$0xff]  ;;  %v2360_v62 = vpop.f32.mrb[49].mxu1  ;;  %v757_v1 = vld [vmem:[#allocation2 + $0xd8] sm:$0xff] }
 0x15b   : > { %v4877_v11 = vsel %vm7490_vm5, %v4872_v32, %v4876_v19  ;;  %v2053_v37 = vadd.f32 %v8674_v46, %v1568_v42  ;;  %v6700_v22 = vcombine.low %v5454_v63, %v5457_v61  ;;  %2084 = vst.msk [vmem:[#allocation2 + $0x80] sm:$0xff] %vm199_vm7, %v2052_v41  ;;  %1494 = vst.msk [vmem:[#allocation2 + $0xb8] sm:$0xff] %vm199_vm7, %v1462_v23  ;;  %v5460_v26 = vrot.slane %v6658_v17, 5  ;;  %v8810_v19 = vpop.f32.mrb[46].mxu0  ;;  %v7039_v44 = vpop.f32.mrb[50].mxu1  ;;  %v755_v5 = vld [vmem:[#allocation2 + $0xc8] sm:$0xff] }
 0x15c   : > { %v6594_v49 = vcombine.low %v4867_v24, %v4877_v11  ;;  %2087 = vst.msk [vmem:[#allocation2 + $0x98] sm:$0xff] %vm199_vm7, %v2055_v4  ;;  %1492 = vst.msk [vmem:[#allocation2 + $0xa8] sm:$0xff] %vm199_vm7, %v1460_v14  ;;  %v5463_v27 = vrot.slane %v6659_v45, 5  ;;  %v6678_v46 = vrot.slane %v6660_v0, 9  ;;  %v5467_v50 = vrot.slane %v6661_v58, 5  ;;  %v8814_v34 = vpop.f32.mrb[47].mxu0 }
 0x15d   : > { %2085 = vst.msk [vmem:[#allocation2 + $0x88] sm:$0xff] %vm199_vm7, %v2053_v37  ;;  %v5470_v39 = vrot.slane %v6662_v33, 5  ;;  %7261 = vmatmul.mubr.msk.bf16.gmra.mrb[136].mxu0 %vm408_vm0, %v6700_v22  ;;  %v5461_v51 = vsel %vm7526_vm6, %v6677_v47, %v5460_v26  ;;  %v5462_v35 = vrot.slane %v5460_v26, 4  ;;  %v1465_v59 = vadd.f32 %v8691_v48, %v756_v53  ;;  %v2363_v18 = vpop.f32.mrb[51].mxu1  ;;  %v760_v60 = vld [vmem:[#allocation2 + $0xf0] sm:$0xff]  ;;  %v758_v17 = vld [vmem:[#allocation2 + $0xe0] sm:$0xff] }
 0x15e   : > { %7225 = vmatmul.mubr.msk.bf16.gmra.mrb[140].mxu1 %vm408_vm0, %v6594_v49  ;;  %v1463_v28 = vadd.f32 %v8697_v8, %v754_v16  ;;  %v5468_v15 = vsel %vm7526_vm6, %v6678_v46, %v5467_v50  ;;  %v5469_v55 = vrot.slane %v5467_v50, 4  ;;  %v1466_v52 = vadd.f32 %v8704_v54, %v757_v1  ;;  %v761_v32 = vld [vmem:[#allocation2 + $0xf8] sm:$0xff]  ;;  %v759_v40 = vld [vmem:[#allocation2 + $0xe8] sm:$0xff]  ;;  %v2135_v54 = vld [vmem:[#allocation2 + $0x10] sm:$0xff]  ;;  %v7078_v33 = vpop.f32.mrb[48].mxu0  ;;  %v7042_v14 = vpop.f32.mrb[52].mxu1 }
 0x15f   : > { %v1464_v42 = vadd.f32 %v8710_v7, %v755_v5  ;;  %v5464_v63 = vsel %vm7526_vm6, %v5462_v35, %v5463_v27  ;;  %1497 = vst.msk [vmem:[#allocation2 + $0xd0] sm:$0xff] %vm199_vm7, %v1465_v59  ;;  %v1469_v48 = vadd.f32 %v8755_v9, %v760_v60  ;;  %v1467_v8 = vadd.f32 %v8761_v12, %v758_v17  ;;  %v2133_v23 = vld [vmem:[#allocation2] sm:$0xff]  ;;  %v2136_v9 = vld [vmem:[#allocation2 + $0x18] sm:$0xff]  ;;  %v2134_v58 = vld [vmem:[#allocation2 + $0x8] sm:$0xff]  ;;  %v3178_v37 = vpop.f32.mrb[49].mxu0  ;;  %v2376_v47 = vpop.f32.mrb[53].mxu1 }
 0x160   : > { %1495 = vst.msk [vmem:[#allocation2 + $0xc0] sm:$0xff] %vm199_vm7, %v1463_v28  ;;  %v1470_v2 = vadd.f32 %v8765_v29, %v761_v32  ;;  %v6701_v45 = vcombine.low %v5461_v51, %v5464_v63  ;;  %v5471_v7 = vsel %vm7526_vm6, %v5469_v55, %v5470_v39  ;;  %v1573_v0 = vld [vmem:[#allocation2 + $0xb0] sm:$0xff]  ;;  %1498 = vst.msk [vmem:[#allocation2 + $0xd8] sm:$0xff] %vm199_vm7, %v1466_v52  ;;  %v7079_v26 = vpop.f32.mrb[50].mxu0  ;;  %v7043_v27 = vpop.f32.mrb[54].mxu1  ;;  %v2138_v50 = vld [vmem:[#allocation2 + $0x28] sm:$0xff] }
 0x161   : > { %1496 = vst.msk [vmem:[#allocation2 + $0xc8] sm:$0xff] %vm199_vm7, %v1464_v42  ;;  %v1468_v24 = vadd.f32 %v8771_v30, %v759_v40  ;;  %v2489_v41 = vadd.f32 %v7038_v38, %v2135_v54  ;;  %v6702_v4 = vcombine.low %v5468_v15, %v5471_v7  ;;  %v2058_v12 = vadd.f32 %v8689_v10, %v1573_v0  ;;  %v1571_v29 = vld [vmem:[#allocation2 + $0xa0] sm:$0xff]  ;;  %v2139_v61 = vld [vmem:[#allocation2 + $0x30] sm:$0xff]  ;;  %v3181_v46 = vpop.f32.mrb[51].mxu0  ;;  %v2379_v39 = vpop.f32.mrb[55].mxu1 }
 0x162   : > { %1501 = vst.msk [vmem:[#allocation2 + $0xf0] sm:$0xff] %vm199_vm7, %v1469_v48  ;;  %1499 = vst.msk [vmem:[#allocation2 + $0xe0] sm:$0xff] %vm199_vm7, %v1467_v8  ;;  %v2487_v21 = vadd.f32 %v2360_v62, %v2133_v23  ;;  %v2490_v36 = vadd.f32 %v7039_v44, %v2136_v9  ;;  %7264 = vmatprep.mubr.msk.bf16.mxu0 %vm408_vm0, %v6701_v45  ;;  %v2056_v30 = vadd.f32 %v8693_v13, %v1571_v29  ;;  %v1574_v11 = vld [vmem:[#allocation2 + $0xb8] sm:$0xff]  ;;  %v2137_v13 = vld [vmem:[#allocation2 + $0x20] sm:$0xff] }
 0x163   : > { %1502 = vst.msk [vmem:[#allocation2 + $0xf8] sm:$0xff] %vm199_vm7, %v1470_v2  ;;  %1500 = vst.msk [vmem:[#allocation2 + $0xe8] sm:$0xff] %vm199_vm7, %v1468_v24  ;;  %v2488_v10 = vadd.f32 %v2363_v18, %v2134_v58  ;;  %v2059_v38 = vadd.f32 %v8699_v31, %v1574_v11  ;;  %v1572_v49 = vld [vmem:[#allocation2 + $0xa8] sm:$0xff]  ;;  %v2493_v22 = vadd.f32 %v7042_v14, %v2139_v61  ;;  %v2140_v62 = vld [vmem:[#allocation2 + $0x38] sm:$0xff] }
 0x164   : > { %2521 = vst.msk [vmem:[#allocation2 + $0x10] sm:$0xff] %vm199_vm7, %v2489_v41  ;;  %2090 = vst.msk [vmem:[#allocation2 + $0xb0] sm:$0xff] %vm199_vm7, %v2058_v12  ;;  %v2057_v53 = vadd.f32 %v8706_v6, %v1572_v49  ;;  %v2491_v16 = vadd.f32 %v2376_v47, %v2137_v13  ;;  %v2494_v31 = vadd.f32 %v7043_v27, %v2140_v62  ;;  %v2143_v8 = vld [vmem:[#allocation2 + $0x50] sm:$0xff]  ;;  %v7046_v2 = vpop.f32.mrb[56].mxu1  ;;  %v2141_v45 = vld [vmem:[#allocation2 + $0x40] sm:$0xff] }
 0x165   : > { %2519 = vst.msk [vmem:[#allocation2] sm:$0xff] %vm199_vm7, %v2487_v21  ;;  %2522 = vst.msk [vmem:[#allocation2 + $0x18] sm:$0xff] %vm199_vm7, %v2490_v36  ;;  %7265 = vmatmul.mubr.msk.bf16.gmra.mrb[140].mxu0 %vm408_vm0, %v6702_v4  ;;  %v2492_v6 = vadd.f32 %v2379_v39, %v2138_v50  ;;  %v2497_v54 = vadd.f32 %v7046_v2, %v2143_v8  ;;  %v2392_v7 = vpop.f32.mrb[57].mxu1  ;;  %v2144_v23 = vld [vmem:[#allocation2 + $0x58] sm:$0xff]  ;;  %v2142_v36 = vld [vmem:[#allocation2 + $0x48] sm:$0xff] }
 0x166   : > { %2088 = vst.msk [vmem:[#allocation2 + $0xa0] sm:$0xff] %vm199_vm7, %v2056_v30  ;;  %2520 = vst.msk [vmem:[#allocation2 + $0x8] sm:$0xff] %vm199_vm7, %v2488_v10  ;;  %v1577_v44 = vld [vmem:[#allocation2 + $0xd0] sm:$0xff]  ;;  %v2495_v41 = vadd.f32 %v2392_v7, %v2141_v45  ;;  %v7047_v9 = vpop.f32.mrb[58].mxu1  ;;  %v2145_v47 = vld [vmem:[#allocation2 + $0x60] sm:$0xff] }
 0x167   : > { %2091 = vst.msk [vmem:[#allocation2 + $0xb8] sm:$0xff] %vm199_vm7, %v2059_v38  ;;  %2525 = vst.msk [vmem:[#allocation2 + $0x30] sm:$0xff] %vm199_vm7, %v2493_v22  ;;  %v1575_v51 = vld [vmem:[#allocation2 + $0xc0] sm:$0xff]  ;;  %v2062_v35 = vadd.f32 %v8753_v56, %v1577_v44  ;;  %v1578_v28 = vld [vmem:[#allocation2 + $0xd8] sm:$0xff]  ;;  %v2498_v21 = vadd.f32 %v7047_v9, %v2144_v23  ;;  %v2395_v58 = vpop.f32.mrb[59].mxu1 }
 0x168   : > { %2089 = vst.msk [vmem:[#allocation2 + $0xa8] sm:$0xff] %vm199_vm7, %v2057_v53  ;;  %2523 = vst.msk [vmem:[#allocation2 + $0x20] sm:$0xff] %vm199_vm7, %v2491_v16  ;;  %v2060_v59 = vadd.f32 %v8757_v3, %v1575_v51  ;;  %v1576_v1 = vld [vmem:[#allocation2 + $0xc8] sm:$0xff]  ;;  %v2063_v5 = vadd.f32 %v8763_v57, %v1578_v28  ;;  %v7082_v57 = vpop.f32.mrb[52].mxu0  ;;  %v2496_v11 = vadd.f32 %v2395_v58, %v2142_v36  ;;  %v2147_v38 = vld [vmem:[#allocation2 + $0x70] sm:$0xff] }
 0x169   : > { %2526 = vst.msk [vmem:[#allocation2 + $0x38] sm:$0xff] %vm199_vm7, %v2494_v31  ;;  %v2061_v18 = vadd.f32 %v8767_v43, %v1576_v1  ;;  %v1581_v15 = vld [vmem:[#allocation2 + $0xf0] sm:$0xff]  ;;  %v1579_v55 = vld [vmem:[#allocation2 + $0xe0] sm:$0xff]  ;;  %2524 = vst.msk [vmem:[#allocation2 + $0x28] sm:$0xff] %vm199_vm7, %v2492_v6  ;;  %v3194_v40 = vpop.f32.mrb[53].mxu0 }
 0x16a   : > { %v1582_v52 = vld [vmem:[#allocation2 + $0xf8] sm:$0xff]  ;;  %2094 = vst.msk [vmem:[#allocation2 + $0xd0] sm:$0xff] %vm199_vm7, %v2062_v35  ;;  %2092 = vst.msk [vmem:[#allocation2 + $0xc0] sm:$0xff] %vm199_vm7, %v2060_v59  ;;  %v2066_v56 = vadd.f32 %v8796_v25, %v1581_v15  ;;  %v2064_v3 = vadd.f32 %v8805_v20, %v1579_v55  ;;  %v1580_v60 = vld [vmem:[#allocation2 + $0xe8] sm:$0xff]  ;;  %v7083_v0 = vpop.f32.mrb[54].mxu0 }
 0x16b   : > { %v2067_v42 = vadd.f32 %v8810_v19, %v1582_v52  ;;  %v2601_v17 = vld [vmem:[#allocation2 + $0x10] sm:$0xff]  ;;  %2095 = vst.msk [vmem:[#allocation2 + $0xd8] sm:$0xff] %vm199_vm7, %v2063_v5  ;;  %2093 = vst.msk [vmem:[#allocation2 + $0xc8] sm:$0xff] %vm199_vm7, %v2061_v18  ;;  %v2065_v43 = vadd.f32 %v8814_v34, %v1580_v60  ;;  %v3197_v4 = vpop.f32.mrb[55].mxu0  ;;  %v2148_v27 = vld [vmem:[#allocation2 + $0x78] sm:$0xff] }
 0x16c   : > { %v3307_v32 = vadd.f32 %v7078_v33, %v2601_v17  ;;  %v2599_v63 = vld [vmem:[#allocation2] sm:$0xff]  ;;  %v2602_v48 = vld [vmem:[#allocation2 + $0x18] sm:$0xff]  ;;  %2098 = vst.msk [vmem:[#allocation2 + $0xf0] sm:$0xff] %vm199_vm7, %v2066_v56  ;;  %2096 = vst.msk [vmem:[#allocation2 + $0xe0] sm:$0xff] %vm199_vm7, %v2064_v3  ;;  %v7050_v49 = vpop.f32.mrb[60].mxu1 }
 0x16d   : > { %2099 = vst.msk [vmem:[#allocation2 + $0xf8] sm:$0xff] %vm199_vm7, %v2067_v42  ;;  %v3305_v25 = vadd.f32 %v3178_v37, %v2599_v63  ;;  %v3308_v20 = vadd.f32 %v7079_v26, %v2602_v48  ;;  %v2600_v19 = vld [vmem:[#allocation2 + $0x8] sm:$0xff]  ;;  %2097 = vst.msk [vmem:[#allocation2 + $0xe8] sm:$0xff] %vm199_vm7, %v2065_v43  ;;  %v7086_v37 = vpop.f32.mrb[56].mxu0  ;;  %v2501_v13 = vadd.f32 %v7050_v49, %v2147_v38  ;;  %v2408_v26 = vpop.f32.mrb[61].mxu1  ;;  %v2151_v55 = vld [vmem:[#allocation2 + $0x90] sm:$0xff] }
 0x16e   : > { %3339 = vst.msk [vmem:[#allocation2 + $0x10] sm:$0xff] %vm199_vm7, %v3307_v32  ;;  %v3306_v34 = vadd.f32 %v3181_v46, %v2600_v19  ;;  %v2605_v24 = vld [vmem:[#allocation2 + $0x30] sm:$0xff]  ;;  %2529 = vst.msk [vmem:[#allocation2 + $0x50] sm:$0xff] %vm199_vm7, %v2497_v54  ;;  %v3210_v22 = vpop.f32.mrb[57].mxu0  ;;  %v2499_v62 = vadd.f32 %v2408_v26, %v2145_v47  ;;  %v7051_v46 = vpop.f32.mrb[62].mxu1  ;;  %v2146_v51 = vld [vmem:[#allocation2 + $0x68] sm:$0xff] }
 0x16f   : > { %3337 = vst.msk [vmem:[#allocation2] sm:$0xff] %vm199_vm7, %v3305_v25  ;;  %3340 = vst.msk [vmem:[#allocation2 + $0x18] sm:$0xff] %vm199_vm7, %v3308_v20  ;;  %v3311_v12 = vadd.f32 %v7082_v57, %v2605_v24  ;;  %v2603_v29 = vld [vmem:[#allocation2 + $0x20] sm:$0xff]  ;;  %v7087_v53 = vpop.f32.mrb[58].mxu0  ;;  %v2502_v44 = vadd.f32 %v7051_v46, %v2148_v27  ;;  %v2411_v6 = vpop.f32.mrb[63].mxu1  ;;  %v2152_v32 = vld [vmem:[#allocation2 + $0x98] sm:$0xff] }
 0x170   : > { %3338 = vst.msk [vmem:[#allocation2 + $0x8] sm:$0xff] %vm199_vm7, %v3306_v34  ;;  %2527 = vst.msk [vmem:[#allocation2 + $0x40] sm:$0xff] %vm199_vm7, %v2495_v41  ;;  %v3309_v33 = vadd.f32 %v3194_v40, %v2603_v29  ;;  %v2606_v30 = vld [vmem:[#allocation2 + $0x38] sm:$0xff]  ;;  %v2604_v61 = vld [vmem:[#allocation2 + $0x28] sm:$0xff]  ;;  %v3213_v31 = vpop.f32.mrb[59].mxu0  ;;  %v2500_v28 = vadd.f32 %v2411_v6, %v2146_v51 }
 0x171   : > { %3343 = vst.msk [vmem:[#allocation2 + $0x30] sm:$0xff] %vm199_vm7, %v3311_v12  ;;  %2530 = vst.msk [vmem:[#allocation2 + $0x58] sm:$0xff] %vm199_vm7, %v2498_v21  ;;  %v3312_v10 = vadd.f32 %v7083_v0, %v2606_v30  ;;  %v3310_v14 = vadd.f32 %v3197_v4, %v2604_v61  ;;  %v2149_v42 = vld [vmem:[#allocation2 + $0x80] sm:$0xff]  ;;  %v2150_v25 = vld [vmem:[#allocation2 + $0x88] sm:$0xff] }
 0x172   : > { %3341 = vst.msk [vmem:[#allocation2 + $0x20] sm:$0xff] %vm199_vm7, %v3309_v33  ;;  %2528 = vst.msk [vmem:[#allocation2 + $0x48] sm:$0xff] %vm199_vm7, %v2496_v11  ;;  %v2155_v41 = vld [vmem:[#allocation2 + $0xb0] sm:$0xff]  ;;  %v2153_v12 = vld [vmem:[#allocation2 + $0xa0] sm:$0xff] }
 0x173   : > { %3344 = vst.msk [vmem:[#allocation2 + $0x38] sm:$0xff] %vm199_vm7, %v3312_v10  ;;  %3342 = vst.msk [vmem:[#allocation2 + $0x28] sm:$0xff] %vm199_vm7, %v3310_v14  ;;  %v7090_v15 = vpop.f32.mrb[60].mxu0  ;;  %v2156_v33 = vld [vmem:[#allocation2 + $0xb8] sm:$0xff] }
 0x174   : > { %2533 = vst.msk [vmem:[#allocation2 + $0x70] sm:$0xff] %vm199_vm7, %v2501_v13  ;;  %2531 = vst.msk [vmem:[#allocation2 + $0x60] sm:$0xff] %vm199_vm7, %v2499_v62  ;;  %v7054_v52 = vpop.f32.mrb[64].mxu1  ;;  %v3226_v56 = vpop.f32.mrb[61].mxu0  ;;  %v2160_v6 = vld [vmem:[#allocation2 + $0xd8] sm:$0xff] }
 0x175   : > { %v2609_v16 = vld [vmem:[#allocation2 + $0x50] sm:$0xff]  ;;  %2534 = vst.msk [vmem:[#allocation2 + $0x78] sm:$0xff] %vm199_vm7, %v2502_v44  ;;  %2532 = vst.msk [vmem:[#allocation2 + $0x68] sm:$0xff] %vm199_vm7, %v2500_v28  ;;  %v2505_v3 = vadd.f32 %v7054_v52, %v2151_v55  ;;  %v2424_v60 = vpop.f32.mrb[65].mxu1  ;;  %v7091_v17 = vpop.f32.mrb[62].mxu0 }
 0x176   : > { %v3315_v50 = vadd.f32 %v7086_v37, %v2609_v16  ;;  %v2503_v43 = vadd.f32 %v2424_v60, %v2149_v42  ;;  %v7055_v63 = vpop.f32.mrb[66].mxu1  ;;  %v3229_v48 = vpop.f32.mrb[63].mxu0  ;;  %v2154_v37 = vld [vmem:[#allocation2 + $0xa8] sm:$0xff]  ;;  %v2159_v16 = vld [vmem:[#allocation2 + $0xd0] sm:$0xff] }
 0x177   : > { %v2607_v39 = vld [vmem:[#allocation2 + $0x40] sm:$0xff]  ;;  %2537 = vst.msk [vmem:[#allocation2 + $0x90] sm:$0xff] %vm199_vm7, %v2505_v3  ;;  %v2506_v40 = vadd.f32 %v7055_v63, %v2152_v32  ;;  %v2427_v20 = vpop.f32.mrb[67].mxu1 }
 0x178   : > { %v3313_v35 = vadd.f32 %v3210_v22, %v2607_v39  ;;  %v2610_v59 = vld [vmem:[#allocation2 + $0x58] sm:$0xff]  ;;  %3347 = vst.msk [vmem:[#allocation2 + $0x50] sm:$0xff] %vm199_vm7, %v3315_v50  ;;  %2535 = vst.msk [vmem:[#allocation2 + $0x80] sm:$0xff] %vm199_vm7, %v2503_v43  ;;  %v2504_v45 = vadd.f32 %v2427_v20, %v2150_v25 }
 0x179   : > { %v3316_v1 = vadd.f32 %v7087_v53, %v2610_v59  ;;  %v2608_v5 = vld [vmem:[#allocation2 + $0x48] sm:$0xff]  ;;  %2538 = vst.msk [vmem:[#allocation2 + $0x98] sm:$0xff] %vm199_vm7, %v2506_v40  ;;  %v2164_v20 = vld [vmem:[#allocation2 + $0xf8] sm:$0xff] }
 0x17a   : > { %3345 = vst.msk [vmem:[#allocation2 + $0x40] sm:$0xff] %vm199_vm7, %v3313_v35  ;;  %v3314_v18 = vadd.f32 %v3213_v31, %v2608_v5  ;;  %2536 = vst.msk [vmem:[#allocation2 + $0x88] sm:$0xff] %vm199_vm7, %v2504_v45  ;;  %v2157_v31 = vld [vmem:[#allocation2 + $0xc0] sm:$0xff] }
 0x17b   : > { %3348 = vst.msk [vmem:[#allocation2 + $0x58] sm:$0xff] %vm199_vm7, %v3316_v1  ;;  %v2613_v57 = vld [vmem:[#allocation2 + $0x70] sm:$0xff]  ;;  %v2611_v2 = vld [vmem:[#allocation2 + $0x60] sm:$0xff]  ;;  %v7094_v24 = vpop.f32.mrb[64].mxu0 }
 0x17c   : > { %3346 = vst.msk [vmem:[#allocation2 + $0x48] sm:$0xff] %vm199_vm7, %v3314_v18  ;;  %v3319_v8 = vadd.f32 %v7090_v15, %v2613_v57  ;;  %v3317_v19 = vadd.f32 %v3226_v56, %v2611_v2  ;;  %v2614_v54 = vld [vmem:[#allocation2 + $0x78] sm:$0xff]  ;;  %v2612_v0 = vld [vmem:[#allocation2 + $0x68] sm:$0xff]  ;;  %v7058_v23 = vpop.f32.mrb[68].mxu1  ;;  %v3242_v9 = vpop.f32.mrb[65].mxu0  ;;  %v2163_v57 = vld [vmem:[#allocation2 + $0xf0] sm:$0xff] }
 0x17d   : > { %v3320_v7 = vadd.f32 %v7091_v17, %v2614_v54  ;;  %v3318_v34 = vadd.f32 %v3229_v48, %v2612_v0  ;;  %v2509_v4 = vadd.f32 %v7058_v23, %v2155_v41  ;;  %v2440_v29 = vpop.f32.mrb[69].mxu1  ;;  %v7095_v21 = vpop.f32.mrb[66].mxu0  ;;  %v2158_v18 = vld [vmem:[#allocation2 + $0xc8] sm:$0xff]  ;;  %v2161_v48 = vld [vmem:[#allocation2 + $0xe0] sm:$0xff] }
 0x17e   : > { %3351 = vst.msk [vmem:[#allocation2 + $0x70] sm:$0xff] %vm199_vm7, %v3319_v8  ;;  %3349 = vst.msk [vmem:[#allocation2 + $0x60] sm:$0xff] %vm199_vm7, %v3317_v19  ;;  %v2617_v36 = vld [vmem:[#allocation2 + $0x90] sm:$0xff]  ;;  %v2507_v58 = vadd.f32 %v2440_v29, %v2153_v12  ;;  %v7059_v30 = vpop.f32.mrb[70].mxu1  ;;  %v3245_v11 = vpop.f32.mrb[67].mxu0 }
 0x17f   : > { %3352 = vst.msk [vmem:[#allocation2 + $0x78] sm:$0xff] %vm199_vm7, %v3320_v7  ;;  %3350 = vst.msk [vmem:[#allocation2 + $0x68] sm:$0xff] %vm199_vm7, %v3318_v34  ;;  %v3323_v10 = vadd.f32 %v7094_v24, %v2617_v36  ;;  %v2615_v61 = vld [vmem:[#allocation2 + $0x80] sm:$0xff]  ;;  %v2510_v14 = vadd.f32 %v7059_v30, %v2156_v33  ;;  %v2443_v38 = vpop.f32.mrb[71].mxu1  ;;  %v2162_v34 = vld [vmem:[#allocation2 + $0xe8] sm:$0xff] }
 0x180   : > { %2541 = vst.msk [vmem:[#allocation2 + $0xb0] sm:$0xff] %vm199_vm7, %v2509_v4  ;;  %2539 = vst.msk [vmem:[#allocation2 + $0xa0] sm:$0xff] %vm199_vm7, %v2507_v58  ;;  %v3321_v49 = vadd.f32 %v3242_v9, %v2615_v61  ;;  %v2618_v22 = vld [vmem:[#allocation2 + $0x98] sm:$0xff]  ;;  %v2508_v13 = vadd.f32 %v2443_v38, %v2154_v37  ;;  %v3419_v58 = vld [vmem:[#allocation2 + $0x10] sm:$0xff] }
 0x181   : > { %3355 = vst.msk [vmem:[#allocation2 + $0x90] sm:$0xff] %vm199_vm7, %v3323_v10  ;;  %2542 = vst.msk [vmem:[#allocation2 + $0xb8] sm:$0xff] %vm199_vm7, %v2510_v14  ;;  %v3324_v47 = vadd.f32 %v7095_v21, %v2618_v22  ;;  %v2616_v26 = vld [vmem:[#allocation2 + $0x88] sm:$0xff]  ;;  %v3417_v61 = vld [vmem:[#allocation2] sm:$0xff] }
 0x182   : > { %3353 = vst.msk [vmem:[#allocation2 + $0x80] sm:$0xff] %vm199_vm7, %v3321_v49  ;;  %2540 = vst.msk [vmem:[#allocation2 + $0xa8] sm:$0xff] %vm199_vm7, %v2508_v13  ;;  %v3322_v53 = vadd.f32 %v3245_v11, %v2616_v26  ;;  %v3420_v13 = vld [vmem:[#allocation2 + $0x18] sm:$0xff] }
 0x183   : > { %3356 = vst.msk [vmem:[#allocation2 + $0x98] sm:$0xff] %vm199_vm7, %v3324_v47 }
 0x184   : > { %3354 = vst.msk [vmem:[#allocation2 + $0x88] sm:$0xff] %vm199_vm7, %v3322_v53  ;;  %v7062_v62 = vpop.f32.mrb[72].mxu1  ;;  %v7098_v46 = vpop.f32.mrb[68].mxu0 }
 0x185   : > { %v2513_v27 = vadd.f32 %v7062_v62, %v2159_v16  ;;  %v2456_v50 = vpop.f32.mrb[73].mxu1  ;;  %v3258_v51 = vpop.f32.mrb[69].mxu0 }
 0x186   : > { %v2511_v44 = vadd.f32 %v2456_v50, %v2157_v31  ;;  %v7063_v35 = vpop.f32.mrb[74].mxu1  ;;  %v7099_v5 = vpop.f32.mrb[70].mxu0 }
 0x187   : > { %v2621_v39 = vld [vmem:[#allocation2 + $0xb0] sm:$0xff]  ;;  %2545 = vst.msk [vmem:[#allocation2 + $0xd0] sm:$0xff] %vm199_vm7, %v2513_v27  ;;  %v2619_v28 = vld [vmem:[#allocation2 + $0xa0] sm:$0xff]  ;;  %v2514_v1 = vadd.f32 %v7063_v35, %v2160_v6  ;;  %v2459_v15 = vpop.f32.mrb[75].mxu1  ;;  %v3261_v3 = vpop.f32.mrb[71].mxu0  ;;  %v3418_v27 = vld [vmem:[#allocation2 + $0x8] sm:$0xff] }
 0x188   : > { %v3327_v59 = vadd.f32 %v7098_v46, %v2621_v39  ;;  %2543 = vst.msk [vmem:[#allocation2 + $0xc0] sm:$0xff] %vm199_vm7, %v2511_v44  ;;  %v3325_v55 = vadd.f32 %v3258_v51, %v2619_v28  ;;  %v2622_v52 = vld [vmem:[#allocation2 + $0xb8] sm:$0xff]  ;;  %v2512_v56 = vadd.f32 %v2459_v15, %v2158_v18  ;;  %v3423_v51 = vld [vmem:[#allocation2 + $0x30] sm:$0xff]  ;;  %v3421_v28 = vld [vmem:[#allocation2 + $0x20] sm:$0xff] }
 0x189   : > { %2546 = vst.msk [vmem:[#allocation2 + $0xd8] sm:$0xff] %vm199_vm7, %v2514_v1  ;;  %v3328_v42 = vadd.f32 %v7099_v5, %v2622_v52  ;;  %v2620_v60 = vld [vmem:[#allocation2 + $0xa8] sm:$0xff] }
 0x18a   : > { %3359 = vst.msk [vmem:[#allocation2 + $0xb0] sm:$0xff] %vm199_vm7, %v3327_v59  ;;  %3357 = vst.msk [vmem:[#allocation2 + $0xa0] sm:$0xff] %vm199_vm7, %v3325_v55  ;;  %v3326_v17 = vadd.f32 %v3261_v3, %v2620_v60  ;;  %v3424_v55 = vld [vmem:[#allocation2 + $0x38] sm:$0xff] }
 0x18b   : > { %2544 = vst.msk [vmem:[#allocation2 + $0xc8] sm:$0xff] %vm199_vm7, %v2512_v56  ;;  %3360 = vst.msk [vmem:[#allocation2 + $0xb8] sm:$0xff] %vm199_vm7, %v3328_v42 }
 0x18c   : > { %3358 = vst.msk [vmem:[#allocation2 + $0xa8] sm:$0xff] %vm199_vm7, %v3326_v17  ;;  %v7066_v43 = vpop.f32.mrb[76].mxu1  ;;  %v7102_v63 = vpop.f32.mrb[72].mxu0  ;;  %v3422_v17 = vld [vmem:[#allocation2 + $0x28] sm:$0xff] }
 0x18d   : > { %v2517_v32 = vadd.f32 %v7066_v43, %v2163_v57  ;;  %v2472_v8 = vpop.f32.mrb[77].mxu1  ;;  %v3274_v25 = vpop.f32.mrb[73].mxu0 }
 0x18e   : > { %v2625_v2 = vld [vmem:[#allocation2 + $0xd0] sm:$0xff]  ;;  %v2515_v40 = vadd.f32 %v2472_v8, %v2161_v48  ;;  %v7067_v19 = vpop.f32.mrb[78].mxu1  ;;  %v7103_v0 = vpop.f32.mrb[74].mxu0 }
 0x18f   : > { %2549 = vst.msk [vmem:[#allocation2 + $0xf0] sm:$0xff] %vm199_vm7, %v2517_v32  ;;  %v3331_v54 = vadd.f32 %v7102_v63, %v2625_v2  ;;  %v2623_v45 = vld [vmem:[#allocation2 + $0xc0] sm:$0xff]  ;;  %v2518_v7 = vadd.f32 %v7067_v19, %v2164_v20  ;;  %v2475_v24 = vpop.f32.mrb[79].mxu1  ;;  %v3277_v4 = vpop.f32.mrb[75].mxu0 }
 0x190   : > { %2547 = vst.msk [vmem:[#allocation2 + $0xe0] sm:$0xff] %vm199_vm7, %v2515_v40  ;;  %v3329_v41 = vadd.f32 %v3274_v25, %v2623_v45  ;;  %v2626_v23 = vld [vmem:[#allocation2 + $0xd8] sm:$0xff]  ;;  %v2516_v9 = vadd.f32 %v2475_v24, %v2162_v34  ;;  %v3427_v25 = vld [vmem:[#allocation2 + $0x50] sm:$0xff]  ;;  %v3425_v45 = vld [vmem:[#allocation2 + $0x40] sm:$0xff] }
 0x191   : > { %3363 = vst.msk [vmem:[#allocation2 + $0xd0] sm:$0xff] %vm199_vm7, %v3331_v54  ;;  %2550 = vst.msk [vmem:[#allocation2 + $0xf8] sm:$0xff] %vm199_vm7, %v2518_v7  ;;  %v3332_v12 = vadd.f32 %v7103_v0, %v2626_v23 }
 0x192   : > { %v2624_v29 = vld [vmem:[#allocation2 + $0xc8] sm:$0xff]  ;;  %3361 = vst.msk [vmem:[#allocation2 + $0xc0] sm:$0xff] %vm199_vm7, %v3329_v41  ;;  %2548 = vst.msk [vmem:[#allocation2 + $0xe8] sm:$0xff] %vm199_vm7, %v2516_v9  ;;  %v3428_v41 = vld [vmem:[#allocation2 + $0x58] sm:$0xff] }
 0x193   : > { %v3330_v21 = vadd.f32 %v3277_v4, %v2624_v29  ;;  %3364 = vst.msk [vmem:[#allocation2 + $0xd8] sm:$0xff] %vm199_vm7, %v3332_v12 }
 0x195   : > { %3362 = vst.msk [vmem:[#allocation2 + $0xc8] sm:$0xff] %vm199_vm7, %v3330_v21  ;;  %v7118_v33 = vpop.f32.mrb[80].mxu1  ;;  %v3426_v21 = vld [vmem:[#allocation2 + $0x48] sm:$0xff] }
 0x196   : > { %v2629_v36 = vld [vmem:[#allocation2 + $0xf0] sm:$0xff]  ;;  %v7106_v30 = vpop.f32.mrb[76].mxu0  ;;  %v3901_v11 = vadd.f32 %v7118_v33, %v3419_v58  ;;  %v3772_v14 = vpop.f32.mrb[81].mxu1 }
 0x197   : > { %v2627_v10 = vld [vmem:[#allocation2 + $0xe0] sm:$0xff]  ;;  %v3335_v37 = vadd.f32 %v7106_v30, %v2629_v36  ;;  %v3290_v38 = vpop.f32.mrb[77].mxu0  ;;  %v3899_v49 = vadd.f32 %v3772_v14, %v3417_v61  ;;  %v7119_v47 = vpop.f32.mrb[82].mxu1 }
 0x198   : > { %v2630_v22 = vld [vmem:[#allocation2 + $0xf8] sm:$0xff]  ;;  %3933 = vst.msk [vmem:[#allocation2 + $0x10] sm:$0xff] %vm199_vm7, %v3901_v11  ;;  %v3333_v26 = vadd.f32 %v3290_v38, %v2627_v10  ;;  %v7107_v53 = vpop.f32.mrb[78].mxu0  ;;  %v3902_v16 = vadd.f32 %v7119_v47, %v3420_v13  ;;  %v3775_v46 = vpop.f32.mrb[83].mxu1  ;;  %v3429_v13 = vld [vmem:[#allocation2 + $0x60] sm:$0xff] }
 0x199   : > { %v2628_v62 = vld [vmem:[#allocation2 + $0xe8] sm:$0xff]  ;;  %3367 = vst.msk [vmem:[#allocation2 + $0xf0] sm:$0xff] %vm199_vm7, %v3335_v37  ;;  %3931 = vst.msk [vmem:[#allocation2] sm:$0xff] %vm199_vm7, %v3899_v49  ;;  %v3336_v31 = vadd.f32 %v7107_v53, %v2630_v22  ;;  %v3293_v50 = vpop.f32.mrb[79].mxu0  ;;  %v3900_v39 = vadd.f32 %v3775_v46, %v3418_v27  ;;  %v3431_v37 = vld [vmem:[#allocation2 + $0x70] sm:$0xff] }
 0x19a   : > { %3365 = vst.msk [vmem:[#allocation2 + $0xe0] sm:$0xff] %vm199_vm7, %v3333_v26  ;;  %3934 = vst.msk [vmem:[#allocation2 + $0x18] sm:$0xff] %vm199_vm7, %v3902_v16  ;;  %v3334_v44 = vadd.f32 %v3293_v50, %v2628_v62  ;;  %v3432_v62 = vld [vmem:[#allocation2 + $0x78] sm:$0xff] }
 0x19b   : > { %3368 = vst.msk [vmem:[#allocation2 + $0xf8] sm:$0xff] %vm199_vm7, %v3336_v31  ;;  %3932 = vst.msk [vmem:[#allocation2 + $0x8] sm:$0xff] %vm199_vm7, %v3900_v39 }
 0x19c   : > { %3366 = vst.msk [vmem:[#allocation2 + $0xe8] sm:$0xff] %vm199_vm7, %v3334_v44  ;;  %v3430_v44 = vld [vmem:[#allocation2 + $0x68] sm:$0xff] }
 0x19d   : > { %v7122_v6 = vpop.f32.mrb[84].mxu1 }
 0x19e   : > { %v3905_v35 = vadd.f32 %v7122_v6, %v3423_v51  ;;  %v7158_v59 = vpop.f32.mrb[80].mxu0  ;;  %v3788_v1 = vpop.f32.mrb[85].mxu1 }
 0x19f   : > { %v3998_v5 = vld [vmem:[#allocation2 + $0x10] sm:$0xff]  ;;  %v3903_v18 = vadd.f32 %v3788_v1, %v3421_v28  ;;  %v4223_v15 = vpop.f32.mrb[81].mxu0  ;;  %v7123_v52 = vpop.f32.mrb[86].mxu1 }
 0x1a0   : > { %3937 = vst.msk [vmem:[#allocation2 + $0x30] sm:$0xff] %vm199_vm7, %v3905_v35  ;;  %v4352_v56 = vadd.f32 %v7158_v59, %v3998_v5  ;;  %v3996_v3 = vld [vmem:[#allocation2] sm:$0xff]  ;;  %v3906_v42 = vadd.f32 %v7123_v52, %v3424_v55  ;;  %v7159_v60 = vpop.f32.mrb[82].mxu0  ;;  %v3791_v57 = vpop.f32.mrb[87].mxu1 }
 0x1a1   : > { %3935 = vst.msk [vmem:[#allocation2 + $0x20] sm:$0xff] %vm199_vm7, %v3903_v18  ;;  %v4350_v43 = vadd.f32 %v4223_v15, %v3996_v3  ;;  %v3999_v32 = vld [vmem:[#allocation2 + $0x18] sm:$0xff]  ;;  %v3904_v63 = vadd.f32 %v3791_v57, %v3422_v17  ;;  %v4226_v48 = vpop.f32.mrb[83].mxu0  ;;  %v3435_v15 = vld [vmem:[#allocation2 + $0x90] sm:$0xff]  ;;  %v3433_v3 = vld [vmem:[#allocation2 + $0x80] sm:$0xff] }
 0x1a2   : > { %4384 = vst.msk [vmem:[#allocation2 + $0x10] sm:$0xff] %vm199_vm7, %v4352_v56  ;;  %3938 = vst.msk [vmem:[#allocation2 + $0x38] sm:$0xff] %vm199_vm7, %v3906_v42  ;;  %v4353_v8 = vadd.f32 %v7159_v60, %v3999_v32  ;;  %v3997_v2 = vld [vmem:[#allocation2 + $0x8] sm:$0xff] }
 0x1a3   : > { %4382 = vst.msk [vmem:[#allocation2] sm:$0xff] %vm199_vm7, %v4350_v43  ;;  %3936 = vst.msk [vmem:[#allocation2 + $0x28] sm:$0xff] %vm199_vm7, %v3904_v63  ;;  %v4351_v40 = vadd.f32 %v4226_v48, %v3997_v2  ;;  %v3436_v43 = vld [vmem:[#allocation2 + $0x98] sm:$0xff] }
 0x1a4   : > { %4385 = vst.msk [vmem:[#allocation2 + $0x18] sm:$0xff] %vm199_vm7, %v4353_v8 }
 0x1a5   : > { %4383 = vst.msk [vmem:[#allocation2 + $0x8] sm:$0xff] %vm199_vm7, %v4351_v40  ;;  %v7126_v20 = vpop.f32.mrb[88].mxu1  ;;  %v3434_v40 = vld [vmem:[#allocation2 + $0x88] sm:$0xff] }
 0x1a6   : > { %v3909_v19 = vadd.f32 %v7126_v20, %v3427_v25  ;;  %v7162_v54 = vpop.f32.mrb[84].mxu0  ;;  %v3804_v7 = vpop.f32.mrb[89].mxu1 }
 0x1a7   : > { %v4002_v0 = vld [vmem:[#allocation2 + $0x30] sm:$0xff]  ;;  %v3907_v34 = vadd.f32 %v3804_v7, %v3425_v45  ;;  %v4239_v24 = vpop.f32.mrb[85].mxu0  ;;  %v7127_v23 = vpop.f32.mrb[90].mxu1 }
 0x1a8   : > { %3941 = vst.msk [vmem:[#allocation2 + $0x50] sm:$0xff] %vm199_vm7, %v3909_v19  ;;  %v4356_v9 = vadd.f32 %v7162_v54, %v4002_v0  ;;  %v4000_v4 = vld [vmem:[#allocation2 + $0x20] sm:$0xff]  ;;  %v3910_v12 = vadd.f32 %v7127_v23, %v3428_v41  ;;  %v7163_v29 = vpop.f32.mrb[86].mxu0  ;;  %v3807_v36 = vpop.f32.mrb[91].mxu1 }
 0x1a9   : > { %3939 = vst.msk [vmem:[#allocation2 + $0x40] sm:$0xff] %vm199_vm7, %v3907_v34  ;;  %v4354_v58 = vadd.f32 %v4239_v24, %v4000_v4  ;;  %v4003_v33 = vld [vmem:[#allocation2 + $0x38] sm:$0xff]  ;;  %v3908_v30 = vadd.f32 %v3807_v36, %v3426_v21  ;;  %v4242_v11 = vpop.f32.mrb[87].mxu0  ;;  %v3439_v24 = vld [vmem:[#allocation2 + $0xb0] sm:$0xff]  ;;  %v3437_v4 = vld [vmem:[#allocation2 + $0xa0] sm:$0xff] }
 0x1aa   : > { %4388 = vst.msk [vmem:[#allocation2 + $0x30] sm:$0xff] %vm199_vm7, %v4356_v9  ;;  %3942 = vst.msk [vmem:[#allocation2 + $0x58] sm:$0xff] %vm199_vm7, %v3910_v12  ;;  %v4357_v10 = vadd.f32 %v7163_v29, %v4003_v33  ;;  %v4001_v61 = vld [vmem:[#allocation2 + $0x28] sm:$0xff] }
 0x1ab   : > { %4386 = vst.msk [vmem:[#allocation2 + $0x20] sm:$0xff] %vm199_vm7, %v4354_v58  ;;  %3940 = vst.msk [vmem:[#allocation2 + $0x48] sm:$0xff] %vm199_vm7, %v3908_v30  ;;  %v4355_v14 = vadd.f32 %v4242_v11, %v4001_v61  ;;  %v3440_v58 = vld [vmem:[#allocation2 + $0xb8] sm:$0xff] }
 0x1ac   : > { %4389 = vst.msk [vmem:[#allocation2 + $0x38] sm:$0xff] %vm199_vm7, %v4357_v10 }
 0x1ad   : > { %4387 = vst.msk [vmem:[#allocation2 + $0x28] sm:$0xff] %vm199_vm7, %v4355_v14  ;;  %v7130_v38 = vpop.f32.mrb[92].mxu1  ;;  %v3438_v14 = vld [vmem:[#allocation2 + $0xa8] sm:$0xff] }
 0x1ae   : > { %v3913_v49 = vadd.f32 %v7130_v38, %v3431_v37  ;;  %v7166_v22 = vpop.f32.mrb[88].mxu0  ;;  %v3820_v47 = vpop.f32.mrb[93].mxu1 }
 0x1af   : > { %v4006_v26 = vld [vmem:[#allocation2 + $0x50] sm:$0xff]  ;;  %v3911_v53 = vadd.f32 %v3820_v47, %v3429_v13  ;;  %v4255_v16 = vpop.f32.mrb[89].mxu0  ;;  %v7131_v27 = vpop.f32.mrb[94].mxu1 }
 0x1b0   : > { %3945 = vst.msk [vmem:[#allocation2 + $0x70] sm:$0xff] %vm199_vm7, %v3913_v49  ;;  %v4360_v46 = vadd.f32 %v7166_v22, %v4006_v26  ;;  %v4004_v31 = vld [vmem:[#allocation2 + $0x40] sm:$0xff]  ;;  %v3914_v50 = vadd.f32 %v7131_v27, %v3432_v62  ;;  %v7167_v39 = vpop.f32.mrb[90].mxu0  ;;  %v3823_v51 = vpop.f32.mrb[95].mxu1 }
 0x1b1   : > { %3943 = vst.msk [vmem:[#allocation2 + $0x60] sm:$0xff] %vm199_vm7, %v3911_v53  ;;  %v4358_v6 = vadd.f32 %v4255_v16, %v4004_v31  ;;  %v4007_v35 = vld [vmem:[#allocation2 + $0x58] sm:$0xff]  ;;  %v3912_v59 = vadd.f32 %v3823_v51, %v3430_v44  ;;  %v4258_v28 = vpop.f32.mrb[91].mxu0  ;;  %v3443_v16 = vld [vmem:[#allocation2 + $0xd0] sm:$0xff]  ;;  %v3441_v31 = vld [vmem:[#allocation2 + $0xc0] sm:$0xff] }
 0x1b2   : > { %4392 = vst.msk [vmem:[#allocation2 + $0x50] sm:$0xff] %vm199_vm7, %v4360_v46  ;;  %3946 = vst.msk [vmem:[#allocation2 + $0x78] sm:$0xff] %vm199_vm7, %v3914_v50  ;;  %v4361_v1 = vadd.f32 %v7167_v39, %v4007_v35  ;;  %v4005_v5 = vld [vmem:[#allocation2 + $0x48] sm:$0xff] }
 0x1b3   : > { %4390 = vst.msk [vmem:[#allocation2 + $0x40] sm:$0xff] %vm199_vm7, %v4358_v6  ;;  %3944 = vst.msk [vmem:[#allocation2 + $0x68] sm:$0xff] %vm199_vm7, %v3912_v59  ;;  %v4359_v18 = vadd.f32 %v4258_v28, %v4005_v5  ;;  %v3444_v6 = vld [vmem:[#allocation2 + $0xd8] sm:$0xff] }
 0x1b4   : > { %4393 = vst.msk [vmem:[#allocation2 + $0x58] sm:$0xff] %vm199_vm7, %v4361_v1 }
 0x1b5   : > { %4391 = vst.msk [vmem:[#allocation2 + $0x48] sm:$0xff] %vm199_vm7, %v4359_v18  ;;  %v7134_v55 = vpop.f32.mrb[96].mxu1  ;;  %v3442_v18 = vld [vmem:[#allocation2 + $0xc8] sm:$0xff] }
 0x1b6   : > { %v3917_v52 = vadd.f32 %v7134_v55, %v3435_v15  ;;  %v7170_v56 = vpop.f32.mrb[92].mxu0  ;;  %v3836_v42 = vpop.f32.mrb[97].mxu1 }
 0x1b7   : > { %v4010_v60 = vld [vmem:[#allocation2 + $0x70] sm:$0xff]  ;;  %v3915_v17 = vadd.f32 %v3836_v42, %v3433_v3  ;;  %v4271_v57 = vpop.f32.mrb[93].mxu0  ;;  %v7135_v32 = vpop.f32.mrb[98].mxu1 }
 0x1b8   : > { %3949 = vst.msk [vmem:[#allocation2 + $0x90] sm:$0xff] %vm199_vm7, %v3917_v52  ;;  %v4364_v63 = vadd.f32 %v7170_v56, %v4010_v60  ;;  %v4008_v48 = vld [vmem:[#allocation2 + $0x60] sm:$0xff]  ;;  %v3918_v8 = vadd.f32 %v7135_v32, %v3436_v43  ;;  %v7171_v2 = vpop.f32.mrb[94].mxu0  ;;  %v3839_v25 = vpop.f32.mrb[99].mxu1 }
 0x1b9   : > { %3947 = vst.msk [vmem:[#allocation2 + $0x80] sm:$0xff] %vm199_vm7, %v3915_v17  ;;  %v4362_v20 = vadd.f32 %v4271_v57, %v4008_v48  ;;  %v4011_v19 = vld [vmem:[#allocation2 + $0x78] sm:$0xff]  ;;  %v3916_v54 = vadd.f32 %v3839_v25, %v3434_v40  ;;  %v4274_v45 = vpop.f32.mrb[95].mxu0  ;;  %v3447_v57 = vld [vmem:[#allocation2 + $0xf0] sm:$0xff]  ;;  %v3445_v48 = vld [vmem:[#allocation2 + $0xe0] sm:$0xff] }
 0x1ba   : > { %4396 = vst.msk [vmem:[#allocation2 + $0x70] sm:$0xff] %vm199_vm7, %v4364_v63  ;;  %3950 = vst.msk [vmem:[#allocation2 + $0x98] sm:$0xff] %vm199_vm7, %v3918_v8  ;;  %v4365_v7 = vadd.f32 %v7171_v2, %v4011_v19  ;;  %v4009_v0 = vld [vmem:[#allocation2 + $0x68] sm:$0xff] }
 0x1bb   : > { %4394 = vst.msk [vmem:[#allocation2 + $0x60] sm:$0xff] %vm199_vm7, %v4362_v20  ;;  %3948 = vst.msk [vmem:[#allocation2 + $0x88] sm:$0xff] %vm199_vm7, %v3916_v54  ;;  %v4363_v34 = vadd.f32 %v4274_v45, %v4009_v0  ;;  %v3448_v20 = vld [vmem:[#allocation2 + $0xf8] sm:$0xff] }
 0x1bc   : > { %4397 = vst.msk [vmem:[#allocation2 + $0x78] sm:$0xff] %vm199_vm7, %v4365_v7 }
 0x1bd   : > { %4395 = vst.msk [vmem:[#allocation2 + $0x68] sm:$0xff] %vm199_vm7, %v4363_v34  ;;  %v7138_v41 = vpop.f32.mrb[100].mxu1  ;;  %v3446_v34 = vld [vmem:[#allocation2 + $0xe8] sm:$0xff] }
 0x1be   : > { %v3921_v23 = vadd.f32 %v7138_v41, %v3439_v24  ;;  %v7174_v9 = vpop.f32.mrb[96].mxu0  ;;  %v3852_v12 = vpop.f32.mrb[101].mxu1 }
 0x1bf   : > { %v4014_v29 = vld [vmem:[#allocation2 + $0x90] sm:$0xff]  ;;  %v3919_v21 = vadd.f32 %v3852_v12, %v3437_v4  ;;  %v4287_v36 = vpop.f32.mrb[97].mxu0  ;;  %v7139_v33 = vpop.f32.mrb[102].mxu1 }
 0x1c0   : > { %3953 = vst.msk [vmem:[#allocation2 + $0xb0] sm:$0xff] %vm199_vm7, %v3921_v23  ;;  %v4368_v30 = vadd.f32 %v7174_v9, %v4014_v29  ;;  %v4012_v11 = vld [vmem:[#allocation2 + $0x80] sm:$0xff]  ;;  %v3922_v10 = vadd.f32 %v7139_v33, %v3440_v58  ;;  %v7175_v61 = vpop.f32.mrb[98].mxu0  ;;  %v3855_v37 = vpop.f32.mrb[103].mxu1 }
 0x1c1   : > { %3951 = vst.msk [vmem:[#allocation2 + $0xa0] sm:$0xff] %vm199_vm7, %v3919_v21  ;;  %v4366_v38 = vadd.f32 %v4287_v36, %v4012_v11  ;;  %v4015_v49 = vld [vmem:[#allocation2 + $0x98] sm:$0xff]  ;;  %v3920_v22 = vadd.f32 %v3855_v37, %v3438_v14  ;;  %v4290_v13 = vpop.f32.mrb[99].mxu0  ;;  %v4464_v36 = vld [vmem:[#allocation2 + $0x10] sm:$0xff]  ;;  %v4462_v11 = vld [vmem:[#allocation2] sm:$0xff] }
 0x1c2   : > { %4400 = vst.msk [vmem:[#allocation2 + $0x90] sm:$0xff] %vm199_vm7, %v4368_v30  ;;  %3954 = vst.msk [vmem:[#allocation2 + $0xb8] sm:$0xff] %vm199_vm7, %v3922_v10  ;;  %v4369_v47 = vadd.f32 %v7175_v61, %v4015_v49  ;;  %v4013_v26 = vld [vmem:[#allocation2 + $0x88] sm:$0xff] }
 0x1c3   : > { %4398 = vst.msk [vmem:[#allocation2 + $0x80] sm:$0xff] %vm199_vm7, %v4366_v38  ;;  %3952 = vst.msk [vmem:[#allocation2 + $0xa8] sm:$0xff] %vm199_vm7, %v3920_v22  ;;  %v4367_v53 = vadd.f32 %v4290_v13, %v4013_v26  ;;  %v4465_v38 = vld [vmem:[#allocation2 + $0x18] sm:$0xff] }
 0x1c4   : > { %4401 = vst.msk [vmem:[#allocation2 + $0x98] sm:$0xff] %vm199_vm7, %v4369_v47 }
 0x1c5   : > { %4399 = vst.msk [vmem:[#allocation2 + $0x88] sm:$0xff] %vm199_vm7, %v4367_v53  ;;  %v7142_v62 = vpop.f32.mrb[104].mxu1  ;;  %v4463_v53 = vld [vmem:[#allocation2 + $0x8] sm:$0xff] }
 0x1c6   : > { %v3925_v27 = vadd.f32 %v7142_v62, %v3443_v16  ;;  %v7178_v46 = vpop.f32.mrb[100].mxu0  ;;  %v3868_v50 = vpop.f32.mrb[105].mxu1 }
 0x1c7   : > { %v4018_v39 = vld [vmem:[#allocation2 + $0xb0] sm:$0xff]  ;;  %v3923_v44 = vadd.f32 %v3868_v50, %v3441_v31  ;;  %v4303_v51 = vpop.f32.mrb[101].mxu0  ;;  %v7143_v35 = vpop.f32.mrb[106].mxu1 }
 0x1c8   : > { %3957 = vst.msk [vmem:[#allocation2 + $0xd0] sm:$0xff] %vm199_vm7, %v3925_v27  ;;  %v4372_v59 = vadd.f32 %v7178_v46, %v4018_v39  ;;  %v4016_v28 = vld [vmem:[#allocation2 + $0xa0] sm:$0xff]  ;;  %v3926_v1 = vadd.f32 %v7143_v35, %v3444_v6  ;;  %v7179_v5 = vpop.f32.mrb[102].mxu0  ;;  %v3871_v15 = vpop.f32.mrb[107].mxu1 }
 0x1c9   : > { %3955 = vst.msk [vmem:[#allocation2 + $0xc0] sm:$0xff] %vm199_vm7, %v3923_v44  ;;  %v4370_v55 = vadd.f32 %v4303_v51, %v4016_v28  ;;  %v4019_v52 = vld [vmem:[#allocation2 + $0xb8] sm:$0xff]  ;;  %v3924_v56 = vadd.f32 %v3871_v15, %v3442_v18  ;;  %v4306_v3 = vpop.f32.mrb[103].mxu0  ;;  %v4468_v51 = vld [vmem:[#allocation2 + $0x30] sm:$0xff]  ;;  %v4466_v28 = vld [vmem:[#allocation2 + $0x20] sm:$0xff] }
 0x1ca   : > { %4404 = vst.msk [vmem:[#allocation2 + $0xb0] sm:$0xff] %vm199_vm7, %v4372_v59  ;;  %3958 = vst.msk [vmem:[#allocation2 + $0xd8] sm:$0xff] %vm199_vm7, %v3926_v1  ;;  %v4373_v42 = vadd.f32 %v7179_v5, %v4019_v52  ;;  %v4017_v60 = vld [vmem:[#allocation2 + $0xa8] sm:$0xff] }
 0x1cb   : > { %4402 = vst.msk [vmem:[#allocation2 + $0xa0] sm:$0xff] %vm199_vm7, %v4370_v55  ;;  %3956 = vst.msk [vmem:[#allocation2 + $0xc8] sm:$0xff] %vm199_vm7, %v3924_v56  ;;  %v4371_v17 = vadd.f32 %v4306_v3, %v4017_v60  ;;  %v4469_v55 = vld [vmem:[#allocation2 + $0x38] sm:$0xff] }
 0x1cc   : > { %4405 = vst.msk [vmem:[#allocation2 + $0xb8] sm:$0xff] %vm199_vm7, %v4373_v42 }
 0x1cd   : > { %4403 = vst.msk [vmem:[#allocation2 + $0xa8] sm:$0xff] %vm199_vm7, %v4371_v17  ;;  %v7146_v43 = vpop.f32.mrb[108].mxu1  ;;  %v4467_v17 = vld [vmem:[#allocation2 + $0x28] sm:$0xff] }
 0x1ce   : > { %v3929_v32 = vadd.f32 %v7146_v43, %v3447_v57  ;;  %v7182_v63 = vpop.f32.mrb[104].mxu0  ;;  %v3884_v8 = vpop.f32.mrb[109].mxu1 }
 0x1cf   : > { %v4022_v2 = vld [vmem:[#allocation2 + $0xd0] sm:$0xff]  ;;  %v3927_v40 = vadd.f32 %v3884_v8, %v3445_v48  ;;  %v4319_v25 = vpop.f32.mrb[105].mxu0  ;;  %v7147_v19 = vpop.f32.mrb[110].mxu1 }
 0x1d0   : > { %3961 = vst.msk [vmem:[#allocation2 + $0xf0] sm:$0xff] %vm199_vm7, %v3929_v32  ;;  %v4376_v54 = vadd.f32 %v7182_v63, %v4022_v2  ;;  %v4020_v45 = vld [vmem:[#allocation2 + $0xc0] sm:$0xff]  ;;  %v3930_v7 = vadd.f32 %v7147_v19, %v3448_v20  ;;  %v7183_v0 = vpop.f32.mrb[106].mxu0  ;;  %v3887_v24 = vpop.f32.mrb[111].mxu1 }
 0x1d1   : > { %3959 = vst.msk [vmem:[#allocation2 + $0xe0] sm:$0xff] %vm199_vm7, %v3927_v40  ;;  %v4374_v41 = vadd.f32 %v4319_v25, %v4020_v45  ;;  %v4023_v23 = vld [vmem:[#allocation2 + $0xd8] sm:$0xff]  ;;  %v3928_v9 = vadd.f32 %v3887_v24, %v3446_v34  ;;  %v4322_v4 = vpop.f32.mrb[107].mxu0  ;;  %v4472_v25 = vld [vmem:[#allocation2 + $0x50] sm:$0xff]  ;;  %v4470_v45 = vld [vmem:[#allocation2 + $0x40] sm:$0xff] }
 0x1d2   : > { %4408 = vst.msk [vmem:[#allocation2 + $0xd0] sm:$0xff] %vm199_vm7, %v4376_v54  ;;  %3962 = vst.msk [vmem:[#allocation2 + $0xf8] sm:$0xff] %vm199_vm7, %v3930_v7  ;;  %v4377_v12 = vadd.f32 %v7183_v0, %v4023_v23  ;;  %v4021_v29 = vld [vmem:[#allocation2 + $0xc8] sm:$0xff]  ;;  %v9011_v0 = vld [vmem:[%s9209_s2] ss:$0 sm:$0xff] }
 0x1d3   : > { %4406 = vst.msk [vmem:[#allocation2 + $0xc0] sm:$0xff] %vm199_vm7, %v4374_v41  ;;  %3960 = vst.msk [vmem:[#allocation2 + $0xe8] sm:$0xff] %vm199_vm7, %v3928_v9  ;;  %v4375_v21 = vadd.f32 %v4322_v4, %v4021_v29  ;;  %v4473_v23 = vld [vmem:[#allocation2 + $0x58] sm:$0xff] }
 0x1d4   : > { %4409 = vst.msk [vmem:[#allocation2 + $0xd8] sm:$0xff] %vm199_vm7, %v4377_v12 }
 0x1d5   : > { %4407 = vst.msk [vmem:[#allocation2 + $0xc8] sm:$0xff] %vm199_vm7, %v4375_v21  ;;  %v7198_v58 = vpop.f32.mrb[112].mxu1 }
 0x1d6   : > { %v7186_v33 = vpop.f32.mrb[108].mxu0  ;;  %v5170_v30 = vadd.f32 %v7198_v58, %v4464_v36  ;;  %v5041_v10 = vpop.f32.mrb[113].mxu1  ;;  %v4471_v36 = vld [vmem:[#allocation2 + $0x48] sm:$0xff] }
 0x1d7   : > { %v4026_v61 = vld [vmem:[#allocation2 + $0xf0] sm:$0xff]  ;;  %v4335_v14 = vpop.f32.mrb[109].mxu0  ;;  %v5168_v37 = vadd.f32 %v5041_v10, %v4462_v11  ;;  %v7199_v49 = vpop.f32.mrb[114].mxu1 }
 0x1d8   : > { %v4380_v22 = vadd.f32 %v7186_v33, %v4026_v61  ;;  %5202 = vst.msk [vmem:[#allocation2 + $0x10] sm:$0xff] %vm199_vm7, %v5170_v30  ;;  %v4024_v13 = vld [vmem:[#allocation2 + $0xe0] sm:$0xff]  ;;  %v7187_v47 = vpop.f32.mrb[110].mxu0  ;;  %v5171_v26 = vadd.f32 %v7199_v49, %v4465_v38  ;;  %v5044_v16 = vpop.f32.mrb[115].mxu1 }
 0x1d9   : > { %v4378_v62 = vadd.f32 %v4335_v14, %v4024_v13  ;;  %5200 = vst.msk [vmem:[#allocation2] sm:$0xff] %vm199_vm7, %v5168_v37  ;;  %v4027_v27 = vld [vmem:[#allocation2 + $0xf8] sm:$0xff]  ;;  %v4338_v46 = vpop.f32.mrb[111].mxu0  ;;  %v5169_v31 = vadd.f32 %v5044_v16, %v4463_v53  ;;  %v9018_v30 = vld [vmem:[%s9210_s3] ss:$0 sm:$0xff] }
 0x1da   : > { %4412 = vst.msk [vmem:[#allocation2 + $0xf0] sm:$0xff] %vm199_vm7, %v4380_v22  ;;  %v4381_v50 = vadd.f32 %v7187_v47, %v4027_v27  ;;  %5203 = vst.msk [vmem:[#allocation2 + $0x18] sm:$0xff] %vm199_vm7, %v5171_v26  ;;  %v4025_v39 = vld [vmem:[#allocation2 + $0xe8] sm:$0xff] }
 0x1db   : > { %4410 = vst.msk [vmem:[#allocation2 + $0xe0] sm:$0xff] %vm199_vm7, %v4378_v62  ;;  %v4379_v44 = vadd.f32 %v4338_v46, %v4025_v39  ;;  %5201 = vst.msk [vmem:[#allocation2 + $0x8] sm:$0xff] %vm199_vm7, %v5169_v31 }
 0x1dc   : > { %4413 = vst.msk [vmem:[#allocation2 + $0xf8] sm:$0xff] %vm199_vm7, %v4381_v50 }
 0x1dd   : > { %4411 = vst.msk [vmem:[#allocation2 + $0xe8] sm:$0xff] %vm199_vm7, %v4379_v44  ;;  %v7202_v6 = vpop.f32.mrb[116].mxu1 }
 0x1de   : > { %v5174_v35 = vadd.f32 %v7202_v6, %v4468_v51  ;;  %v7238_v59 = vpop.f32.mrb[112].mxu0  ;;  %v5057_v1 = vpop.f32.mrb[117].mxu1 }
 0x1df   : > { %v5282_v5 = vld [vmem:[#allocation2 + $0x10] sm:$0xff]  ;;  %v5172_v18 = vadd.f32 %v5057_v1, %v4466_v28  ;;  %v5635_v15 = vpop.f32.mrb[113].mxu0  ;;  %v7203_v52 = vpop.f32.mrb[118].mxu1 }
 0x1e0   : > { %5206 = vst.msk [vmem:[#allocation2 + $0x30] sm:$0xff] %vm199_vm7, %v5174_v35  ;;  %v5764_v56 = vadd.f32 %v7238_v59, %v5282_v5  ;;  %v5280_v3 = vld [vmem:[#allocation2] sm:$0xff]  ;;  %v5175_v42 = vadd.f32 %v7203_v52, %v4469_v55  ;;  %v7239_v60 = vpop.f32.mrb[114].mxu0  ;;  %v5060_v57 = vpop.f32.mrb[119].mxu1  ;;  %v4476_v1 = vld [vmem:[#allocation2 + $0x70] sm:$0xff] }
 0x1e1   : > { %5204 = vst.msk [vmem:[#allocation2 + $0x20] sm:$0xff] %vm199_vm7, %v5172_v18  ;;  %v5762_v43 = vadd.f32 %v5635_v15, %v5280_v3  ;;  %v5283_v32 = vld [vmem:[#allocation2 + $0x18] sm:$0xff]  ;;  %v5173_v63 = vadd.f32 %v5060_v57, %v4467_v17  ;;  %v5638_v48 = vpop.f32.mrb[115].mxu0 }
 0x1e2   : > { %5796 = vst.msk [vmem:[#allocation2 + $0x10] sm:$0xff] %vm199_vm7, %v5764_v56  ;;  %5207 = vst.msk [vmem:[#allocation2 + $0x38] sm:$0xff] %vm199_vm7, %v5175_v42  ;;  %v5765_v8 = vadd.f32 %v7239_v60, %v5283_v32  ;;  %v5281_v2 = vld [vmem:[#allocation2 + $0x8] sm:$0xff]  ;;  %v4474_v42 = vld [vmem:[#allocation2 + $0x60] sm:$0xff] }
 0x1e3   : > { %5794 = vst.msk [vmem:[#allocation2] sm:$0xff] %vm199_vm7, %v5762_v43  ;;  %5205 = vst.msk [vmem:[#allocation2 + $0x28] sm:$0xff] %vm199_vm7, %v5173_v63  ;;  %v5763_v40 = vadd.f32 %v5638_v48, %v5281_v2 }
 0x1e4   : > { %5797 = vst.msk [vmem:[#allocation2 + $0x18] sm:$0xff] %vm199_vm7, %v5765_v8  ;;  %v4477_v8 = vld [vmem:[#allocation2 + $0x78] sm:$0xff] }
 0x1e5   : > { %5795 = vst.msk [vmem:[#allocation2 + $0x8] sm:$0xff] %vm199_vm7, %v5763_v40 }
 0x1e7   : > { %v5286_v34 = vld [vmem:[#allocation2 + $0x30] sm:$0xff] }
 0x1e8   : > { %v5284_v12 = vld [vmem:[#allocation2 + $0x20] sm:$0xff] }
 0x1e9   : > { %v5828_v33 = vld [vmem:[#allocation2 + $0x10] sm:$0xff]  ;;  %v5287_v10 = vld [vmem:[#allocation2 + $0x38] sm:$0xff] }
 0x1ea   : > { %v7206_v20 = vpop.f32.mrb[120].mxu1  ;;  %v7242_v54 = vpop.f32.mrb[116].mxu0  ;;  %v5867_v37 = vmul.f32 %v9011_v0, %v5828_v33  ;;  %v5826_v38 = vld [vmem:[#allocation2] sm:$0xff]  ;;  %v5285_v22 = vld [vmem:[#allocation2 + $0x28] sm:$0xff] }
 0x1eb   : > { %v5178_v19 = vadd.f32 %v7206_v20, %v4472_v25  ;;  %v5073_v7 = vpop.f32.mrb[121].mxu1  ;;  %v5651_v41 = vpop.f32.mrb[117].mxu0  ;;  %v5768_v4 = vadd.f32 %v7242_v54, %v5286_v34  ;;  %v5865_v13 = vmul.f32 %v9011_v0, %v5826_v38  ;;  %v5829_v47 = vld [vmem:[#allocation2 + $0x18] sm:$0xff] }
 0x1ec   : > { %v5176_v24 = vadd.f32 %v5073_v7, %v4470_v45  ;;  %v7207_v9 = vpop.f32.mrb[122].mxu1  ;;  %v7243_v21 = vpop.f32.mrb[118].mxu0  ;;  %v5766_v11 = vadd.f32 %v5651_v41, %v5284_v12  ;;  %v5906_v53 = vadd.f32 %v9018_v30, %v5867_v37  ;;  %v5868_v16 = vmul.f32 %v9011_v0, %v5829_v47  ;;  %v5827_v62 = vld [vmem:[#allocation2 + $0x8] sm:$0xff]  ;;  %v4480_v37 = vld [vmem:[#allocation2 + $0x90] sm:$0xff] }
 0x1ed   : > { %5210 = vst.msk [vmem:[#allocation2 + $0x50] sm:$0xff] %vm199_vm7, %v5178_v19  ;;  %v5179_v29 = vadd.f32 %v7207_v9, %v4473_v23  ;;  %v5076_v58 = vpop.f32.mrb[123].mxu1  ;;  %v5654_v14 = vpop.f32.mrb[119].mxu0  ;;  %5800 = vst.msk [vmem:[#allocation2 + $0x30] sm:$0xff] %vm199_vm7, %v5768_v4  ;;  %v5769_v49 = vadd.f32 %v7243_v21, %v5287_v10  ;;  %v5904_v27 = vadd.f32 %v9018_v30, %v5865_v13  ;;  %v4475_v45 = vld [vmem:[#allocation2 + $0x68] sm:$0xff] }
 0x1ee   : > { %5208 = vst.msk [vmem:[#allocation2 + $0x40] sm:$0xff] %vm199_vm7, %v5176_v24  ;;  %v5177_v61 = vadd.f32 %v5076_v58, %v4471_v36  ;;  %5798 = vst.msk [vmem:[#allocation2 + $0x20] sm:$0xff] %vm199_vm7, %v5766_v11  ;;  %v5767_v26 = vadd.f32 %v5654_v14, %v5285_v22  ;;  %v5866_v46 = vmul.f32 %v9011_v0, %v5827_v62 }
 0x1ef   : > { %5211 = vst.msk [vmem:[#allocation2 + $0x58] sm:$0xff] %vm199_vm7, %v5179_v29  ;;  %5801 = vst.msk [vmem:[#allocation2 + $0x38] sm:$0xff] %vm199_vm7, %v5769_v49  ;;  %v5907_v31 = vadd.f32 %v9018_v30, %v5868_v16 }
 0x1f0   : > { %5209 = vst.msk [vmem:[#allocation2 + $0x48] sm:$0xff] %vm199_vm7, %v5177_v61  ;;  %5799 = vst.msk [vmem:[#allocation2 + $0x28] sm:$0xff] %vm199_vm7, %v5767_v26  ;;  %v5905_v50 = vadd.f32 %v9018_v30, %v5866_v46 }
 0x1f1   : > { %5938 = vst.msk [vmem:[%s9027_s29 + $0x10] sm:$0xff] %vm199_vm7, %v5906_v53  ;;  %5936 = vst.msk [vmem:[%s9027_s29] sm:$0xff] %vm199_vm7, %v5904_v27  ;;  %v4478_v53 = vld [vmem:[#allocation2 + $0x80] sm:$0xff] }
 0x1f2   : > { %5939 = vst.msk [vmem:[%s9027_s29 + $0x18] sm:$0xff] %vm199_vm7, %v5907_v31  ;;  %5937 = vst.msk [vmem:[%s9027_s29 + $0x8] sm:$0xff] %vm199_vm7, %v5905_v50 }
 0x1f4   : > { %v5290_v39 = vld [vmem:[#allocation2 + $0x50] sm:$0xff] }
 0x1f5   : > { %v5288_v44 = vld [vmem:[#allocation2 + $0x40] sm:$0xff]  ;;  %v5832_v51 = vld [vmem:[#allocation2 + $0x30] sm:$0xff] }
 0x1f6   : > { %v5291_v35 = vld [vmem:[#allocation2 + $0x58] sm:$0xff]  ;;  %v5871_v59 = vmul.f32 %v9011_v0, %v5832_v51  ;;  %v5830_v28 = vld [vmem:[#allocation2 + $0x20] sm:$0xff] }
 0x1f7   : > { %v5289_v55 = vld [vmem:[#allocation2 + $0x48] sm:$0xff]  ;;  %v5869_v52 = vmul.f32 %v9011_v0, %v5830_v28  ;;  %v5833_v56 = vld [vmem:[#allocation2 + $0x38] sm:$0xff] }
 0x1f8   : > { %v7246_v6 = vpop.f32.mrb[120].mxu0  ;;  %v5910_v43 = vadd.f32 %v9018_v30, %v5871_v59  ;;  %v5872_v32 = vmul.f32 %v9011_v0, %v5833_v56  ;;  %v5831_v63 = vld [vmem:[#allocation2 + $0x28] sm:$0xff] }
 0x1f9   : > { %v7210_v5 = vpop.f32.mrb[124].mxu1  ;;  %v5772_v18 = vadd.f32 %v7246_v6, %v5290_v39  ;;  %v5667_v15 = vpop.f32.mrb[121].mxu0  ;;  %v5908_v20 = vadd.f32 %v9018_v30, %v5869_v52  ;;  %v5870_v19 = vmul.f32 %v9011_v0, %v5831_v63  ;;  %v4481_v39 = vld [vmem:[#allocation2 + $0x98] sm:$0xff]  ;;  %v4479_v59 = vld [vmem:[#allocation2 + $0x88] sm:$0xff] }
 0x1fa   : > { %v5182_v3 = vadd.f32 %v7210_v5, %v4476_v1  ;;  %v5089_v60 = vpop.f32.mrb[125].mxu1  ;;  %v5770_v17 = vadd.f32 %v5667_v15, %v5288_v44  ;;  %v7247_v57 = vpop.f32.mrb[122].mxu0  ;;  %5942 = vst.msk [vmem:[%s9027_s29 + $0x30] sm:$0xff] %vm199_vm7, %v5910_v43  ;;  %v5911_v24 = vadd.f32 %v9018_v30, %v5872_v32 }
 0x1fb   : > { %5804 = vst.msk [vmem:[#allocation2 + $0x50] sm:$0xff] %vm199_vm7, %v5772_v18  ;;  %v5180_v48 = vadd.f32 %v5089_v60, %v4474_v42  ;;  %v7211_v2 = vpop.f32.mrb[126].mxu1  ;;  %v5773_v40 = vadd.f32 %v7247_v57, %v5291_v35  ;;  %v5670_v25 = vpop.f32.mrb[123].mxu0  ;;  %5940 = vst.msk [vmem:[%s9027_s29 + $0x20] sm:$0xff] %vm199_vm7, %v5908_v20  ;;  %v5909_v23 = vadd.f32 %v9018_v30, %v5870_v19 }
 0x1fc   : > { %5214 = vst.msk [vmem:[#allocation2 + $0x70] sm:$0xff] %vm199_vm7, %v5182_v3  ;;  %5802 = vst.msk [vmem:[#allocation2 + $0x40] sm:$0xff] %vm199_vm7, %v5770_v17  ;;  %v5183_v54 = vadd.f32 %v7211_v2, %v4477_v8  ;;  %v5092_v7 = vpop.f32.mrb[127].mxu1  ;;  %v5771_v34 = vadd.f32 %v5670_v25, %v5289_v55 }
 0x1fd   : > { %5212 = vst.msk [vmem:[#allocation2 + $0x60] sm:$0xff] %vm199_vm7, %v5180_v48  ;;  %5805 = vst.msk [vmem:[#allocation2 + $0x58] sm:$0xff] %vm199_vm7, %v5773_v40  ;;  %v5181_v41 = vadd.f32 %v5092_v7, %v4475_v45  ;;  %v4484_v48 = vld [vmem:[#allocation2 + $0xb0] sm:$0xff] }
 0x1fe   : > { %5215 = vst.msk [vmem:[#allocation2 + $0x78] sm:$0xff] %vm199_vm7, %v5183_v54  ;;  %5803 = vst.msk [vmem:[#allocation2 + $0x48] sm:$0xff] %vm199_vm7, %v5771_v34  ;;  %v4482_v54 = vld [vmem:[#allocation2 + $0xa0] sm:$0xff] }
 0x1ff   : > { %5943 = vst.msk [vmem:[%s9027_s29 + $0x38] sm:$0xff] %vm199_vm7, %v5911_v24  ;;  %5213 = vst.msk [vmem:[#allocation2 + $0x68] sm:$0xff] %vm199_vm7, %v5181_v41 }
 0x200   : > { %5941 = vst.msk [vmem:[%s9027_s29 + $0x28] sm:$0xff] %vm199_vm7, %v5909_v23 }
 0x202   : > { %v5836_v9 = vld [vmem:[#allocation2 + $0x50] sm:$0xff] }
 0x203   : > { %v5875_v4 = vmul.f32 %v9011_v0, %v5836_v9  ;;  %v5834_v12 = vld [vmem:[#allocation2 + $0x40] sm:$0xff]  ;;  %v5294_v36 = vld [vmem:[#allocation2 + $0x70] sm:$0xff]  ;;  %v4485_v9 = vld [vmem:[#allocation2 + $0xb8] sm:$0xff] }
 0x204   : > { %v5873_v29 = vmul.f32 %v9011_v0, %v5834_v12  ;;  %v5837_v21 = vld [vmem:[#allocation2 + $0x58] sm:$0xff]  ;;  %v5292_v10 = vld [vmem:[#allocation2 + $0x60] sm:$0xff] }
 0x205   : > { %v5914_v58 = vadd.f32 %v9018_v30, %v5875_v4  ;;  %v5876_v33 = vmul.f32 %v9011_v0, %v5837_v21  ;;  %v5835_v11 = vld [vmem:[#allocation2 + $0x48] sm:$0xff]  ;;  %v5295_v22 = vld [vmem:[#allocation2 + $0x78] sm:$0xff] }
 0x206   : > { %v5912_v61 = vadd.f32 %v9018_v30, %v5873_v29  ;;  %v5874_v14 = vmul.f32 %v9011_v0, %v5835_v11  ;;  %v7214_v38 = vpop.f32.mrb[128].mxu1  ;;  %v7250_v49 = vpop.f32.mrb[124].mxu0  ;;  %v5293_v27 = vld [vmem:[#allocation2 + $0x68] sm:$0xff] }
 0x207   : > { %5946 = vst.msk [vmem:[%s9027_s29 + $0x50] sm:$0xff] %vm199_vm7, %v5914_v58  ;;  %v5915_v13 = vadd.f32 %v9018_v30, %v5876_v33  ;;  %v5186_v47 = vadd.f32 %v7214_v38, %v4480_v37  ;;  %v5776_v26 = vadd.f32 %v7250_v49, %v5294_v36  ;;  %v5105_v16 = vpop.f32.mrb[129].mxu1  ;;  %v5683_v62 = vpop.f32.mrb[125].mxu0  ;;  %v4483_v36 = vld [vmem:[#allocation2 + $0xa8] sm:$0xff] }
 0x208   : > { %5944 = vst.msk [vmem:[%s9027_s29 + $0x40] sm:$0xff] %vm199_vm7, %v5912_v61  ;;  %v5913_v46 = vadd.f32 %v9018_v30, %v5874_v14  ;;  %v5184_v31 = vadd.f32 %v5105_v16, %v4478_v53  ;;  %v5774_v50 = vadd.f32 %v5683_v62, %v5292_v10  ;;  %v7215_v44 = vpop.f32.mrb[130].mxu1  ;;  %v7251_v51 = vpop.f32.mrb[126].mxu0 }
 0x209   : > { %5947 = vst.msk [vmem:[%s9027_s29 + $0x58] sm:$0xff] %vm199_vm7, %v5915_v13  ;;  %5218 = vst.msk [vmem:[#allocation2 + $0x90] sm:$0xff] %vm199_vm7, %v5186_v47  ;;  %v5187_v6 = vadd.f32 %v7215_v44, %v4481_v39  ;;  %v5777_v35 = vadd.f32 %v7251_v51, %v5295_v22  ;;  %v5108_v28 = vpop.f32.mrb[131].mxu1  ;;  %v5686_v1 = vpop.f32.mrb[127].mxu0 }
 0x20a   : > { %5808 = vst.msk [vmem:[#allocation2 + $0x70] sm:$0xff] %vm199_vm7, %v5776_v26  ;;  %5945 = vst.msk [vmem:[%s9027_s29 + $0x48] sm:$0xff] %vm199_vm7, %v5913_v46  ;;  %v5185_v5 = vadd.f32 %v5108_v28, %v4479_v59  ;;  %v5775_v18 = vadd.f32 %v5686_v1, %v5293_v27  ;;  %v4488_v27 = vld [vmem:[#allocation2 + $0xd0] sm:$0xff] }
 0x20b   : > { %5216 = vst.msk [vmem:[#allocation2 + $0x80] sm:$0xff] %vm199_vm7, %v5184_v31  ;;  %5806 = vst.msk [vmem:[#allocation2 + $0x60] sm:$0xff] %vm199_vm7, %v5774_v50 }
 0x20c   : > { %5219 = vst.msk [vmem:[#allocation2 + $0x98] sm:$0xff] %vm199_vm7, %v5187_v6  ;;  %5809 = vst.msk [vmem:[#allocation2 + $0x78] sm:$0xff] %vm199_vm7, %v5777_v35  ;;  %v4486_v6 = vld [vmem:[#allocation2 + $0xc0] sm:$0xff] }
 0x20d   : > { %5217 = vst.msk [vmem:[#allocation2 + $0x88] sm:$0xff] %vm199_vm7, %v5185_v5  ;;  %5807 = vst.msk [vmem:[#allocation2 + $0x68] sm:$0xff] %vm199_vm7, %v5775_v18 }
 0x210   : > { %v5298_v42 = vld [vmem:[#allocation2 + $0x90] sm:$0xff] }
 0x211   : > { %v5840_v15 = vld [vmem:[#allocation2 + $0x70] sm:$0xff] }
 0x212   : > { %v5879_v55 = vmul.f32 %v9011_v0, %v5840_v15  ;;  %v5838_v52 = vld [vmem:[#allocation2 + $0x60] sm:$0xff]  ;;  %v4489_v15 = vld [vmem:[#allocation2 + $0xd8] sm:$0xff] }
 0x213   : > { %v5877_v56 = vmul.f32 %v9011_v0, %v5838_v52  ;;  %v5841_v3 = vld [vmem:[#allocation2 + $0x78] sm:$0xff]  ;;  %v5296_v43 = vld [vmem:[#allocation2 + $0x80] sm:$0xff] }
 0x214   : > { %v5918_v60 = vadd.f32 %v9018_v30, %v5879_v55  ;;  %v5880_v17 = vmul.f32 %v9011_v0, %v5841_v3  ;;  %v5839_v57 = vld [vmem:[#allocation2 + $0x68] sm:$0xff]  ;;  %v7254_v2 = vpop.f32.mrb[128].mxu0  ;;  %v5299_v40 = vld [vmem:[#allocation2 + $0x98] sm:$0xff] }
 0x215   : > { %v5916_v32 = vadd.f32 %v9018_v30, %v5877_v56  ;;  %v5878_v63 = vmul.f32 %v9011_v0, %v5839_v57  ;;  %v7218_v8 = vpop.f32.mrb[132].mxu1  ;;  %v5780_v19 = vadd.f32 %v7254_v2, %v5298_v42  ;;  %v5699_v7 = vpop.f32.mrb[129].mxu0  ;;  %v5297_v34 = vld [vmem:[#allocation2 + $0x88] sm:$0xff] }
 0x216   : > { %5950 = vst.msk [vmem:[%s9027_s29 + $0x70] sm:$0xff] %vm199_vm7, %v5918_v60  ;;  %v5919_v25 = vadd.f32 %v9018_v30, %v5880_v17  ;;  %v5190_v20 = vadd.f32 %v7218_v8, %v4484_v48  ;;  %v5121_v45 = vpop.f32.mrb[133].mxu1  ;;  %v5778_v23 = vadd.f32 %v5699_v7, %v5296_v43  ;;  %v7255_v12 = vpop.f32.mrb[130].mxu0  ;;  %v4487_v42 = vld [vmem:[#allocation2 + $0xc8] sm:$0xff] }
 0x217   : > { %5948 = vst.msk [vmem:[%s9027_s29 + $0x60] sm:$0xff] %vm199_vm7, %v5916_v32  ;;  %v5917_v24 = vadd.f32 %v9018_v30, %v5878_v63  ;;  %v5188_v41 = vadd.f32 %v5121_v45, %v4482_v54  ;;  %v7219_v4 = vpop.f32.mrb[134].mxu1  ;;  %5812 = vst.msk [vmem:[#allocation2 + $0x90] sm:$0xff] %vm199_vm7, %v5780_v19  ;;  %v5781_v21 = vadd.f32 %v7255_v12, %v5299_v40  ;;  %v5702_v33 = vpop.f32.mrb[131].mxu0 }
 0x218   : > { %5951 = vst.msk [vmem:[%s9027_s29 + $0x78] sm:$0xff] %vm199_vm7, %v5919_v25  ;;  %5222 = vst.msk [vmem:[#allocation2 + $0xb0] sm:$0xff] %vm199_vm7, %v5190_v20  ;;  %v5191_v29 = vadd.f32 %v7219_v4, %v4485_v9  ;;  %v5124_v58 = vpop.f32.mrb[135].mxu1  ;;  %v5779_v10 = vadd.f32 %v5702_v33, %v5297_v34  ;;  %v4492_v34 = vld [vmem:[#allocation2 + $0xf0] sm:$0xff] }
 0x219   : > { %5949 = vst.msk [vmem:[%s9027_s29 + $0x68] sm:$0xff] %vm199_vm7, %v5917_v24  ;;  %5220 = vst.msk [vmem:[#allocation2 + $0xa0] sm:$0xff] %vm199_vm7, %v5188_v41  ;;  %v5189_v11 = vadd.f32 %v5124_v58, %v4483_v36 }
 0x21a   : > { %5810 = vst.msk [vmem:[#allocation2 + $0x80] sm:$0xff] %vm199_vm7, %v5778_v23  ;;  %5223 = vst.msk [vmem:[#allocation2 + $0xb8] sm:$0xff] %vm199_vm7, %v5191_v29  ;;  %v4490_v29 = vld [vmem:[#allocation2 + $0xe0] sm:$0xff] }
 0x21b   : > { %5813 = vst.msk [vmem:[#allocation2 + $0x98] sm:$0xff] %vm199_vm7, %v5781_v21  ;;  %5221 = vst.msk [vmem:[#allocation2 + $0xa8] sm:$0xff] %vm199_vm7, %v5189_v11 }
 0x21c   : > { %5811 = vst.msk [vmem:[#allocation2 + $0x88] sm:$0xff] %vm199_vm7, %v5779_v10 }
 0x21e   : > { %v5844_v61 = vld [vmem:[#allocation2 + $0x90] sm:$0xff] }
 0x21f   : > { %v5883_v14 = vmul.f32 %v9011_v0, %v5844_v61  ;;  %v5302_v22 = vld [vmem:[#allocation2 + $0xb0] sm:$0xff]  ;;  %v4493_v61 = vld [vmem:[#allocation2 + $0xf8] sm:$0xff] }
 0x220   : > { %v5300_v53 = vld [vmem:[#allocation2 + $0xa0] sm:$0xff] }
 0x221   : > { %v5842_v37 = vld [vmem:[#allocation2 + $0x80] sm:$0xff]  ;;  %v5922_v13 = vadd.f32 %v9018_v30, %v5883_v14  ;;  %v5303_v50 = vld [vmem:[#allocation2 + $0xb8] sm:$0xff] }
 0x222   : > { %v5881_v38 = vmul.f32 %v9011_v0, %v5842_v37  ;;  %v5845_v49 = vld [vmem:[#allocation2 + $0x98] sm:$0xff]  ;;  %v7258_v31 = vpop.f32.mrb[132].mxu0  ;;  %v5301_v28 = vld [vmem:[#allocation2 + $0xa8] sm:$0xff] }
 0x223   : > { %v5884_v47 = vmul.f32 %v9011_v0, %v5845_v49  ;;  %v5843_v26 = vld [vmem:[#allocation2 + $0x88] sm:$0xff]  ;;  %v7222_v46 = vpop.f32.mrb[136].mxu1  ;;  %5954 = vst.msk [vmem:[%s9027_s29 + $0x90] sm:$0xff] %vm199_vm7, %v5922_v13  ;;  %v5784_v51 = vadd.f32 %v7258_v31, %v5302_v22  ;;  %v5715_v59 = vpop.f32.mrb[133].mxu0 }
 0x224   : > { %v5920_v16 = vadd.f32 %v9018_v30, %v5881_v38  ;;  %v5882_v62 = vmul.f32 %v9011_v0, %v5843_v26  ;;  %v5194_v44 = vadd.f32 %v7222_v46, %v4488_v27  ;;  %v5137_v35 = vpop.f32.mrb[137].mxu1  ;;  %v5782_v18 = vadd.f32 %v5715_v59, %v5300_v53  ;;  %v7259_v52 = vpop.f32.mrb[134].mxu0  ;;  %v4491_v22 = vld [vmem:[#allocation2 + $0xe8] sm:$0xff] }
 0x225   : > { %v5923_v39 = vadd.f32 %v9018_v30, %v5884_v47  ;;  %v5192_v5 = vadd.f32 %v5137_v35, %v4486_v6  ;;  %v7223_v55 = vpop.f32.mrb[138].mxu1  ;;  %5816 = vst.msk [vmem:[#allocation2 + $0xb0] sm:$0xff] %vm199_vm7, %v5784_v51  ;;  %v5785_v3 = vadd.f32 %v7259_v52, %v5303_v50  ;;  %v5718_v17 = vpop.f32.mrb[135].mxu0 }
 0x226   : > { %5952 = vst.msk [vmem:[%s9027_s29 + $0x80] sm:$0xff] %vm199_vm7, %v5920_v16  ;;  %v5921_v1 = vadd.f32 %v9018_v30, %v5882_v62  ;;  %5226 = vst.msk [vmem:[#allocation2 + $0xd0] sm:$0xff] %vm199_vm7, %v5194_v44  ;;  %v5195_v56 = vadd.f32 %v7223_v55, %v4489_v15  ;;  %v5140_v60 = vpop.f32.mrb[139].mxu1  ;;  %v5783_v43 = vadd.f32 %v5718_v17, %v5301_v28 }
 0x227   : > { %5955 = vst.msk [vmem:[%s9027_s29 + $0x98] sm:$0xff] %vm199_vm7, %v5923_v39  ;;  %5224 = vst.msk [vmem:[#allocation2 + $0xc0] sm:$0xff] %vm199_vm7, %v5192_v5  ;;  %v5193_v57 = vadd.f32 %v5140_v60, %v4487_v42 }
 0x228   : > { %5953 = vst.msk [vmem:[%s9027_s29 + $0x88] sm:$0xff] %vm199_vm7, %v5921_v1  ;;  %5814 = vst.msk [vmem:[#allocation2 + $0xa0] sm:$0xff] %vm199_vm7, %v5782_v18 }
 0x229   : > { %5227 = vst.msk [vmem:[#allocation2 + $0xd8] sm:$0xff] %vm199_vm7, %v5195_v56  ;;  %5817 = vst.msk [vmem:[#allocation2 + $0xb8] sm:$0xff] %vm199_vm7, %v5785_v3 }
 0x22a   : > { %5225 = vst.msk [vmem:[#allocation2 + $0xc8] sm:$0xff] %vm199_vm7, %v5193_v57  ;;  %5815 = vst.msk [vmem:[#allocation2 + $0xa8] sm:$0xff] %vm199_vm7, %v5783_v43 }
 0x22c   : > { %v5848_v32 = vld [vmem:[#allocation2 + $0xb0] sm:$0xff] }
 0x22d   : > { %v5887_v63 = vmul.f32 %v9011_v0, %v5848_v32  ;;  %v5306_v40 = vld [vmem:[#allocation2 + $0xd0] sm:$0xff] }
 0x22e   : > { %v5304_v54 = vld [vmem:[#allocation2 + $0xc0] sm:$0xff] }
 0x22f   : > { %v5846_v48 = vld [vmem:[#allocation2 + $0xa0] sm:$0xff]  ;;  %v5926_v25 = vadd.f32 %v9018_v30, %v5887_v63 }
 0x230   : > { %v5885_v8 = vmul.f32 %v9011_v0, %v5846_v48  ;;  %v5849_v2 = vld [vmem:[#allocation2 + $0xb8] sm:$0xff]  ;;  %v7262_v41 = vpop.f32.mrb[136].mxu0 }
 0x231   : > { %v5888_v20 = vmul.f32 %v9011_v0, %v5849_v2  ;;  %v5847_v19 = vld [vmem:[#allocation2 + $0xa8] sm:$0xff]  ;;  %v7226_v24 = vpop.f32.mrb[140].mxu1  ;;  %v5307_v23 = vld [vmem:[#allocation2 + $0xd8] sm:$0xff]  ;;  %5958 = vst.msk [vmem:[%s9027_s29 + $0xb0] sm:$0xff] %vm199_vm7, %v5926_v25  ;;  %v5788_v12 = vadd.f32 %v7262_v41, %v5306_v40  ;;  %v5731_v36 = vpop.f32.mrb[137].mxu0 }
 0x232   : > { %v5924_v45 = vadd.f32 %v9018_v30, %v5885_v8  ;;  %v5886_v7 = vmul.f32 %v9011_v0, %v5847_v19  ;;  %v5198_v4 = vadd.f32 %v7226_v24, %v4492_v34  ;;  %v5153_v21 = vpop.f32.mrb[141].mxu1  ;;  %v5305_v58 = vld [vmem:[#allocation2 + $0xc8] sm:$0xff]  ;;  %v5786_v10 = vadd.f32 %v5731_v36, %v5304_v54  ;;  %v7263_v37 = vpop.f32.mrb[138].mxu0 }
 0x233   : > { %v5927_v9 = vadd.f32 %v9018_v30, %v5888_v20  ;;  %v5196_v11 = vadd.f32 %v5153_v21, %v4490_v29  ;;  %v7227_v14 = vpop.f32.mrb[142].mxu1  ;;  %5820 = vst.msk [vmem:[#allocation2 + $0xd0] sm:$0xff] %vm199_vm7, %v5788_v12  ;;  %v5789_v49 = vadd.f32 %v7263_v37, %v5307_v23  ;;  %v5734_v47 = vpop.f32.mrb[139].mxu0 }
 0x234   : > { %5956 = vst.msk [vmem:[%s9027_s29 + $0xa0] sm:$0xff] %vm199_vm7, %v5924_v45  ;;  %v5925_v33 = vadd.f32 %v9018_v30, %v5886_v7  ;;  %5230 = vst.msk [vmem:[#allocation2 + $0xf0] sm:$0xff] %vm199_vm7, %v5198_v4  ;;  %v5199_v38 = vadd.f32 %v7227_v14, %v4493_v61  ;;  %v5156_v13 = vpop.f32.mrb[143].mxu1  ;;  %v5787_v53 = vadd.f32 %v5734_v47, %v5305_v58 }
 0x235   : > { %5959 = vst.msk [vmem:[%s9027_s29 + $0xb8] sm:$0xff] %vm199_vm7, %v5927_v9  ;;  %5228 = vst.msk [vmem:[#allocation2 + $0xe0] sm:$0xff] %vm199_vm7, %v5196_v11  ;;  %v5197_v26 = vadd.f32 %v5156_v13, %v4491_v22 }
 0x236   : > { %5957 = vst.msk [vmem:[%s9027_s29 + $0xa8] sm:$0xff] %vm199_vm7, %v5925_v33  ;;  %5818 = vst.msk [vmem:[#allocation2 + $0xc0] sm:$0xff] %vm199_vm7, %v5786_v10 }
 0x237   : > { %5231 = vst.msk [vmem:[#allocation2 + $0xf8] sm:$0xff] %vm199_vm7, %v5199_v38  ;;  %5821 = vst.msk [vmem:[#allocation2 + $0xd8] sm:$0xff] %vm199_vm7, %v5789_v49 }
 0x238   : > { %5229 = vst.msk [vmem:[#allocation2 + $0xe8] sm:$0xff] %vm199_vm7, %v5197_v26  ;;  %5819 = vst.msk [vmem:[#allocation2 + $0xc8] sm:$0xff] %vm199_vm7, %v5787_v53  ;;  %v7266_v16 = vpop.f32.mrb[140].mxu0 }
 0x239   : > { %v5747_v62 = vpop.f32.mrb[141].mxu0 }
 0x23a   : > { %v5852_v27 = vld [vmem:[#allocation2 + $0xd0] sm:$0xff]  ;;  %v7267_v31 = vpop.f32.mrb[142].mxu0 }
 0x23b   : > { %v5310_v46 = vld [vmem:[#allocation2 + $0xf0] sm:$0xff]  ;;  %v5891_v50 = vmul.f32 %v9011_v0, %v5852_v27  ;;  %v5750_v6 = vpop.f32.mrb[143].mxu0 }
 0x23c   : > { %v5792_v44 = vadd.f32 %v7266_v16, %v5310_v46  ;;  %v5308_v51 = vld [vmem:[#allocation2 + $0xe0] sm:$0xff] }
 0x23d   : > { %v5850_v39 = vld [vmem:[#allocation2 + $0xc0] sm:$0xff]  ;;  %v5790_v28 = vadd.f32 %v5747_v62, %v5308_v51  ;;  %v5930_v5 = vadd.f32 %v9018_v30, %v5891_v50 }
 0x23e   : > { %v5889_v35 = vmul.f32 %v9011_v0, %v5850_v39  ;;  %v5853_v59 = vld [vmem:[#allocation2 + $0xd8] sm:$0xff]  ;;  %5824 = vst.msk [vmem:[#allocation2 + $0xf0] sm:$0xff] %vm199_vm7, %v5792_v44 }
 0x23f   : > { %v5311_v1 = vld [vmem:[#allocation2 + $0xf8] sm:$0xff]  ;;  %v5892_v18 = vmul.f32 %v9011_v0, %v5853_v59  ;;  %v5851_v15 = vld [vmem:[#allocation2 + $0xc8] sm:$0xff]  ;;  %5822 = vst.msk [vmem:[#allocation2 + $0xe0] sm:$0xff] %vm199_vm7, %v5790_v28  ;;  %5962 = vst.msk [vmem:[%s9027_s29 + $0xd0] sm:$0xff] %vm199_vm7, %v5930_v5 }
 0x240   : > { %v5793_v55 = vadd.f32 %v7267_v31, %v5311_v1  ;;  %v5309_v52 = vld [vmem:[#allocation2 + $0xe8] sm:$0xff]  ;;  %v5928_v56 = vadd.f32 %v9018_v30, %v5889_v35  ;;  %v5890_v3 = vmul.f32 %v9011_v0, %v5851_v15 }
 0x241   : > { %v5791_v42 = vadd.f32 %v5750_v6, %v5309_v52  ;;  %v5931_v60 = vadd.f32 %v9018_v30, %v5892_v18 }
 0x242   : > { %5825 = vst.msk [vmem:[#allocation2 + $0xf8] sm:$0xff] %vm199_vm7, %v5793_v55  ;;  %5960 = vst.msk [vmem:[%s9027_s29 + $0xc0] sm:$0xff] %vm199_vm7, %v5928_v56  ;;  %v5929_v17 = vadd.f32 %v9018_v30, %v5890_v3 }
 0x243   : > { %5823 = vst.msk [vmem:[#allocation2 + $0xe8] sm:$0xff] %vm199_vm7, %v5791_v42  ;;  %5963 = vst.msk [vmem:[%s9027_s29 + $0xd8] sm:$0xff] %vm199_vm7, %v5931_v60 }
 0x244   : > { %5961 = vst.msk [vmem:[%s9027_s29 + $0xc8] sm:$0xff] %vm199_vm7, %v5929_v17 }
 0x245   : > { %v5856_v57 = vld [vmem:[#allocation2 + $0xf0] sm:$0xff] }
 0x246   : > { %v5895_v43 = vmul.f32 %v9011_v0, %v5856_v57  ;;  %v5854_v32 = vld [vmem:[#allocation2 + $0xe0] sm:$0xff] }
 0x247   : > { %v5893_v63 = vmul.f32 %v9011_v0, %v5854_v32 }
 0x248   : > { %v5934_v8 = vadd.f32 %v9018_v30, %v5895_v43 }
 0x249   : > { %v5857_v48 = vld [vmem:[#allocation2 + $0xf8] sm:$0xff]  ;;  %v5932_v25 = vadd.f32 %v9018_v30, %v5893_v63 }
 0x24a   : > { %v5896_v2 = vmul.f32 %v9011_v0, %v5857_v48  ;;  %v5855_v40 = vld [vmem:[#allocation2 + $0xe8] sm:$0xff]  ;;  %5966 = vst.msk [vmem:[%s9027_s29 + $0xf0] sm:$0xff] %vm199_vm7, %v5934_v8 }
 0x24b   : > { %v5894_v20 = vmul.f32 %v9011_v0, %v5855_v40  ;;  %5964 = vst.msk [vmem:[%s9027_s29 + $0xe0] sm:$0xff] %vm199_vm7, %v5932_v25 }
 0x24c   : > { %v5935_v19 = vadd.f32 %v9018_v30, %v5896_v2 }
 0x24d   : > { %v5933_v54 = vadd.f32 %v9018_v30, %v5894_v20 }
 0x24e   : > { %5967 = vst.msk [vmem:[%s9027_s29 + $0xf8] sm:$0xff] %vm199_vm7, %v5935_v19 }
 0x24f   : > { %5965 = vst.msk [vmem:[%s9027_s29 + $0xe8] sm:$0xff] %vm199_vm7, %v5933_v54 }
 0x250 PF: > { %s14_s15 = sadd.s32 1, %s7376_s15  }
 0x251   : > { %p11_p4 = scmp.ge.s32.totalorder %s14_s15, 4  }
 0x253   :  { %13 = sbr.rel (!%p11_p4) target bundleno = 1 (0x1), region = 76 }

</bundles_post_ra>
